<compile_context>
chip_gen: v7x
topology: tpu7x:2x2x1
jax: 0.10.0
libtpu: 0.0.40
codegen_flags: <defaults>
</compile_context>

<pallas_src>
import functools

import jax
import jax.numpy as jnp
from jax.experimental import pallas as pl
from jax.experimental.pallas import tpu as pltpu

_MID = 64  # hidden channel width of DnCnn


def _dncnn_kernel(xp_ref, xres_ref, w_ref, b_ref, o_ref, buf0, buf1,
                  *, H, W, channel, layers, mid):
    """One grid step = one (batch element, layer) pair.

    xp_ref   : (1, H+2, W+2, mid)  bf16  zero-padded, channel-padded input
    xres_ref : (1, H, W, channel)  f32   raw input for the residual add
    w_ref    : (1, 9*mid, mid)     bf16  this layer's flattened HWIO weights
    b_ref    : (1, 1, mid)         f32   this layer's bias (padded)
    o_ref    : (1, H, W, channel)         output (written at the last layer)
    buf0/buf1: (H+2, W+2, mid)     f32   ping-pong activation buffers (VMEM)
    """
    l = pl.program_id(1)
    last = layers - 1

    def conv(read_slice):
        # im2col -> one deep MXU matmul with K = 9*mid, f32 accumulation.
        cols = [read_slice(kh, kw).astype(jnp.bfloat16).reshape(H * W, mid)
                for kh in range(3) for kw in range(3)]
        patch = jnp.concatenate(cols, axis=-1)              # (H*W, 9*mid) bf16
        acc = jnp.dot(patch, w_ref[0],
                      preferred_element_type=jnp.float32)    # (H*W, mid) f32
        return acc + b_ref[0]                                # bias in f32

    def store_hidden(dst, acc):
        h = jnp.maximum(acc, 0.0).astype(dst.dtype).reshape(H, W, mid)
        dst[1:H + 1, 1:W + 1, :] = h                         # interior only

    # ---- layer 0 of each batch element: init halos + load the input --------
    @pl.when(l == 0)
    def _():
        buf0[...] = jnp.zeros_like(buf0)                     # zero halo (once)
        buf1[...] = xp_ref[0].astype(buf1.dtype)             # padded input

    # ---- hidden layers: ping-pong.  layer l reads buf[(l+1)%2], writes -----
    # ---- buf[l%2]; halos stay zero because only interiors are written. -----
    @pl.when((l < last) & (l % 2 == 0))
    def _():
        store_hidden(buf0, conv(lambda kh, kw: buf1[kh:kh + H, kw:kw + W, :]))

    @pl.when((l < last) & (l % 2 == 1))
    def _():
        store_hidden(buf1, conv(lambda kh, kw: buf0[kh:kh + H, kw:kw + W, :]))

    # ---- last layer: no ReLU, drop padded channels, fuse "+ x" in f32 ------
    @pl.when(l == last)
    def _():
        src = buf1 if last % 2 == 0 else buf0                # static choice
        acc = conv(lambda kh, kw: src[kh:kh + H, kw:kw + W, :])
        out = acc.reshape(H, W, mid)[:, :, :channel]
        out = out + xres_ref[0].astype(jnp.float32)
        o_ref[0] = out.astype(o_ref.dtype)


def dncnn_forward(params, x_nchw):
    """DnCnn forward.  Accepts/returns NCHW exactly like the PyTorch module."""
    n_layers = len(params)
    assert n_layers >= 2
    N, C, H, W = x_nchw.shape
    assert C <= _MID

    x_nhwc = jnp.transpose(x_nchw, (0, 2, 3, 1))             # (N, H, W, C)

    # Input: cast to bf16, one small pad (spatial halo + channel pad to 64).
    xp0 = jnp.pad(x_nhwc.astype(jnp.bfloat16),
                  ((0, 0), (1, 1), (1, 1), (0, _MID - C)))   # (N,H+2,W+2,64)

    # Weights: pad every layer to 64->64, flatten taps to (9*64, 64), bf16.
    ws, bs = [], []
    for w, b in params:
        cin, cout = w.shape[2], w.shape[3]
        w = jnp.pad(w, ((0, 0), (0, 0), (0, _MID - cin), (0, _MID - cout)))
        b = jnp.pad(b, ((0, _MID - cout),))
        ws.append(w.reshape(9 * _MID, _MID))
        bs.append(b)
    w_all = jnp.stack(ws).astype(jnp.bfloat16)               # (L, 576, 64)
    b_all = jnp.stack(bs).astype(jnp.float32).reshape(n_layers, 1, _MID)

    kernel = functools.partial(_dncnn_kernel, H=H, W=W, channel=C,
                               layers=n_layers, mid=_MID)

    out_nhwc = pl.pallas_call(
        kernel,
        out_shape=jax.ShapeDtypeStruct((N, H, W, C), x_nchw.dtype),
        grid=(N, n_layers),
        in_specs=[
            pl.BlockSpec((1, H + 2, W + 2, _MID), lambda n, l: (n, 0, 0, 0)),
            pl.BlockSpec((1, H, W, C), lambda n, l: (n, 0, 0, 0)),
            pl.BlockSpec((1, 9 * _MID, _MID), lambda n, l: (l, 0, 0)),
            pl.BlockSpec((1, 1, _MID), lambda n, l: (l, 0, 0)),
        ],
        out_specs=pl.BlockSpec((1, H, W, C), lambda n, l: (n, 0, 0, 0)),
        scratch_shapes=[
            pltpu.VMEM((H + 2, W + 2, _MID), jnp.float32),   # ping
            pltpu.VMEM((H + 2, W + 2, _MID), jnp.float32),   # pong
        ],
        compiler_params=pltpu.CompilerParams(
            dimension_semantics=("parallel", "arbitrary")),
    )(xp0, x_nhwc, w_all, b_all)

    return jnp.transpose(out_nhwc, (0, 3, 1, 2))


def init_dncnn_params(key, channel, layers):
    """Deterministic parameter init.  Weights in HWIO layout (3,3,Cin,Cout)."""
    dims = [(channel, _MID)] + [(_MID, _MID)] * (layers - 2) + [(_MID, channel)]
    params = []
    for i, (cin, cout) in enumerate(dims):
        kw_, kb_ = jax.random.split(jax.random.fold_in(key, i))
        fan_in = 3 * 3 * cin
        w = jax.random.normal(kw_, (3, 3, cin, cout), jnp.float32)
        w = w * (2.0 / fan_in) ** 0.5
        b = 0.01 * jax.random.normal(kb_, (cout,), jnp.float32)
        params.append((w, b))
    return params


def _dncnn_reference(params, x_nchw):
    """Pure-JAX (XLA) f32 reference matching the PyTorch module."""
    x = jnp.transpose(x_nchw, (0, 2, 3, 1))
    h = x
    dn = ('NHWC', 'HWIO', 'NHWC')
    for i, (w, b) in enumerate(params):
        h = jax.lax.conv_general_dilated(h, w, (1, 1), 'SAME',
                                         dimension_numbers=dn) + b
        if i < len(params) - 1:
            h = jnp.maximum(h, 0.0)
    h = h + x
    return jnp.transpose(h, (0, 3, 1, 2))


if __name__ == "__main__":
    key = jax.random.PRNGKey(0)
    channel, layers, bn = 4, 5, False
    N, H, W = 2, 16, 16

    params = init_dncnn_params(jax.random.fold_in(key, 1000), channel, layers)
    x = jax.random.normal(jax.random.fold_in(key, 2000),
                          (N, channel, H, W), jnp.float32)

    out = jax.jit(dncnn_forward)(params, x)
    out = jax.block_until_ready(out)
    assert out.shape == (N, channel, H, W)
    assert jnp.all(jnp.isfinite(out))

    # Correctness vs f32 XLA reference (kernel uses bf16 MXU operands, so a
    # generous tolerance is used; structural bugs would be O(1) errors).
    ref = _dncnn_reference(params, x)
    max_err = float(jnp.max(jnp.abs(out - ref)))
    assert max_err < 0.5, f"mismatch vs reference: {max_err}"

    print("KERNEL_OK")
</pallas_src>

<mosaic_0001>
module attributes {stable_mosaic.version = 11 : i64} {
  func.func @_dncnn_kernel(%arg0: i32, %arg1: i32, %arg2: memref<1x18x18x64xbf16, #tpu.memory_space<vmem>>, %arg3: memref<1x16x16x4xf32, #tpu.memory_space<vmem>>, %arg4: memref<1x576x64xbf16, #tpu.memory_space<vmem>>, %arg5: memref<1x1x64xf32, #tpu.memory_space<vmem>>, %arg6: memref<1x16x16x4xf32, #tpu.memory_space<vmem>>, %arg7: memref<18x18x64xf32, #tpu.memory_space<vmem>>, %arg8: memref<18x18x64xf32, #tpu.memory_space<vmem>>) attributes {dimension_semantics = [#tpu.dimension_semantics<parallel>, #tpu.dimension_semantics<arbitrary>], iteration_bounds = array<i64: 2, 5>, scalar_prefetch = 0 : i64, scratch_operands = 2 : i64, tpu.core_type = #tpu.core_type<tc>, window_params = [{transform_indices = @transform_0, window_bounds = array<i64: 1, 18, 18, 64>}, {transform_indices = @transform_1, window_bounds = array<i64: 1, 16, 16, 4>}, {transform_indices = @transform_2, window_bounds = array<i64: 1, 576, 64>}, {transform_indices = @transform_3, window_bounds = array<i64: 1, 1, 64>}, {transform_indices = @transform_4, window_bounds = array<i64: 1, 16, 16, 4>}]} {
    %c0_i32 = arith.constant 0 : i32
    %0 = arith.cmpi eq, %arg1, %c0_i32 : i32
    %1 = arith.extui %0 : i1 to i32
    %c0_i32_0 = arith.constant 0 : i32
    %2 = arith.cmpi ne, %1, %c0_i32_0 : i32
    scf.if %2 {
      %cst = arith.constant 0.000000e+00 : f32
      %36 = vector.broadcast %cst : f32 to vector<18x18x64xf32>
      %c0 = arith.constant 0 : index
      %c0_18 = arith.constant 0 : index
      %c0_19 = arith.constant 0 : index
      %37 = vector.load %arg7[%c0, %c0_18, %c0_19] : memref<18x18x64xf32, #tpu.memory_space<vmem>>, vector<18x18x64xf32>
      tpu.vector_store %arg7[%c0, %c0_18, %c0_19], %36 {strides = array<i32>} : memref<18x18x64xf32, #tpu.memory_space<vmem>>, vector<18x18x64xf32>,
      %c0_20 = arith.constant 0 : index
      %c0_21 = arith.constant 0 : index
      %c0_22 = arith.constant 0 : index
      %c0_23 = arith.constant 0 : index
      %38 = vector.load %arg2[%c0_20, %c0_21, %c0_22, %c0_23] : memref<1x18x18x64xbf16, #tpu.memory_space<vmem>>, vector<1x18x18x64xbf16>
      %39 = vector.shape_cast %38 : vector<1x18x18x64xbf16> to vector<18x18x64xbf16>
      %40 = arith.extf %39 : vector<18x18x64xbf16> to vector<18x18x64xf32>
      %c0_24 = arith.constant 0 : index
      %c0_25 = arith.constant 0 : index
      %c0_26 = arith.constant 0 : index
      %41 = vector.load %arg8[%c0_24, %c0_25, %c0_26] : memref<18x18x64xf32, #tpu.memory_space<vmem>>, vector<18x18x64xf32>
      tpu.vector_store %arg8[%c0_24, %c0_25, %c0_26], %40 {strides = array<i32>} : memref<18x18x64xf32, #tpu.memory_space<vmem>>, vector<18x18x64xf32>,
    } else {
    }
    %c4_i32 = arith.constant 4 : i32
    %3 = arith.cmpi slt, %arg1, %c4_i32 : i32
    %c2_i32 = arith.constant 2 : i32
    %c0_i32_1 = arith.constant 0 : i32
    %4 = arith.cmpi eq, %c2_i32, %c0_i32_1 : i32
    %c1_i32 = arith.constant 1 : i32
    %5 = arith.select %4, %c1_i32, %c2_i32 : i32
    %6 = arith.remsi %arg1, %5 : i32
    %c0_i32_2 = arith.constant 0 : i32
    %7 = arith.cmpi ne, %6, %c0_i32_2 : i32
    %c0_i32_3 = arith.constant 0 : i32
    %8 = arith.cmpi slt, %6, %c0_i32_3 : i32
    %c0_i32_4 = arith.constant 0 : i32
    %9 = arith.cmpi slt, %5, %c0_i32_4 : i32
    %10 = arith.xori %8, %9 : i1
    %11 = arith.andi %10, %7 : i1
    %12 = arith.addi %6, %5 : i32
    %13 = arith.select %11, %12, %6 : i32
    %c0_i32_5 = arith.constant 0 : i32
    %14 = arith.cmpi eq, %13, %c0_i32_5 : i32
    %15 = arith.andi %3, %14 : i1
    %16 = arith.extui %15 : i1 to i32
    %c0_i32_6 = arith.constant 0 : i32
    %17 = arith.cmpi ne, %16, %c0_i32_6 : i32
    scf.if %17 {
      %c0 = arith.constant 0 : index
      %c0_18 = arith.constant 0 : index
      %c0_19 = arith.constant 0 : index
      %36 = vector.load %arg8[%c0, %c0_18, %c0_19] : memref<18x18x64xf32, #tpu.memory_space<vmem>>, vector<16x16x64xf32>
      %37 = arith.truncf %36 : vector<16x16x64xf32> to vector<16x16x64xbf16>
      %38 = vector.shape_cast %37 : vector<16x16x64xbf16> to vector<256x64xbf16>
      %c0_20 = arith.constant 0 : index
      %c1 = arith.constant 1 : index
      %c0_21 = arith.constant 0 : index
      %39 = vector.load %arg8[%c0_20, %c1, %c0_21] : memref<18x18x64xf32, #tpu.memory_space<vmem>>, vector<16x16x64xf32>
      %40 = arith.truncf %39 : vector<16x16x64xf32> to vector<16x16x64xbf16>
      %41 = vector.shape_cast %40 : vector<16x16x64xbf16> to vector<256x64xbf16>
      %c0_22 = arith.constant 0 : index
      %c2 = arith.constant 2 : index
      %c0_23 = arith.constant 0 : index
      %42 = vector.load %arg8[%c0_22, %c2, %c0_23] : memref<18x18x64xf32, #tpu.memory_space<vmem>>, vector<16x16x64xf32>
      %43 = arith.truncf %42 : vector<16x16x64xf32> to vector<16x16x64xbf16>
      %44 = vector.shape_cast %43 : vector<16x16x64xbf16> to vector<256x64xbf16>
      %c1_24 = arith.constant 1 : index
      %c0_25 = arith.constant 0 : index
      %c0_26 = arith.constant 0 : index
      %45 = vector.load %arg8[%c1_24, %c0_25, %c0_26] : memref<18x18x64xf32, #tpu.memory_space<vmem>>, vector<16x16x64xf32>
      %46 = arith.truncf %45 : vector<16x16x64xf32> to vector<16x16x64xbf16>
      %47 = vector.shape_cast %46 : vector<16x16x64xbf16> to vector<256x64xbf16>
      %c1_27 = arith.constant 1 : index
      %c1_28 = arith.constant 1 : index
      %c0_29 = arith.constant 0 : index
      %48 = vector.load %arg8[%c1_27, %c1_28, %c0_29] : memref<18x18x64xf32, #tpu.memory_space<vmem>>, vector<16x16x64xf32>
      %49 = arith.truncf %48 : vector<16x16x64xf32> to vector<16x16x64xbf16>
      %50 = vector.shape_cast %49 : vector<16x16x64xbf16> to vector<256x64xbf16>
      %c1_30 = arith.constant 1 : index
      %c2_31 = arith.constant 2 : index
      %c0_32 = arith.constant 0 : index
      %51 = vector.load %arg8[%c1_30, %c2_31, %c0_32] : memref<18x18x64xf32, #tpu.memory_space<vmem>>, vector<16x16x64xf32>
      %52 = arith.truncf %51 : vector<16x16x64xf32> to vector<16x16x64xbf16>
      %53 = vector.shape_cast %52 : vector<16x16x64xbf16> to vector<256x64xbf16>
      %c2_33 = arith.constant 2 : index
      %c0_34 = arith.constant 0 : index
      %c0_35 = arith.constant 0 : index
      %54 = vector.load %arg8[%c2_33, %c0_34, %c0_35] : memref<18x18x64xf32, #tpu.memory_space<vmem>>, vector<16x16x64xf32>
      %55 = arith.truncf %54 : vector<16x16x64xf32> to vector<16x16x64xbf16>
      %56 = vector.shape_cast %55 : vector<16x16x64xbf16> to vector<256x64xbf16>
      %c2_36 = arith.constant 2 : index
      %c1_37 = arith.constant 1 : index
      %c0_38 = arith.constant 0 : index
      %57 = vector.load %arg8[%c2_36, %c1_37, %c0_38] : memref<18x18x64xf32, #tpu.memory_space<vmem>>, vector<16x16x64xf32>
      %58 = arith.truncf %57 : vector<16x16x64xf32> to vector<16x16x64xbf16>
      %59 = vector.shape_cast %58 : vector<16x16x64xbf16> to vector<256x64xbf16>
      %c2_39 = arith.constant 2 : index
      %c2_40 = arith.constant 2 : index
      %c0_41 = arith.constant 0 : index
      %60 = vector.load %arg8[%c2_39, %c2_40, %c0_41] : memref<18x18x64xf32, #tpu.memory_space<vmem>>, vector<16x16x64xf32>
      %61 = arith.truncf %60 : vector<16x16x64xf32> to vector<16x16x64xbf16>
      %62 = vector.shape_cast %61 : vector<16x16x64xbf16> to vector<256x64xbf16>
      %63 = tpu.concatenate %38, %41, %44, %47, %50, %53, %56, %59, %62 in 1 : vector<256x64xbf16>, vector<256x64xbf16>, vector<256x64xbf16>, vector<256x64xbf16>, vector<256x64xbf16>, vector<256x64xbf16>, vector<256x64xbf16>, vector<256x64xbf16>, vector<256x64xbf16> -> vector<256x576xbf16>
      %c0_42 = arith.constant 0 : index
      %c0_43 = arith.constant 0 : index
      %c0_44 = arith.constant 0 : index
      %64 = vector.load %arg4[%c0_42, %c0_43, %c0_44] : memref<1x576x64xbf16, #tpu.memory_space<vmem>>, vector<1x576x64xbf16>
      %65 = vector.shape_cast %64 : vector<1x576x64xbf16> to vector<576x64xbf16>
      %cst = arith.constant dense<0.000000e+00> : vector<256x64xf32>
      %66 = tpu.matmul %63, %65, %cst {dimension_numbers = #tpu.dot_dimension_numbers<[1], [0], [0], [1], [0, 0, 1, 1], [], []>} : vector<256x576xbf16>, vector<576x64xbf16>, vector<256x64xf32> -> vector<256x64xf32>
      %c0_45 = arith.constant 0 : index
      %c0_46 = arith.constant 0 : index
      %c0_47 = arith.constant 0 : index
      %67 = vector.load %arg5[%c0_45, %c0_46, %c0_47] : memref<1x1x64xf32, #tpu.memory_space<vmem>>, vector<1x1x64xf32>
      %68 = vector.shape_cast %67 : vector<1x1x64xf32> to vector<1x64xf32>
      %69 = vector.broadcast %68 : vector<1x64xf32> to vector<256x64xf32>
      %70 = arith.addf %66, %69 : vector<256x64xf32>
      %cst_48 = arith.constant 0.000000e+00 : f32
      %71 = vector.broadcast %cst_48 : f32 to vector<256x64xf32>
      %72 = arith.maximumf %70, %71 : vector<256x64xf32>
      %73 = vector.shape_cast %72 : vector<256x64xf32> to vector<16x16x64xf32>
      %c1_49 = arith.constant 1 : index
      %c1_50 = arith.constant 1 : index
      %c0_51 = arith.constant 0 : index
      %74 = vector.load %arg7[%c1_49, %c1_50, %c0_51] : memref<18x18x64xf32, #tpu.memory_space<vmem>>, vector<16x16x64xf32>
      tpu.vector_store %arg7[%c1_49, %c1_50, %c0_51], %73 {strides = array<i32>} : memref<18x18x64xf32, #tpu.memory_space<vmem>>, vector<16x16x64xf32>,
    } else {
    }
    %c4_i32_7 = arith.constant 4 : i32
    %18 = arith.cmpi slt, %arg1, %c4_i32_7 : i32
    %c2_i32_8 = arith.constant 2 : i32
    %c0_i32_9 = arith.constant 0 : i32
    %19 = arith.cmpi eq, %c2_i32_8, %c0_i32_9 : i32
    %c1_i32_10 = arith.constant 1 : i32
    %20 = arith.select %19, %c1_i32_10, %c2_i32_8 : i32
    %21 = arith.remsi %arg1, %20 : i32
    %c0_i32_11 = arith.constant 0 : i32
    %22 = arith.cmpi ne, %21, %c0_i32_11 : i32
    %c0_i32_12 = arith.constant 0 : i32
    %23 = arith.cmpi slt, %21, %c0_i32_12 : i32
    %c0_i32_13 = arith.constant 0 : i32
    %24 = arith.cmpi slt, %20, %c0_i32_13 : i32
    %25 = arith.xori %23, %24 : i1
    %26 = arith.andi %25, %22 : i1
    %27 = arith.addi %21, %20 : i32
    %28 = arith.select %26, %27, %21 : i32
    %c1_i32_14 = arith.constant 1 : i32
    %29 = arith.cmpi eq, %28, %c1_i32_14 : i32
    %30 = arith.andi %18, %29 : i1
    %31 = arith.extui %30 : i1 to i32
    %c0_i32_15 = arith.constant 0 : i32
    %32 = arith.cmpi ne, %31, %c0_i32_15 : i32
    scf.if %32 {
      %c0 = arith.constant 0 : index
      %c0_18 = arith.constant 0 : index
      %c0_19 = arith.constant 0 : index
      %36 = vector.load %arg7[%c0, %c0_18, %c0_19] : memref<18x18x64xf32, #tpu.memory_space<vmem>>, vector<16x16x64xf32>
      %37 = arith.truncf %36 : vector<16x16x64xf32> to vector<16x16x64xbf16>
      %38 = vector.shape_cast %37 : vector<16x16x64xbf16> to vector<256x64xbf16>
      %c0_20 = arith.constant 0 : index
      %c1 = arith.constant 1 : index
      %c0_21 = arith.constant 0 : index
      %39 = vector.load %arg7[%c0_20, %c1, %c0_21] : memref<18x18x64xf32, #tpu.memory_space<vmem>>, vector<16x16x64xf32>
      %40 = arith.truncf %39 : vector<16x16x64xf32> to vector<16x16x64xbf16>
      %41 = vector.shape_cast %40 : vector<16x16x64xbf16> to vector<256x64xbf16>
      %c0_22 = arith.constant 0 : index
      %c2 = arith.constant 2 : index
      %c0_23 = arith.constant 0 : index
      %42 = vector.load %arg7[%c0_22, %c2, %c0_23] : memref<18x18x64xf32, #tpu.memory_space<vmem>>, vector<16x16x64xf32>
      %43 = arith.truncf %42 : vector<16x16x64xf32> to vector<16x16x64xbf16>
      %44 = vector.shape_cast %43 : vector<16x16x64xbf16> to vector<256x64xbf16>
      %c1_24 = arith.constant 1 : index
      %c0_25 = arith.constant 0 : index
      %c0_26 = arith.constant 0 : index
      %45 = vector.load %arg7[%c1_24, %c0_25, %c0_26] : memref<18x18x64xf32, #tpu.memory_space<vmem>>, vector<16x16x64xf32>
      %46 = arith.truncf %45 : vector<16x16x64xf32> to vector<16x16x64xbf16>
      %47 = vector.shape_cast %46 : vector<16x16x64xbf16> to vector<256x64xbf16>
      %c1_27 = arith.constant 1 : index
      %c1_28 = arith.constant 1 : index
      %c0_29 = arith.constant 0 : index
      %48 = vector.load %arg7[%c1_27, %c1_28, %c0_29] : memref<18x18x64xf32, #tpu.memory_space<vmem>>, vector<16x16x64xf32>
      %49 = arith.truncf %48 : vector<16x16x64xf32> to vector<16x16x64xbf16>
      %50 = vector.shape_cast %49 : vector<16x16x64xbf16> to vector<256x64xbf16>
      %c1_30 = arith.constant 1 : index
      %c2_31 = arith.constant 2 : index
      %c0_32 = arith.constant 0 : index
      %51 = vector.load %arg7[%c1_30, %c2_31, %c0_32] : memref<18x18x64xf32, #tpu.memory_space<vmem>>, vector<16x16x64xf32>
      %52 = arith.truncf %51 : vector<16x16x64xf32> to vector<16x16x64xbf16>
      %53 = vector.shape_cast %52 : vector<16x16x64xbf16> to vector<256x64xbf16>
      %c2_33 = arith.constant 2 : index
      %c0_34 = arith.constant 0 : index
      %c0_35 = arith.constant 0 : index
      %54 = vector.load %arg7[%c2_33, %c0_34, %c0_35] : memref<18x18x64xf32, #tpu.memory_space<vmem>>, vector<16x16x64xf32>
      %55 = arith.truncf %54 : vector<16x16x64xf32> to vector<16x16x64xbf16>
      %56 = vector.shape_cast %55 : vector<16x16x64xbf16> to vector<256x64xbf16>
      %c2_36 = arith.constant 2 : index
      %c1_37 = arith.constant 1 : index
      %c0_38 = arith.constant 0 : index
      %57 = vector.load %arg7[%c2_36, %c1_37, %c0_38] : memref<18x18x64xf32, #tpu.memory_space<vmem>>, vector<16x16x64xf32>
      %58 = arith.truncf %57 : vector<16x16x64xf32> to vector<16x16x64xbf16>
      %59 = vector.shape_cast %58 : vector<16x16x64xbf16> to vector<256x64xbf16>
      %c2_39 = arith.constant 2 : index
      %c2_40 = arith.constant 2 : index
      %c0_41 = arith.constant 0 : index
      %60 = vector.load %arg7[%c2_39, %c2_40, %c0_41] : memref<18x18x64xf32, #tpu.memory_space<vmem>>, vector<16x16x64xf32>
      %61 = arith.truncf %60 : vector<16x16x64xf32> to vector<16x16x64xbf16>
      %62 = vector.shape_cast %61 : vector<16x16x64xbf16> to vector<256x64xbf16>
      %63 = tpu.concatenate %38, %41, %44, %47, %50, %53, %56, %59, %62 in 1 : vector<256x64xbf16>, vector<256x64xbf16>, vector<256x64xbf16>, vector<256x64xbf16>, vector<256x64xbf16>, vector<256x64xbf16>, vector<256x64xbf16>, vector<256x64xbf16>, vector<256x64xbf16> -> vector<256x576xbf16>
      %c0_42 = arith.constant 0 : index
      %c0_43 = arith.constant 0 : index
      %c0_44 = arith.constant 0 : index
      %64 = vector.load %arg4[%c0_42, %c0_43, %c0_44] : memref<1x576x64xbf16, #tpu.memory_space<vmem>>, vector<1x576x64xbf16>
      %65 = vector.shape_cast %64 : vector<1x576x64xbf16> to vector<576x64xbf16>
      %cst = arith.constant dense<0.000000e+00> : vector<256x64xf32>
      %66 = tpu.matmul %63, %65, %cst {dimension_numbers = #tpu.dot_dimension_numbers<[1], [0], [0], [1], [0, 0, 1, 1], [], []>} : vector<256x576xbf16>, vector<576x64xbf16>, vector<256x64xf32> -> vector<256x64xf32>
      %c0_45 = arith.constant 0 : index
      %c0_46 = arith.constant 0 : index
      %c0_47 = arith.constant 0 : index
      %67 = vector.load %arg5[%c0_45, %c0_46, %c0_47] : memref<1x1x64xf32, #tpu.memory_space<vmem>>, vector<1x1x64xf32>
      %68 = vector.shape_cast %67 : vector<1x1x64xf32> to vector<1x64xf32>
      %69 = vector.broadcast %68 : vector<1x64xf32> to vector<256x64xf32>
      %70 = arith.addf %66, %69 : vector<256x64xf32>
      %cst_48 = arith.constant 0.000000e+00 : f32
      %71 = vector.broadcast %cst_48 : f32 to vector<256x64xf32>
      %72 = arith.maximumf %70, %71 : vector<256x64xf32>
      %73 = vector.shape_cast %72 : vector<256x64xf32> to vector<16x16x64xf32>
      %c1_49 = arith.constant 1 : index
      %c1_50 = arith.constant 1 : index
      %c0_51 = arith.constant 0 : index
      %74 = vector.load %arg8[%c1_49, %c1_50, %c0_51] : memref<18x18x64xf32, #tpu.memory_space<vmem>>, vector<16x16x64xf32>
      tpu.vector_store %arg8[%c1_49, %c1_50, %c0_51], %73 {strides = array<i32>} : memref<18x18x64xf32, #tpu.memory_space<vmem>>, vector<16x16x64xf32>,
    } else {
    }
    %c4_i32_16 = arith.constant 4 : i32
    %33 = arith.cmpi eq, %arg1, %c4_i32_16 : i32
    %34 = arith.extui %33 : i1 to i32
    %c0_i32_17 = arith.constant 0 : i32
    %35 = arith.cmpi ne, %34, %c0_i32_17 : i32
    scf.if %35 {
      %c0 = arith.constant 0 : index
      %c0_18 = arith.constant 0 : index
      %c0_19 = arith.constant 0 : index
      %36 = vector.load %arg8[%c0, %c0_18, %c0_19] : memref<18x18x64xf32, #tpu.memory_space<vmem>>, vector<16x16x64xf32>
      %37 = arith.truncf %36 : vector<16x16x64xf32> to vector<16x16x64xbf16>
      %38 = vector.shape_cast %37 : vector<16x16x64xbf16> to vector<256x64xbf16>
      %c0_20 = arith.constant 0 : index
      %c1 = arith.constant 1 : index
      %c0_21 = arith.constant 0 : index
      %39 = vector.load %arg8[%c0_20, %c1, %c0_21] : memref<18x18x64xf32, #tpu.memory_space<vmem>>, vector<16x16x64xf32>
      %40 = arith.truncf %39 : vector<16x16x64xf32> to vector<16x16x64xbf16>
      %41 = vector.shape_cast %40 : vector<16x16x64xbf16> to vector<256x64xbf16>
      %c0_22 = arith.constant 0 : index
      %c2 = arith.constant 2 : index
      %c0_23 = arith.constant 0 : index
      %42 = vector.load %arg8[%c0_22, %c2, %c0_23] : memref<18x18x64xf32, #tpu.memory_space<vmem>>, vector<16x16x64xf32>
      %43 = arith.truncf %42 : vector<16x16x64xf32> to vector<16x16x64xbf16>
      %44 = vector.shape_cast %43 : vector<16x16x64xbf16> to vector<256x64xbf16>
      %c1_24 = arith.constant 1 : index
      %c0_25 = arith.constant 0 : index
      %c0_26 = arith.constant 0 : index
      %45 = vector.load %arg8[%c1_24, %c0_25, %c0_26] : memref<18x18x64xf32, #tpu.memory_space<vmem>>, vector<16x16x64xf32>
      %46 = arith.truncf %45 : vector<16x16x64xf32> to vector<16x16x64xbf16>
      %47 = vector.shape_cast %46 : vector<16x16x64xbf16> to vector<256x64xbf16>
      %c1_27 = arith.constant 1 : index
      %c1_28 = arith.constant 1 : index
      %c0_29 = arith.constant 0 : index
      %48 = vector.load %arg8[%c1_27, %c1_28, %c0_29] : memref<18x18x64xf32, #tpu.memory_space<vmem>>, vector<16x16x64xf32>
      %49 = arith.truncf %48 : vector<16x16x64xf32> to vector<16x16x64xbf16>
      %50 = vector.shape_cast %49 : vector<16x16x64xbf16> to vector<256x64xbf16>
      %c1_30 = arith.constant 1 : index
      %c2_31 = arith.constant 2 : index
      %c0_32 = arith.constant 0 : index
      %51 = vector.load %arg8[%c1_30, %c2_31, %c0_32] : memref<18x18x64xf32, #tpu.memory_space<vmem>>, vector<16x16x64xf32>
      %52 = arith.truncf %51 : vector<16x16x64xf32> to vector<16x16x64xbf16>
      %53 = vector.shape_cast %52 : vector<16x16x64xbf16> to vector<256x64xbf16>
      %c2_33 = arith.constant 2 : index
      %c0_34 = arith.constant 0 : index
      %c0_35 = arith.constant 0 : index
      %54 = vector.load %arg8[%c2_33, %c0_34, %c0_35] : memref<18x18x64xf32, #tpu.memory_space<vmem>>, vector<16x16x64xf32>
      %55 = arith.truncf %54 : vector<16x16x64xf32> to vector<16x16x64xbf16>
      %56 = vector.shape_cast %55 : vector<16x16x64xbf16> to vector<256x64xbf16>
      %c2_36 = arith.constant 2 : index
      %c1_37 = arith.constant 1 : index
      %c0_38 = arith.constant 0 : index
      %57 = vector.load %arg8[%c2_36, %c1_37, %c0_38] : memref<18x18x64xf32, #tpu.memory_space<vmem>>, vector<16x16x64xf32>
      %58 = arith.truncf %57 : vector<16x16x64xf32> to vector<16x16x64xbf16>
      %59 = vector.shape_cast %58 : vector<16x16x64xbf16> to vector<256x64xbf16>
      %c2_39 = arith.constant 2 : index
      %c2_40 = arith.constant 2 : index
      %c0_41 = arith.constant 0 : index
      %60 = vector.load %arg8[%c2_39, %c2_40, %c0_41] : memref<18x18x64xf32, #tpu.memory_space<vmem>>, vector<16x16x64xf32>
      %61 = arith.truncf %60 : vector<16x16x64xf32> to vector<16x16x64xbf16>
      %62 = vector.shape_cast %61 : vector<16x16x64xbf16> to vector<256x64xbf16>
      %63 = tpu.concatenate %38, %41, %44, %47, %50, %53, %56, %59, %62 in 1 : vector<256x64xbf16>, vector<256x64xbf16>, vector<256x64xbf16>, vector<256x64xbf16>, vector<256x64xbf16>, vector<256x64xbf16>, vector<256x64xbf16>, vector<256x64xbf16>, vector<256x64xbf16> -> vector<256x576xbf16>
      %c0_42 = arith.constant 0 : index
      %c0_43 = arith.constant 0 : index
      %c0_44 = arith.constant 0 : index
      %64 = vector.load %arg4[%c0_42, %c0_43, %c0_44] : memref<1x576x64xbf16, #tpu.memory_space<vmem>>, vector<1x576x64xbf16>
      %65 = vector.shape_cast %64 : vector<1x576x64xbf16> to vector<576x64xbf16>
      %cst = arith.constant dense<0.000000e+00> : vector<256x64xf32>
      %66 = tpu.matmul %63, %65, %cst {dimension_numbers = #tpu.dot_dimension_numbers<[1], [0], [0], [1], [0, 0, 1, 1], [], []>} : vector<256x576xbf16>, vector<576x64xbf16>, vector<256x64xf32> -> vector<256x64xf32>
      %c0_45 = arith.constant 0 : index
      %c0_46 = arith.constant 0 : index
      %c0_47 = arith.constant 0 : index
      %67 = vector.load %arg5[%c0_45, %c0_46, %c0_47] : memref<1x1x64xf32, #tpu.memory_space<vmem>>, vector<1x1x64xf32>
      %68 = vector.shape_cast %67 : vector<1x1x64xf32> to vector<1x64xf32>
      %69 = vector.broadcast %68 : vector<1x64xf32> to vector<256x64xf32>
      %70 = arith.addf %66, %69 : vector<256x64xf32>
      %71 = vector.shape_cast %70 : vector<256x64xf32> to vector<16x16x64xf32>
      %72 = vector.extract_strided_slice %71 {offsets = [0, 0, 0], sizes = [16, 16, 4], strides = [1, 1, 1]} : vector<16x16x64xf32> to vector<16x16x4xf32>
      %c0_48 = arith.constant 0 : index
      %c0_49 = arith.constant 0 : index
      %c0_50 = arith.constant 0 : index
      %c0_51 = arith.constant 0 : index
      %73 = vector.load %arg3[%c0_48, %c0_49, %c0_50, %c0_51] : memref<1x16x16x4xf32, #tpu.memory_space<vmem>>, vector<1x16x16x4xf32>
      %74 = vector.shape_cast %73 : vector<1x16x16x4xf32> to vector<16x16x4xf32>
      %75 = arith.addf %72, %74 : vector<16x16x4xf32>
      %c0_52 = arith.constant 0 : index
      %c0_53 = arith.constant 0 : index
      %c0_54 = arith.constant 0 : index
      %c0_55 = arith.constant 0 : index
      %76 = vector.load %arg6[%c0_52, %c0_53, %c0_54, %c0_55] : memref<1x16x16x4xf32, #tpu.memory_space<vmem>>, vector<1x16x16x4xf32>
      %77 = vector.shape_cast %76 : vector<1x16x16x4xf32> to vector<16x16x4xf32>
      %78 = vector.shape_cast %75 : vector<16x16x4xf32> to vector<1x16x16x4xf32>
      tpu.vector_store %arg6[%c0_52, %c0_53, %c0_54, %c0_55], %78 {strides = array<i32>} : memref<1x16x16x4xf32, #tpu.memory_space<vmem>>, vector<1x16x16x4xf32>,
    } else {
    }
    return
  }
  func.func @transform_0(%arg0: i32, %arg1: i32) -> (i32, i32, i32, i32) {
    %c0_i32 = arith.constant 0 : i32
    %c0_i32_0 = arith.constant 0 : i32
    %c0_i32_1 = arith.constant 0 : i32
    %c0_i32_2 = arith.constant 0 : i32
    return %arg0, %c0_i32, %c0_i32_0, %c0_i32_1 : i32, i32, i32, i32
  }
  func.func @transform_1(%arg0: i32, %arg1: i32) -> (i32, i32, i32, i32) {
    %c0_i32 = arith.constant 0 : i32
    %c0_i32_0 = arith.constant 0 : i32
    %c0_i32_1 = arith.constant 0 : i32
    %c0_i32_2 = arith.constant 0 : i32
    return %arg0, %c0_i32, %c0_i32_0, %c0_i32_1 : i32, i32, i32, i32
  }
  func.func @transform_2(%arg0: i32, %arg1: i32) -> (i32, i32, i32) {
    %c0_i32 = arith.constant 0 : i32
    %c0_i32_0 = arith.constant 0 : i32
    %c0_i32_1 = arith.constant 0 : i32
    return %arg1, %c0_i32, %c0_i32_0 : i32, i32, i32
  }
  func.func @transform_3(%arg0: i32, %arg1: i32) -> (i32, i32, i32) {
    %c0_i32 = arith.constant 0 : i32
    %c0_i32_0 = arith.constant 0 : i32
    %c0_i32_1 = arith.constant 0 : i32
    return %arg1, %c0_i32, %c0_i32_0 : i32, i32, i32
  }
  func.func @transform_4(%arg0: i32, %arg1: i32) -> (i32, i32, i32, i32) {
    %c0_i32 = arith.constant 0 : i32
    %c0_i32_0 = arith.constant 0 : i32
    %c0_i32_1 = arith.constant 0 : i32
    %c0_i32_2 = arith.constant 0 : i32
    return %arg0, %c0_i32, %c0_i32_0, %c0_i32_1 : i32, i32, i32, i32
  }
}

</mosaic_0001>

<bundles_post_ra>
// kernel: dncnn_forward.1
= control target key start
LH: loop header
LB: loop body
LE: loop exit
PB: predicated region body
PF: predicated region fallthrough
CT: control target
= control target key end

     0   :  { %s7313_s15 = smov 0   ;;  %s7315_s16 = smov 0   ;;  %s9129_s0 = inlined_call_operand.vmem [shape: bf16[2,18,18,64], index: 0, kind: input, shape index: {}]   ;;  %s9130_s1 = inlined_call_operand.vmem [shape: f32[2,16,16,4], index: 1, kind: input, shape index: {}]   ;;  %s9131_s2 = inlined_call_operand.vmem [shape: bf16[5,576,64], index: 2, kind: input, shape index: {}]   ;;  %s9132_s3 = inlined_call_operand.vmem [shape: f32[5,1,64], index: 3, kind: input, shape index: {}]   ;;  %s9133_s4 = inlined_call_operand.vmem [shape: f32[2,16,16,4], index: 4, kind: output, shape index: {}]  }
   0x1   :  { %s7317_s17 = smov 0   ;;  %s7319_s18 = smov 0  }
   0x2   :  { %s7321_s19 = smov 0  }
   0x3 LB: > { %s23_s20 = sadd.s32 1, %s7274_s17  ;;  %s26_s21 = sadd.s32 1, %s7278_s18  ;;  %s7282_s19 = sphi %s7321_s19, %s14_s19   ;;  %s7278_s18 = sphi %s7319_s18, %s9137_s18   ;;  %s7274_s17 = sphi %s7317_s17, %s9136_s17   ;;  %s7270_s16 = sphi %s7315_s16, %s9135_s16   ;;  %s7266_s15 = sphi %s7313_s15, %s9134_s15  }
   0x4   : > { %p24_p0 = scmp.ge.s32.totalorder %s23_s20, 5  ;;  %p5971_p1 = scmp.ge.s32.totalorder %s7282_s19, 1 }
   0x5   : > { %p202_p2 = scmp.lt.s32.totalorder %s7282_s19, 11 }
   0x6   : > { %s9139_s20 = smov (%p24_p0, %s23_s20), 0  ;;  %s9141_s21 = smov (!%p24_p0, %s26_s21), %s7278_s18 }
   0x7   : > { %p203_p3 = pnand %p5971_p1, %p202_p2  ;;  %p28_p4 = scmp.ge.s32.totalorder %s9141_s21, 2 }
   0x8   : > { %p241_p5 = scmp.lt.s32.totalorder (!%p203_p3), %s7270_s16, 1  ;;  %p251_p6 = scmp.lt.s32.totalorder (!%p203_p3), %s7266_s15, 4 }
   0x9   : > { %s9143_s21 = smov (%p28_p4, %s9141_s21), 0  ;;  %206 = sbr.rel (%p203_p3) target bundleno = 1585 (0x631), region = 36 }
   0xa   : > { %p5978_p7 = scmp.ne.s32.totalorder (!%p203_p3), %s7266_s15, 0 }
  0x10   : > { %s9145_s16 = smov (!%p241_p5, %s7270_s16), 1  ;;  %268 = sbr.rel (%p5978_p7) target bundleno = 73 (0x49), region = 40 }
  0x11   : > { %s252_s22 = scalar_select %p251_p6, %s7266_s15, 4 }
  0x12   : > { %s7090_s23 = smul.u32 216, %s9145_s16  ;;  %s6144_s24 = sshll.u32 %s9145_s16, 8  ;;  %vm269_vm0 = vcmask (!%p5978_p7), 523264   ;;  %vm272_vm1 = vcmask (!%p5978_p7), 517120   ;;  %v7284_v2 = vmov (!%p5978_p7), 0.0  }
  0x13   : > { %s7352_s27 = scalar_lea.vmem %s9130_s1, %s6144_s24  ;;  %s7091_s28 = smul.u32 288, %s252_s22  ;;  %270 = vst.msk [vmem:[#allocation2] sm:$0xff] (!%p5978_p7), %vm269_vm0, %v7284_v2  ;;  %271 = vst.msk [vmem:[#allocation2 + $0x8] sm:$0xff] (!%p5978_p7), %vm269_vm0, %v7284_v2 }
  0x14   : > { %s7357_s5 = scalar_lea.vmem %s9129_s0, %s7090_s23  ;;  %s7362_s8 = scalar_lea.vmem %s9132_s3, %s252_s22  ;;  %274 = vst.msk [vmem:[#allocation2 + $0x18] sm:$0xff] (!%p5978_p7), %vm269_vm0, %v7284_v2  ;;  %275 = vst.msk [vmem:[#allocation2 + $0x20] sm:$0xff] (!%p5978_p7), %vm269_vm0, %v7284_v2 }
  0x15   : > { %s7367_s11 = scalar_lea.vmem %s9131_s2, %s7091_s28  ;;  %s7372_s14 = scalar_lea.vmem %s9133_s4, %s6144_s24  ;;  %v7376_v0 = vld [vmem:[%s7357_s5] sm:$0xff] (!%p5978_p7)   ;;  %v7379_v1 = vld [vmem:[%s7357_s5 + $0x8] sm:$0x1] (!%p5978_p7)  ;;  %277 = vst.msk [vmem:[#allocation2 + $0x30] sm:$0xff] (!%p5978_p7), %vm269_vm0, %v7284_v2  ;;  %278 = vst.msk [vmem:[#allocation2 + $0x38] sm:$0xff] (!%p5978_p7), %vm269_vm0, %v7284_v2 }
  0x16   : > { %280 = vst.msk [vmem:[#allocation2 + $0x48] sm:$0xff] (!%p5978_p7), %vm269_vm0, %v7284_v2  ;;  %281 = vst.msk [vmem:[#allocation2 + $0x50] sm:$0xff] (!%p5978_p7), %vm269_vm0, %v7284_v2  ;;  %v6148_v3 = vunpack.c.l.bf16 (!%p5978_p7), %v7376_v0  ;;  %v6149_v4 = vunpack.c.h.bf16 (!%p5978_p7), %v7376_v0  ;;  %v381_v5 = vunpack.c.l.bf16 (!%p5978_p7), %v7379_v1  ;;  %v328_v6 = vld [vmem:[%s7357_s5 + $0xc] sm:$0xff] (!%p5978_p7)   ;;  %v330_v7 = vld [vmem:[%s7357_s5 + $0x14] sm:$0x1] (!%p5978_p7) }
  0x17   : > { %283 = vst.msk [vmem:[#allocation2 + $0x60] sm:$0xff] %vm269_vm0, %v7284_v2  ;;  %284 = vst.msk [vmem:[#allocation2 + $0x68] sm:$0xff] %vm269_vm0, %v7284_v2  ;;  %v6182_v8 = vld [vmem:[%s7357_s5 + $0x18] sm:$0xff]   ;;  %v382_v9 = vunpack.c.l.bf16 %v328_v6  ;;  %v383_v10 = vunpack.c.h.bf16 %v328_v6  ;;  %v384_v11 = vunpack.c.l.bf16 %v330_v7  ;;  %v333_v13 = vld [vmem:[%s7357_s5 + $0x20] sm:$0x1] }
  0x18   : > { %286 = vst.msk [vmem:[#allocation2 + $0x78] sm:$0xff] %vm269_vm0, %v7284_v2  ;;  %287 = vst.msk [vmem:[#allocation2 + $0x80] sm:$0xff] %vm269_vm0, %v7284_v2  ;;  %v6152_v12 = vunpack.c.l.bf16 %v6182_v8  ;;  %v334_v14 = vld [vmem:[%s7357_s5 + $0x24] sm:$0xff]   ;;  %v336_v15 = vld [vmem:[%s7357_s5 + $0x2c] sm:$0x1]  ;;  %v6153_v16 = vunpack.c.h.bf16 %v6182_v8  ;;  %v387_v17 = vunpack.c.l.bf16 %v333_v13 }
  0x19   : > { %289 = vst.msk [vmem:[#allocation2 + $0x90] sm:$0xff] %vm269_vm0, %v7284_v2  ;;  %290 = vst.msk [vmem:[#allocation2 + $0x98] sm:$0xff] %vm269_vm0, %v7284_v2  ;;  %v388_v18 = vunpack.c.l.bf16 %v334_v14  ;;  %v389_v19 = vunpack.c.h.bf16 %v334_v14  ;;  %v6183_v20 = vld [vmem:[%s7357_s5 + $0x30] sm:$0xff]   ;;  %v339_v21 = vld [vmem:[%s7357_s5 + $0x38] sm:$0x1]  ;;  %v390_v23 = vunpack.c.l.bf16 %v336_v15 }
  0x1a   : > { %292 = vst.msk [vmem:[#allocation2 + $0xa8] sm:$0xff] %vm269_vm0, %v7284_v2  ;;  %293 = vst.msk [vmem:[#allocation2 + $0xb0] sm:$0xff] %vm269_vm0, %v7284_v2  ;;  %v340_v22 = vld [vmem:[%s7357_s5 + $0x3c] sm:$0xff]   ;;  %v6156_v24 = vunpack.c.l.bf16 %v6183_v20  ;;  %v6157_v25 = vunpack.c.h.bf16 %v6183_v20  ;;  %v393_v26 = vunpack.c.l.bf16 %v339_v21  ;;  %v342_v27 = vld [vmem:[%s7357_s5 + $0x44] sm:$0x1] }
  0x1b   : > { %295 = vst.msk [vmem:[#allocation2 + $0xc0] sm:$0xff] %vm269_vm0, %v7284_v2  ;;  %296 = vst.msk [vmem:[#allocation2 + $0xc8] sm:$0xff] %vm269_vm0, %v7284_v2  ;;  %v6184_v28 = vld [vmem:[%s7357_s5 + $0x48] sm:$0xff]   ;;  %v345_v29 = vld [vmem:[%s7357_s5 + $0x50] sm:$0x1]  ;;  %v394_v30 = vunpack.c.l.bf16 %v340_v22  ;;  %v395_v31 = vunpack.c.h.bf16 %v340_v22  ;;  %v396_v32 = vunpack.c.l.bf16 %v342_v27 }
  0x1c   : > { %298 = vst.msk [vmem:[#allocation2 + $0xd8] sm:$0xff] %vm269_vm0, %v7284_v2  ;;  %299 = vst.msk [vmem:[#allocation2 + $0xe0] sm:$0xff] %vm269_vm0, %v7284_v2  ;;  %v6160_v33 = vunpack.c.l.bf16 %v6184_v28  ;;  %v346_v34 = vld [vmem:[%s7357_s5 + $0x54] sm:$0xff]   ;;  %v348_v35 = vld [vmem:[%s7357_s5 + $0x5c] sm:$0x1]  ;;  %v6161_v37 = vunpack.c.h.bf16 %v6184_v28  ;;  %v399_v38 = vunpack.c.l.bf16 %v345_v29 }
  0x1d   : > { %301 = vst.msk [vmem:[#allocation2 + $0xf0] sm:$0xff] %vm269_vm0, %v7284_v2  ;;  %302 = vst.msk [vmem:[#allocation2 + $0xf8] sm:$0xff] %vm269_vm0, %v7284_v2  ;;  %v6185_v36 = vld [vmem:[%s7357_s5 + $0x60] sm:$0xff]   ;;  %v400_v39 = vunpack.c.l.bf16 %v346_v34  ;;  %v401_v40 = vunpack.c.h.bf16 %v346_v34  ;;  %v351_v41 = vld [vmem:[%s7357_s5 + $0x68] sm:$0x1]  ;;  %v402_v44 = vunpack.c.l.bf16 %v348_v35 }
  0x1e   : > { %304 = vst.msk [vmem:[#allocation2 + $0x108] sm:$0xff] %vm269_vm0, %v7284_v2  ;;  %305 = vst.msk [vmem:[#allocation2 + $0x110] sm:$0xff] %vm269_vm0, %v7284_v2  ;;  %v352_v42 = vld [vmem:[%s7357_s5 + $0x6c] sm:$0xff]   ;;  %v354_v43 = vld [vmem:[%s7357_s5 + $0x74] sm:$0x1]  ;;  %v6164_v45 = vunpack.c.l.bf16 %v6185_v36  ;;  %v6165_v46 = vunpack.c.h.bf16 %v6185_v36  ;;  %v405_v47 = vunpack.c.l.bf16 %v351_v41 }
  0x1f   : > { %307 = vst.msk [vmem:[#allocation2 + $0x120] sm:$0xff] %vm269_vm0, %v7284_v2  ;;  %308 = vst.msk [vmem:[#allocation2 + $0x128] sm:$0xff] %vm269_vm0, %v7284_v2  ;;  %v6186_v48 = vld [vmem:[%s7357_s5 + $0x78] sm:$0xff]   ;;  %v357_v49 = vld [vmem:[%s7357_s5 + $0x80] sm:$0x1]  ;;  %v406_v51 = vunpack.c.l.bf16 %v352_v42  ;;  %v407_v52 = vunpack.c.h.bf16 %v352_v42  ;;  %v408_v53 = vunpack.c.l.bf16 %v354_v43 }
  0x20   : > { %310 = vst.msk [vmem:[#allocation2 + $0x138] sm:$0xff] %vm269_vm0, %v7284_v2  ;;  %311 = vst.msk [vmem:[#allocation2 + $0x140] sm:$0xff] %vm269_vm0, %v7284_v2  ;;  %v358_v50 = vld [vmem:[%s7357_s5 + $0x84] sm:$0xff]   ;;  %v6168_v54 = vunpack.c.l.bf16 %v6186_v48  ;;  %v360_v55 = vld [vmem:[%s7357_s5 + $0x8c] sm:$0x1]  ;;  %v6169_v58 = vunpack.c.h.bf16 %v6186_v48  ;;  %v411_v59 = vunpack.c.l.bf16 %v357_v49 }
  0x21   : > { %313 = vst.msk [vmem:[#allocation2 + $0x150] sm:$0xff] %vm269_vm0, %v7284_v2  ;;  %314 = vst.msk [vmem:[#allocation2 + $0x158] sm:$0xff] %vm269_vm0, %v7284_v2  ;;  %v6187_v56 = vld [vmem:[%s7357_s5 + $0x90] sm:$0xff]   ;;  %v363_v57 = vld [vmem:[%s7357_s5 + $0x98] sm:$0x1]  ;;  %v412_v60 = vunpack.c.l.bf16 %v358_v50  ;;  %v413_v61 = vunpack.c.h.bf16 %v358_v50  ;;  %v414_v1 = vunpack.c.l.bf16 %v360_v55 }
  0x22   : > { %316 = vst.msk [vmem:[#allocation2 + $0x168] sm:$0xff] %vm269_vm0, %v7284_v2  ;;  %317 = vst.msk [vmem:[#allocation2 + $0x170] sm:$0xff] %vm269_vm0, %v7284_v2  ;;  %v364_v62 = vld [vmem:[%s7357_s5 + $0x9c] sm:$0xff]   ;;  %v366_v63 = vld [vmem:[%s7357_s5 + $0xa4] sm:$0x1] }
  0x23   : > { %319 = vst.msk [vmem:[#allocation2 + $0x180] sm:$0xff] %vm269_vm0, %v7284_v2  ;;  %320 = vst.msk [vmem:[#allocation2 + $0x188] sm:$0xff] %vm269_vm0, %v7284_v2  ;;  %v6188_v0 = vld [vmem:[%s7357_s5 + $0xa8] sm:$0xff]   ;;  %v370_v6 = vld [vmem:[%s7357_s5 + $0xb4] sm:$0xff]   ;;  %v418_v8 = vunpack.c.l.bf16 %v364_v62 }
  0x24   : > { %322 = vst.msk [vmem:[#allocation2 + $0x198] sm:$0xff] %vm269_vm0, %v7284_v2  ;;  %323 = vst.msk [vmem:[#allocation2 + $0x1a0] sm:$0xff] %vm269_vm0, %v7284_v2  ;;  %v372_v7 = vld [vmem:[%s7357_s5 + $0xbc] sm:$0x1]  ;;  %v375_v13 = vld [vmem:[%s7357_s5 + $0xc8] sm:$0x1]  ;;  %v6177_v15 = vunpack.c.h.bf16 %v6188_v0 }
  0x25   : > { %273 = vst.msk [vmem:[#allocation2 + $0x10] sm:$0x3] %vm272_vm1, %v7284_v2  ;;  %276 = vst.msk [vmem:[#allocation2 + $0x28] sm:$0x3] %vm272_vm1, %v7284_v2  ;;  %v376_v14 = vld [vmem:[%s7357_s5 + $0xcc] sm:$0xff]   ;;  %v426_v20 = vunpack.c.l.bf16 %v372_v7 }
  0x26   : > { %279 = vst.msk [vmem:[#allocation2 + $0x40] sm:$0x3] %vm272_vm1, %v7284_v2  ;;  %282 = vst.msk [vmem:[#allocation2 + $0x58] sm:$0x3] %vm272_vm1, %v7284_v2 }
  0x27   : > { %285 = vst.msk [vmem:[#allocation2 + $0x70] sm:$0x3] %vm272_vm1, %v7284_v2  ;;  %288 = vst.msk [vmem:[#allocation2 + $0x88] sm:$0x3] %vm272_vm1, %v7284_v2 }
  0x28   : > { %291 = vst.msk [vmem:[#allocation2 + $0xa0] sm:$0x3] %vm272_vm1, %v7284_v2  ;;  %294 = vst.msk [vmem:[#allocation2 + $0xb8] sm:$0x3] %vm272_vm1, %v7284_v2 }
  0x29   : > { %297 = vst.msk [vmem:[#allocation2 + $0xd0] sm:$0x3] %vm272_vm1, %v7284_v2  ;;  %300 = vst.msk [vmem:[#allocation2 + $0xe8] sm:$0x3] %vm272_vm1, %v7284_v2 }
  0x2a   : > { %303 = vst.msk [vmem:[#allocation2 + $0x100] sm:$0x3] %vm272_vm1, %v7284_v2  ;;  %306 = vst.msk [vmem:[#allocation2 + $0x118] sm:$0x3] %vm272_vm1, %v7284_v2 }
  0x2b   : > { %309 = vst.msk [vmem:[#allocation2 + $0x130] sm:$0x3] %vm272_vm1, %v7284_v2  ;;  %312 = vst.msk [vmem:[#allocation2 + $0x148] sm:$0x3] %vm272_vm1, %v7284_v2 }
  0x2c   : > { %315 = vst.msk [vmem:[#allocation2 + $0x160] sm:$0x3] %vm272_vm1, %v7284_v2  ;;  %318 = vst.msk [vmem:[#allocation2 + $0x178] sm:$0x3] %vm272_vm1, %v7284_v2 }
  0x2d   : > { %321 = vst.msk [vmem:[#allocation2 + $0x190] sm:$0x3] %vm272_vm1, %v7284_v2  ;;  %324 = vst.msk [vmem:[#allocation2 + $0x1a8] sm:$0x3] %vm272_vm1, %v7284_v2  ;;  %v6172_v2 = vunpack.c.l.bf16 %v6187_v56 }
  0x2e   : > { %433 = vst.msk [vmem:[#allocation3] sm:$0xff] %vm269_vm0, %v6148_v3  ;;  %434 = vst.msk [vmem:[#allocation3 + $0x8] sm:$0xff] %vm269_vm0, %v6149_v4  ;;  %v6173_v3 = vunpack.c.h.bf16 %v6187_v56  ;;  %v417_v4 = vunpack.c.l.bf16 %v363_v57 }
  0x2f   : > { %435 = vst.msk [vmem:[#allocation3 + $0x10] sm:$0x3] %vm272_vm1, %v381_v5  ;;  %438 = vst.msk [vmem:[#allocation3 + $0x28] sm:$0x3] %vm272_vm1, %v384_v11  ;;  %v369_v5 = vld [vmem:[%s7357_s5 + $0xb0] sm:$0x1]  ;;  %v6176_v11 = vunpack.c.l.bf16 %v6188_v0 }
  0x30   : > { %436 = vst.msk [vmem:[#allocation3 + $0x18] sm:$0xff] %vm269_vm0, %v382_v9  ;;  %437 = vst.msk [vmem:[#allocation3 + $0x20] sm:$0xff] %vm269_vm0, %v383_v10  ;;  %v419_v9 = vunpack.c.h.bf16 %v364_v62  ;;  %v420_v10 = vunpack.c.l.bf16 %v366_v63 }
  0x31   : > { %439 = vst.msk [vmem:[#allocation3 + $0x30] sm:$0xff] %vm269_vm0, %v6152_v12  ;;  %440 = vst.msk [vmem:[#allocation3 + $0x38] sm:$0xff] %vm269_vm0, %v6153_v16  ;;  %v6189_v12 = vld [vmem:[%s7357_s5 + $0xc0] sm:$0xff]   ;;  %v423_v16 = vunpack.c.l.bf16 %v369_v5 }
  0x32   : > { %441 = vst.msk [vmem:[#allocation3 + $0x40] sm:$0x3] %vm272_vm1, %v387_v17  ;;  %444 = vst.msk [vmem:[#allocation3 + $0x58] sm:$0x3] %vm272_vm1, %v390_v23  ;;  %v424_v17 = vunpack.c.l.bf16 %v370_v6  ;;  %v6180_v21 = vunpack.c.l.bf16 %v6189_v12  ;;  %v6181_v22 = vunpack.c.h.bf16 %v6189_v12  ;;  %v429_v23 = vunpack.c.l.bf16 %v375_v13 }
  0x33   : > { %442 = vst.msk [vmem:[#allocation3 + $0x48] sm:$0xff] %vm269_vm0, %v388_v18  ;;  %443 = vst.msk [vmem:[#allocation3 + $0x50] sm:$0xff] %vm269_vm0, %v389_v19  ;;  %v425_v18 = vunpack.c.h.bf16 %v370_v6  ;;  %v378_v19 = vld [vmem:[%s7357_s5 + $0xd4] sm:$0x1] }
  0x34   : > { %445 = vst.msk [vmem:[#allocation3 + $0x60] sm:$0xff] %vm269_vm0, %v6156_v24  ;;  %446 = vst.msk [vmem:[#allocation3 + $0x68] sm:$0xff] %vm269_vm0, %v6157_v25  ;;  %v430_v24 = vunpack.c.l.bf16 %v376_v14  ;;  %v431_v25 = vunpack.c.h.bf16 %v376_v14 }
  0x35   : > { %447 = vst.msk [vmem:[#allocation3 + $0x70] sm:$0x3] %vm272_vm1, %v393_v26  ;;  %450 = vst.msk [vmem:[#allocation3 + $0x88] sm:$0x3] %vm272_vm1, %v396_v32  ;;  %v432_v26 = vunpack.c.l.bf16 %v378_v19 }
  0x36   : > { %448 = vst.msk [vmem:[#allocation3 + $0x78] sm:$0xff] %vm269_vm0, %v394_v30  ;;  %449 = vst.msk [vmem:[#allocation3 + $0x80] sm:$0xff] %vm269_vm0, %v395_v31 }
  0x37   : > { %451 = vst.msk [vmem:[#allocation3 + $0x90] sm:$0xff] %vm269_vm0, %v6160_v33  ;;  %452 = vst.msk [vmem:[#allocation3 + $0x98] sm:$0xff] %vm269_vm0, %v6161_v37 }
  0x38   : > { %453 = vst.msk [vmem:[#allocation3 + $0xa0] sm:$0x3] %vm272_vm1, %v399_v38  ;;  %456 = vst.msk [vmem:[#allocation3 + $0xb8] sm:$0x3] %vm272_vm1, %v402_v44 }
  0x39   : > { %454 = vst.msk [vmem:[#allocation3 + $0xa8] sm:$0xff] %vm269_vm0, %v400_v39  ;;  %455 = vst.msk [vmem:[#allocation3 + $0xb0] sm:$0xff] %vm269_vm0, %v401_v40 }
  0x3a   : > { %457 = vst.msk [vmem:[#allocation3 + $0xc0] sm:$0xff] %vm269_vm0, %v6164_v45  ;;  %458 = vst.msk [vmem:[#allocation3 + $0xc8] sm:$0xff] %vm269_vm0, %v6165_v46 }
  0x3b   : > { %459 = vst.msk [vmem:[#allocation3 + $0xd0] sm:$0x3] %vm272_vm1, %v405_v47  ;;  %462 = vst.msk [vmem:[#allocation3 + $0xe8] sm:$0x3] %vm272_vm1, %v408_v53 }
  0x3c   : > { %460 = vst.msk [vmem:[#allocation3 + $0xd8] sm:$0xff] %vm269_vm0, %v406_v51  ;;  %461 = vst.msk [vmem:[#allocation3 + $0xe0] sm:$0xff] %vm269_vm0, %v407_v52 }
  0x3d   : > { %463 = vst.msk [vmem:[#allocation3 + $0xf0] sm:$0xff] %vm269_vm0, %v6168_v54  ;;  %464 = vst.msk [vmem:[#allocation3 + $0xf8] sm:$0xff] %vm269_vm0, %v6169_v58 }
  0x3e   : > { %465 = vst.msk [vmem:[#allocation3 + $0x100] sm:$0x3] %vm272_vm1, %v411_v59  ;;  %468 = vst.msk [vmem:[#allocation3 + $0x118] sm:$0x3] %vm272_vm1, %v414_v1 }
  0x3f   : > { %466 = vst.msk [vmem:[#allocation3 + $0x108] sm:$0xff] %vm269_vm0, %v412_v60  ;;  %467 = vst.msk [vmem:[#allocation3 + $0x110] sm:$0xff] %vm269_vm0, %v413_v61 }
  0x40   : > { %469 = vst.msk [vmem:[#allocation3 + $0x120] sm:$0xff] %vm269_vm0, %v6172_v2  ;;  %470 = vst.msk [vmem:[#allocation3 + $0x128] sm:$0xff] %vm269_vm0, %v6173_v3 }
  0x41   : > { %471 = vst.msk [vmem:[#allocation3 + $0x130] sm:$0x3] %vm272_vm1, %v417_v4  ;;  %474 = vst.msk [vmem:[#allocation3 + $0x148] sm:$0x3] %vm272_vm1, %v420_v10 }
  0x42   : > { %472 = vst.msk [vmem:[#allocation3 + $0x138] sm:$0xff] %vm269_vm0, %v418_v8  ;;  %473 = vst.msk [vmem:[#allocation3 + $0x140] sm:$0xff] %vm269_vm0, %v419_v9 }
  0x43   : > { %475 = vst.msk [vmem:[#allocation3 + $0x150] sm:$0xff] %vm269_vm0, %v6176_v11  ;;  %476 = vst.msk [vmem:[#allocation3 + $0x158] sm:$0xff] %vm269_vm0, %v6177_v15 }
  0x44   : > { %477 = vst.msk [vmem:[#allocation3 + $0x160] sm:$0x3] %vm272_vm1, %v423_v16  ;;  %480 = vst.msk [vmem:[#allocation3 + $0x178] sm:$0x3] %vm272_vm1, %v426_v20 }
  0x45   : > { %478 = vst.msk [vmem:[#allocation3 + $0x168] sm:$0xff] %vm269_vm0, %v424_v17  ;;  %479 = vst.msk [vmem:[#allocation3 + $0x170] sm:$0xff] %vm269_vm0, %v425_v18 }
  0x46   : > { %481 = vst.msk [vmem:[#allocation3 + $0x180] sm:$0xff] %vm269_vm0, %v6180_v21  ;;  %482 = vst.msk [vmem:[#allocation3 + $0x188] sm:$0xff] %vm269_vm0, %v6181_v22 }
  0x47   : > { %483 = vst.msk [vmem:[#allocation3 + $0x190] sm:$0x3] %vm272_vm1, %v429_v23  ;;  %486 = vst.msk [vmem:[#allocation3 + $0x1a8] sm:$0x3] %vm272_vm1, %v432_v26 }
  0x48   : > { %484 = vst.msk [vmem:[#allocation3 + $0x198] sm:$0xff] %vm269_vm0, %v430_v24  ;;  %485 = vst.msk [vmem:[#allocation3 + $0x1a0] sm:$0xff] %vm269_vm0, %v431_v25 }
  0x49 PF: > { %p488_p8 = scmp.lt.s32.totalorder %s7266_s15, 0  ;;  %s489_s16 = ssub.s32 0, %s7266_s15 }
  0x4a   : > { %s5979_s22 = smin.u32 %s7266_s15, %s489_s16 }
  0x4b   : > { %s491_s23 = sand.u32 1, %s5979_s22  }
  0x4c   : > { %s492_s24 = ssub.s32 0, %s491_s23 }
  0x4d   : > { %s9147_s24 = smov (!%p488_p8, %s492_s24), %s491_s23 }
  0x4e   : > { %p5981_p9 = scmp.lt.s32.totalorder %s9147_s24, 0  ;;  %s498_s25 = sadd.s32 2, %s9147_s24 }
  0x50   : > { %s9149_s25 = smov (!%p5981_p9, %s498_s25), %s9147_s24 }
  0x51   : > { %p500_p10 = scmp.eq.s32.totalorder %s9149_s25, 0 }
  0x53   : > { %p501_p11 = pnand %p500_p10, %p251_p6 }
  0x54   : > { %v674_v27 = vld [vmem:[#allocation3 + $0x138] sm:$0xff] (!%p501_p11)  ;;  %v675_v28 = vld [vmem:[#allocation3 + $0x140] sm:$0xff] (!%p501_p11)  ;;  %v578_v33 = vld [vmem:[#allocation3 + $0x129] sm:$0xff] (!%p501_p11)  ;;  %s7285_s26 = smov (!%p501_p11), 64   ;;  %vm1131_vm2 = vcmask (!%p501_p11), 523264  }
  0x55   : > { %504 = sbr.rel (%p501_p11) target bundleno = 583 (0x247), region = 44  ;;  %v650_v29 = vld [vmem:[#allocation3 + $0x18] sm:$0xff] (!%p501_p11)  ;;  %v7534_v30 = vpack.c.bf16 (!%p501_p11), %v675_v28, %v674_v27  ;;  %v651_v31 = vld [vmem:[#allocation3 + $0x20] sm:$0xff] (!%p501_p11)  ;;  %v554_v36 = vld [vmem:[#allocation3 + $0x9] sm:$0xff] (!%p501_p11) }
  0x56   : > { %v577_v32 = vld [vmem:[#allocation3 + $0x121] sm:$0xff] (!%p501_p11)  ;;  %v7536_v34 = vpack.c.bf16 (!%p501_p11), %v651_v31, %v650_v29  ;;  %v676_v39 = vld [vmem:[#allocation3 + $0x150] sm:$0xff] (!%p501_p11)  ;;  %v677_v40 = vld [vmem:[#allocation3 + $0x158] sm:$0xff] (!%p501_p11) }
  0x57   : > { %v553_v35 = vld [vmem:[#allocation3 + $0x1] sm:$0xff] (!%p501_p11)  ;;  %1027 = vrot.lane.b32.xlu0 (!%p501_p11), %v7534_v30, %s7285_s26  ;;  %v7540_v37 = vpack.c.bf16 (!%p501_p11), %v578_v33, %v577_v32  ;;  %v579_v41 = vld [vmem:[#allocation3 + $0x139] sm:$0xff] (!%p501_p11)  ;;  %v7546_v43 = vpack.c.bf16 (!%p501_p11), %v677_v40, %v676_v39  ;;  %v652_v45 = vld [vmem:[#allocation3 + $0x30] sm:$0xff] (!%p501_p11) }
  0x58   : > { %1003 = vrot.lane.b32.xlu1 (!%p501_p11), %v7536_v34, %s7285_s26  ;;  %v585_v38 = vpack.c.bf16 (!%p501_p11), %v554_v36, %v553_v35  ;;  %v580_v42 = vld [vmem:[#allocation3 + $0x141] sm:$0xff] (!%p501_p11)  ;;  %v653_v46 = vld [vmem:[#allocation3 + $0x38] sm:$0xff] (!%p501_p11)  ;;  %v679_v52 = vld [vmem:[#allocation3 + $0x170] sm:$0xff] (!%p501_p11) }
  0x59   : > { %v7549_v44 = vpack.c.bf16 (!%p501_p11), %v580_v42, %v579_v41  ;;  %v555_v47 = vld [vmem:[#allocation3 + $0x19] sm:$0xff] (!%p501_p11)  ;;  %v556_v48 = vld [vmem:[#allocation3 + $0x21] sm:$0xff] (!%p501_p11)  ;;  %v7553_v49 = vpack.c.bf16 (!%p501_p11), %v653_v46, %v652_v45  ;;  %v581_v53 = vld [vmem:[#allocation3 + $0x151] sm:$0xff] (!%p501_p11) }
  0x5a   : > { %v7557_v50 = vpack.c.bf16 (!%p501_p11), %v556_v48, %v555_v47  ;;  %v678_v51 = vld [vmem:[#allocation3 + $0x168] sm:$0xff] (!%p501_p11)  ;;  %v582_v54 = vld [vmem:[#allocation3 + $0x159] sm:$0xff] (!%p501_p11)  ;;  %v655_v58 = vld [vmem:[#allocation3 + $0x50] sm:$0xff] (!%p501_p11) }
  0x5b   : > { %979 = vrot.lane.b32.xlu0 (!%p501_p11), %v7540_v37, %s7285_s26  ;;  %v7561_v55 = vpack.c.bf16 (!%p501_p11), %v679_v52, %v678_v51  ;;  %v7565_v56 = vpack.c.bf16 (!%p501_p11), %v582_v54, %v581_v53  ;;  %v654_v57 = vld [vmem:[#allocation3 + $0x48] sm:$0xff] (!%p501_p11)  ;;  %v557_v59 = vld [vmem:[#allocation3 + $0x31] sm:$0xff] (!%p501_p11)  ;;  %v558_v60 = vld [vmem:[#allocation3 + $0x39] sm:$0xff] (!%p501_p11) }
  0x5c   : > { %955 = vrot.lane.b32.xlu1 %v585_v38, %s7285_s26  ;;  %v7569_v61 = vpack.c.bf16 %v655_v58, %v654_v57  ;;  %v7573_v62 = vpack.c.bf16 %v558_v60, %v557_v59  ;;  %v680_v63 = vld [vmem:[#allocation3 + $0x180] sm:$0xff]  ;;  %v681_v0 = vld [vmem:[#allocation3 + $0x188] sm:$0xff]  ;;  %v584_v2 = vld [vmem:[#allocation3 + $0x171] sm:$0xff] }
  0x5d   : > { %v583_v1 = vld [vmem:[#allocation3 + $0x169] sm:$0xff]  ;;  %v697_v3 = vpack.c.bf16 %v681_v0, %v680_v63  ;;  %v656_v4 = vld [vmem:[#allocation3 + $0x60] sm:$0xff]  ;;  %v560_v8 = vld [vmem:[#allocation3 + $0x51] sm:$0xff] }
  0x5e   : > { %v657_v5 = vld [vmem:[#allocation3 + $0x68] sm:$0xff]  ;;  %v7579_v6 = vpack.c.bf16 %v584_v2, %v583_v1  ;;  %v7136_v9 = vld [vmem:[%s7367_s11 + $0x40] sm:$0xff]   ;;  %v7138_v13 = vld [vmem:[%s7367_s11 + $0x48] sm:$0xff]  }
  0x5f   : > { %1029 = vrot.lane.b32.xlu0 %v7546_v43, %s7285_s26  ;;  %v559_v7 = vld [vmem:[#allocation3 + $0x49] sm:$0xff]  ;;  %v7584_v11 = vpack.c.bf16 %v657_v5, %v656_v4  ;;  %7042 = vmatprep.subr.bf16.mxu1 %v7136_v9  ;;  %v746_v14 = vld [vmem:[#allocation3 + $0x1a] sm:$0xff]  ;;  %v748_v26 = vld [vmem:[#allocation3 + $0x32] sm:$0xff] }
  0x60   : > { %981 = vrot.lane.b32.xlu1 %v7549_v44, %s7285_s26  ;;  %v7137_v10 = vld [vmem:[%s7367_s11] sm:$0xff]   ;;  %v7588_v12 = vpack.c.bf16 %v560_v8, %v559_v7  ;;  %v747_v15 = vld [vmem:[#allocation3 + $0x22] sm:$0xff]  ;;  %6190 = vmatprep.subr.bf16.mxu0 %v7136_v9  ;;  %v7139_v16 = vld [vmem:[%s7367_s11 + $0x8] sm:$0xff]  }
  0x61   : > { %7050 = vmatpush3.bf16.msra.mxu1 %v7137_v10  ;;  %v658_v17 = vld [vmem:[#allocation3 + $0x78] sm:$0xff]  ;;  %v659_v18 = vld [vmem:[#allocation3 + $0x80] sm:$0xff]  ;;  %6191 = vmatpush3.bf16.msra.mxu0 %v7137_v10  ;;  %v562_v20 = vld [vmem:[#allocation3 + $0x69] sm:$0xff]  ;;  %v7597_v22 = vpack.c.bf16 %v747_v15, %v746_v14 }
  0x62   : > { %7043 = vmatprep.subr.bf16.mxu1 %v7138_v13  ;;  %v561_v19 = vld [vmem:[#allocation3 + $0x61] sm:$0xff]  ;;  %6192 = vmatprep.subr.bf16.mxu0 %v7138_v13  ;;  %v7603_v25 = vpack.c.bf16 %v659_v18, %v658_v17  ;;  %v7144_v31 = vld [vmem:[%s7367_s11 + $0x60] sm:$0xff]   ;;  %v661_v33 = vld [vmem:[#allocation3 + $0x98] sm:$0xff] }
  0x63   : > { %1005 = vrot.lane.b32.xlu0 %v7553_v49, %s7285_s26  ;;  %v7140_v21 = vld [vmem:[%s7367_s11 + $0x50] sm:$0xff]   ;;  %v7142_v24 = vld [vmem:[%s7367_s11 + $0x58] sm:$0xff]   ;;  %v589_v28 = vpack.c.bf16 %v562_v20, %v561_v19  ;;  %v660_v32 = vld [vmem:[#allocation3 + $0x90] sm:$0xff] }
  0x64   : > { %957 = vrot.lane.b32.xlu1 %v7557_v50, %s7285_s26  ;;  %v7141_v23 = vld [vmem:[%s7367_s11 + $0x10] sm:$0xff]   ;;  %v7143_v29 = vld [vmem:[%s7367_s11 + $0x18] sm:$0xff]   ;;  %v7145_v39 = vld [vmem:[%s7367_s11 + $0x20] sm:$0xff]   ;;  %v7618_v41 = vpack.c.bf16 %v661_v33, %v660_v32 }
  0x65   : > { %7051 = vmatpush3.bf16.msra.mxu1 %v7139_v16  ;;  %6193 = vmatpush3.bf16.msra.mxu0 %v7139_v16  ;;  %v749_v27 = vld [vmem:[#allocation3 + $0x3a] sm:$0xff]  ;;  %v750_v45 = vld [vmem:[#allocation3 + $0x4a] sm:$0xff]  ;;  %v751_v46 = vld [vmem:[#allocation3 + $0x52] sm:$0xff] }
  0x66   : > { %7044 = vmatprep.subr.bf16.mxu1 %v7140_v21  ;;  %6194 = vmatprep.subr.bf16.mxu0 %v7140_v21  ;;  %v563_v35 = vld [vmem:[#allocation3 + $0x79] sm:$0xff]  ;;  %v564_v36 = vld [vmem:[#allocation3 + $0x81] sm:$0xff]  ;;  %v7612_v38 = vpack.c.bf16 %v749_v27, %v748_v26  ;;  %v663_v52 = vld [vmem:[#allocation3 + $0xb0] sm:$0xff]  ;;  %v7627_v54 = vpack.c.bf16 %v751_v46, %v750_v45 }
  0x67   : > { %1031 = vrot.lane.b32.xlu0 %v7561_v55, %s7285_s26  ;;  %v7146_v40 = vld [vmem:[%s7367_s11 + $0x68] sm:$0xff]   ;;  %v590_v42 = vpack.c.bf16 %v564_v36, %v563_v35  ;;  %v7148_v48 = vld [vmem:[%s7367_s11 + $0x70] sm:$0xff]   ;;  %v662_v51 = vld [vmem:[#allocation3 + $0xa8] sm:$0xff] }
  0x68   : > { %983 = vrot.lane.b32.xlu1 %v7565_v56, %s7285_s26  ;;  %v7147_v47 = vld [vmem:[%s7367_s11 + $0x28] sm:$0xff]   ;;  %v7149_v58 = vld [vmem:[%s7367_s11 + $0x30] sm:$0xff]   ;;  %v7150_v59 = vld [vmem:[%s7367_s11 + $0x78] sm:$0xff]   ;;  %v7632_v60 = vpack.c.bf16 %v663_v52, %v662_v51 }
  0x69   : > { %7052 = vmatpush3.bf16.msra.mxu1 %v7141_v23  ;;  %6195 = vmatpush3.bf16.msra.mxu0 %v7141_v23  ;;  %v565_v53 = vld [vmem:[#allocation3 + $0x91] sm:$0xff]  ;;  %v566_v57 = vld [vmem:[#allocation3 + $0x99] sm:$0xff]  ;;  %v752_v63 = vld [vmem:[#allocation3 + $0x62] sm:$0xff] }
  0x6a   : > { %7045 = vmatprep.subr.bf16.mxu1 %v7142_v24  ;;  %6196 = vmatprep.subr.bf16.mxu0 %v7142_v24  ;;  %v753_v0 = vld [vmem:[#allocation3 + $0x6a] sm:$0xff]  ;;  %v591_v1 = vpack.c.bf16 %v566_v57, %v565_v53  ;;  %v664_v7 = vld [vmem:[#allocation3 + $0xc0] sm:$0xff]  ;;  %v666_v17 = vld [vmem:[#allocation3 + $0xd8] sm:$0xff] }
  0x6b   : > { %1007 = vrot.lane.b32.xlu0 %v7569_v61, %s7285_s26  ;;  %v7151_v2 = vld [vmem:[%s7367_s11 + $0x38] sm:$0xff]   ;;  %v7641_v4 = vld [vmem:[%s7367_s11 + $0x100] sm:$0xff]   ;;  %v7644_v5 = vpack.c.bf16 %v753_v0, %v752_v63  ;;  %v754_v15 = vld [vmem:[#allocation3 + $0x7a] sm:$0xff] }
  0x6c   : > { %959 = vrot.lane.b32.xlu1 %v7573_v62, %s7285_s26  ;;  %v665_v8 = vld [vmem:[#allocation3 + $0xc8] sm:$0xff]  ;;  %v568_v10 = vld [vmem:[#allocation3 + $0xb1] sm:$0xff]  ;;  %v667_v18 = vld [vmem:[#allocation3 + $0xe0] sm:$0xff] }
  0x6d   : > { %7053 = vmatpush3.bf16.msra.mxu1 %v7143_v29  ;;  %6197 = vmatpush3.bf16.msra.mxu0 %v7143_v29  ;;  %v567_v9 = vld [vmem:[#allocation3 + $0xa9] sm:$0xff]  ;;  %v7647_v13 = vpack.c.bf16 %v665_v8, %v664_v7  ;;  %v569_v20 = vld [vmem:[#allocation3 + $0xc1] sm:$0xff]  ;;  %v690_v23 = vpack.c.bf16 %v667_v18, %v666_v17  ;;  %v756_v26 = vld [vmem:[#allocation3 + $0x92] sm:$0xff] }
  0x6e   : > { %7046 = vmatprep.subr.bf16.mxu1 %v7144_v31  ;;  %6198 = vmatprep.subr.bf16.mxu0 %v7144_v31  ;;  %v592_v14 = vpack.c.bf16 %v568_v10, %v567_v9  ;;  %v755_v16 = vld [vmem:[#allocation3 + $0x82] sm:$0xff]  ;;  %v757_v27 = vld [vmem:[#allocation3 + $0x9a] sm:$0xff]  ;;  %v668_v29 = vld [vmem:[#allocation3 + $0xf0] sm:$0xff] }
  0x6f   : > { %1033 = vrot.lane.b32.xlu0 %v697_v3, %s7285_s26  ;;  %v7152_v3 = vld [vmem:[%s7367_s11 + $0xc0] sm:$0xff]   ;;  %v7655_v19 = vpack.c.bf16 %v755_v16, %v754_v15  ;;  %v669_v31 = vld [vmem:[#allocation3 + $0xf8] sm:$0xff]  ;;  %v572_v33 = vld [vmem:[#allocation3 + $0xe1] sm:$0xff] }
  0x70   : > { %985 = vrot.lane.b32.xlu1 %v7579_v6, %s7285_s26  ;;  %v570_v21 = vld [vmem:[#allocation3 + $0xc9] sm:$0xff]  ;;  %v571_v32 = vld [vmem:[#allocation3 + $0xd9] sm:$0xff]  ;;  %v691_v35 = vpack.c.bf16 %v669_v31, %v668_v29 }
  0x71   : > { %7054 = vmatpush3.bf16.msra.mxu1 %v7145_v39  ;;  %6199 = vmatpush3.bf16.msra.mxu0 %v7145_v39  ;;  %v593_v24 = vpack.c.bf16 %v570_v21, %v569_v20  ;;  %v594_v36 = vpack.c.bf16 %v572_v33, %v571_v32  ;;  %v758_v39 = vld [vmem:[#allocation3 + $0xaa] sm:$0xff]  ;;  %v760_v53 = vld [vmem:[#allocation3 + $0xc2] sm:$0xff]  ;;  %v762_v7 = vld [vmem:[#allocation3 + $0xda] sm:$0xff] }
  0x72   : > { %7047 = vmatprep.subr.bf16.mxu1 %v7146_v40  ;;  %6200 = vmatprep.subr.bf16.mxu0 %v7146_v40  ;;  %v759_v40 = vld [vmem:[#allocation3 + $0xb2] sm:$0xff]  ;;  %v670_v45 = vld [vmem:[#allocation3 + $0x108] sm:$0xff] }
  0x73   : > { %1009 = vrot.lane.b32.xlu0 %v7584_v11, %s7285_s26  ;;  %v671_v46 = vld [vmem:[#allocation3 + $0x110] sm:$0xff]  ;;  %v673_v63 = vld [vmem:[#allocation3 + $0x128] sm:$0xff] }
  0x74   : > { %961 = vrot.lane.b32.xlu1 %v7588_v12, %s7285_s26  ;;  %v692_v51 = vpack.c.bf16 %v671_v46, %v670_v45  ;;  %v761_v57 = vld [vmem:[#allocation3 + $0xca] sm:$0xff]  ;;  %v763_v8 = vld [vmem:[#allocation3 + $0xe2] sm:$0xff]  ;;  %v764_v10 = vld [vmem:[#allocation3 + $0xf2] sm:$0xff] }
  0x75   : > { %7055 = vmatpush3.bf16.msra.mxu1 %v7147_v47  ;;  %6201 = vmatpush3.bf16.msra.mxu0 %v7147_v47  ;;  %v573_v47 = vld [vmem:[#allocation3 + $0xf1] sm:$0xff]  ;;  %v575_v0 = vld [vmem:[#allocation3 + $0x109] sm:$0xff]  ;;  %v7683_v9 = vpack.c.bf16 %v763_v8, %v762_v7 }
  0x76   : > { %7048 = vmatprep.subr.bf16.mxu1 %v7148_v48  ;;  %6202 = vmatprep.subr.bf16.mxu0 %v7148_v48  ;;  %v574_v48 = vld [vmem:[#allocation3 + $0xf9] sm:$0xff]  ;;  %v766_v16 = vld [vmem:[#allocation3 + $0x10a] sm:$0xff]  ;;  %v625_v20 = vld [vmem:[#allocation3 + $0x122] sm:$0xff] }
  0x77   : > { %1099 = vrot.lane.b32.xlu0 %v7573_v62, %s7285_s26  ;;  %v595_v52 = vpack.c.bf16 %v574_v48, %v573_v47  ;;  %v767_v17 = vld [vmem:[#allocation3 + $0x112] sm:$0xff]  ;;  %v626_v21 = vld [vmem:[#allocation3 + $0x12a] sm:$0xff] }
  0x78   : > { %1051 = vrot.lane.b32.xlu1 %v7597_v22, %s7285_s26  ;;  %v7693_v18 = vpack.c.bf16 %v767_v17, %v766_v16  ;;  %v602_v29 = vld [vmem:[#allocation3 + $0xa] sm:$0xff]  ;;  %v629_v33 = vld [vmem:[#allocation3 + $0x152] sm:$0xff] }
  0x79   : > { %7056 = vmatpush3.bf16.msra.mxu1 %v7149_v58  ;;  %6203 = vmatpush3.bf16.msra.mxu0 %v7149_v58  ;;  %v7676_v58 = vpack.c.bf16 %v761_v57, %v760_v53  ;;  %v873_v53 = vld [vmem:[#allocation3 + $0x199] sm:$0xff]  ;;  %v874_v57 = vld [vmem:[#allocation3 + $0x1a1] sm:$0xff]  ;;  %v777_v16 = vld [vmem:[#allocation3 + $0x18a] sm:$0xff] }
  0x7a   : > { %7049 = vmatprep.subr.bf16.mxu1 %v7150_v59  ;;  %6204 = vmatprep.subr.bf16.mxu0 %v7150_v59  ;;  %v672_v59 = vld [vmem:[#allocation3 + $0x120] sm:$0xff]  ;;  %v7168_v8 = vld [vmem:[%s7367_s11 + $0x108] sm:$0xff]  }
  0x7b   : > { %1011 = vrot.lane.b32.xlu0 %v7603_v25, %s7285_s26  ;;  %v7156_v17 = vld [vmem:[%s7367_s11 + $0x88] sm:$0xff]  }
  0x7c   : > { %963 = vrot.lane.b32.xlu1 %v589_v28, %s7285_s26 }
  0x7d   : > { %7057 = vmatpush3.bf16.msra.mxu1 %v7151_v2  ;;  %6205 = vmatpush3.bf16.msra.mxu0 %v7151_v2  ;;  %v693_v2 = vpack.c.bf16 %v673_v63, %v672_v59  ;;  %v7155_v63 = vld [vmem:[%s7367_s11 + $0xc8] sm:$0xff]  }
  0x7e   : > { %6302 = vmatprep.subr.bf16.mxu1 %v7152_v3  ;;  %6922 = vmatprep.subr.bf16.mxu0 %v7641_v4 }
  0x7f   : > { %1101 = vrot.lane.b32.xlu0 %v7588_v12, %s7285_s26 }
  0x80   : > { %1053 = vrot.lane.b32.xlu1 %v7612_v38, %s7285_s26 }
  0x83   : > { %1013 = vrot.lane.b32.xlu0 %v7618_v41, %s7285_s26 }
  0x84   : > { %965 = vrot.lane.b32.xlu1 %v590_v42, %s7285_s26 }
  0x87   : > { %1103 = vrot.lane.b32.xlu0 %v589_v28, %s7285_s26  ;;  %v7662_v28 = vpack.c.bf16 %v757_v27, %v756_v26  ;;  %v628_v26 = vld [vmem:[#allocation3 + $0x142] sm:$0xff] }
  0x88   : > { %1055 = vrot.lane.b32.xlu1 %v7627_v54, %s7285_s26  ;;  %v601_v27 = vld [vmem:[#allocation3 + $0x2] sm:$0xff] }
  0x89   : > { %v633_v32 = vpack.c.bf16 %v602_v29, %v601_v27  ;;  %v7170_v27 = vld [vmem:[%s7367_s11 + $0x110] sm:$0xff]  }
  0x8a   : > { %v7158_v29 = vld [vmem:[%s7367_s11 + $0x90] sm:$0xff]  }
  0x8b   : > { %1015 = vrot.lane.b32.xlu0 %v7632_v60, %s7285_s26 }
  0x8c   : > { %967 = vrot.lane.b32.xlu1 %v591_v1, %s7285_s26 }
  0x8f   : > { %1105 = vrot.lane.b32.xlu0 %v590_v42, %s7285_s26  ;;  %v7669_v42 = vpack.c.bf16 %v759_v40, %v758_v39  ;;  %v872_v39 = vld [vmem:[#allocation3 + $0x189] sm:$0xff] }
  0x90   : > { %1057 = vrot.lane.b32.xlu1 %v7644_v5, %s7285_s26 }
  0x93   : > { %1017 = vrot.lane.b32.xlu0 %v7647_v13, %s7285_s26 }
  0x94   : > { %969 = vrot.lane.b32.xlu1 %v592_v14, %s7285_s26 }
  0x97   : > { %1107 = vrot.lane.b32.xlu0 %v591_v1, %s7285_s26  ;;  %v576_v1 = vld [vmem:[#allocation3 + $0x111] sm:$0xff] }
  0x98   : > { %1059 = vrot.lane.b32.xlu1 %v7655_v19, %s7285_s26  ;;  %v596_v3 = vpack.c.bf16 %v576_v1, %v575_v0  ;;  %v631_v0 = vld [vmem:[#allocation3 + $0x16a] sm:$0xff]  ;;  %v632_v1 = vld [vmem:[#allocation3 + $0x172] sm:$0xff] }
  0x9b   : > { %1019 = vrot.lane.b32.xlu0 %v690_v23, %s7285_s26  ;;  %v645_v23 = vpack.c.bf16 %v626_v21, %v625_v20  ;;  %v7726_v20 = vpack.c.bf16 %v632_v1, %v631_v0 }
  0x9c   : > { %971 = vrot.lane.b32.xlu1 %v593_v24, %s7285_s26 }
  0x9f   : > { %1109 = vrot.lane.b32.xlu0 %v592_v14, %s7285_s26  ;;  %v765_v14 = vld [vmem:[#allocation3 + $0xfa] sm:$0xff] }
  0xa0   : > { %1061 = vrot.lane.b32.xlu1 %v7662_v28, %s7285_s26  ;;  %v7688_v15 = vpack.c.bf16 %v765_v14, %v764_v10  ;;  %v890_v10 = vpack.c.bf16 %v874_v57, %v873_v53  ;;  %v776_v14 = vld [vmem:[#allocation3 + $0x182] sm:$0xff] }
  0xa3   : > { %1021 = vrot.lane.b32.xlu0 %v691_v35, %s7285_s26  ;;  %v630_v35 = vld [vmem:[#allocation3 + $0x15a] sm:$0xff] }
  0xa4   : > { %973 = vrot.lane.b32.xlu1 %v594_v36, %s7285_s26  ;;  %v7709_v47 = vpack.c.bf16 %v630_v35, %v629_v33 }
  0xa7   : > { %1111 = vrot.lane.b32.xlu0 %v593_v24, %s7285_s26  ;;  %v627_v24 = vld [vmem:[#allocation3 + $0x13a] sm:$0xff] }
  0xa8   : > { %1063 = vrot.lane.b32.xlu1 %v7669_v42, %s7285_s26  ;;  %v7702_v31 = vpack.c.bf16 %v628_v26, %v627_v24  ;;  %v7734_v26 = vpack.c.bf16 %v777_v16, %v776_v14  ;;  %v7169_v16 = vld [vmem:[%s7367_s11 + $0xb8] sm:$0xff]  }
  0xab   : > { %1023 = vrot.lane.b32.xlu0 %v692_v51, %s7285_s26 }
  0xac   : > { %975 = vrot.lane.b32.xlu1 %v595_v52, %s7285_s26 }
  0xaf   : > { %1113 = vrot.lane.b32.xlu0 %v594_v36, %s7285_s26  ;;  %v506_v36 = vld [vmem:[#allocation3 + $0x8] sm:$0xff] }
  0xb0   : > { %1065 = vrot.lane.b32.xlu1 %v7676_v58, %s7285_s26 }
  0xb3   : > { %1025 = vrot.lane.b32.xlu0 %v693_v2, %s7285_s26 }
  0xb4   : > { %977 = vrot.lane.b32.xlu1 %v596_v3, %s7285_s26 }
  0xb7   : > { %1115 = vrot.lane.b32.xlu0 %v595_v52, %s7285_s26  ;;  %v7153_v52 = vld [vmem:[%s7367_s11 + $0x80] sm:$0xff]  }
  0xb8   : > { %1067 = vrot.lane.b32.xlu1 %v7683_v9, %s7285_s26 }
  0xbb   : > { %1117 = vrot.lane.b32.xlu0 %v596_v3, %s7285_s26 }
  0xbc   : > { %1069 = vrot.lane.b32.xlu1 %v7688_v15, %s7285_s26 }
  0xbf   : > { %1119 = vrot.lane.b32.xlu0 %v7540_v37, %s7285_s26  ;;  %v505_v37 = vld [vmem:[#allocation3] sm:$0xff] }
  0xc0   : > { %1071 = vrot.lane.b32.xlu1 %v7693_v18, %s7285_s26  ;;  %v537_v48 = vpack.c.bf16 %v506_v36, %v505_v37  ;;  %v7159_v37 = vld [vmem:[%s7367_s11 + $0xd8] sm:$0xff]  }
  0xc1   : > { %v7171_v36 = vld [vmem:[%s7367_s11 + $0x118] sm:$0xff]  }
  0xc3   : > { %1121 = vrot.lane.b32.xlu0 %v7549_v44, %s7285_s26  ;;  %v871_v44 = vld [vmem:[#allocation3 + $0x181] sm:$0xff] }
  0xc4   : > { %1073 = vrot.lane.b32.xlu1 %v645_v23, %s7285_s26  ;;  %v7714_v51 = vpack.c.bf16 %v872_v39, %v871_v44  ;;  %v7160_v44 = vld [vmem:[%s7367_s11 + $0x98] sm:$0xff]  }
  0xc7   : > { %1123 = vrot.lane.b32.xlu0 %v7565_v56, %s7285_s26 }
  0xc8   : > { %1075 = vrot.lane.b32.xlu1 %v7702_v31, %s7285_s26 }
  0xc9   : > { %v1028_v40 = vpop.permute.xlu0 %1027 }
  0xca   : > { %v1004_v45 = vpop.permute.xlu1 %1003  ;;  %v1246_v46 = vsel %vm1131_vm2, %v645_v23, %v1028_v40  ;;  %v7161_v40 = vld [vmem:[%s7367_s11 + $0xe0] sm:$0xff]  }
  0xcb   : > { %1859 = vmatprep.mubr.bf16.mxu1 %v1246_v46  ;;  %v1198_v56 = vsel %vm1131_vm2, %v633_v32, %v1004_v45  ;;  %1125 = vrot.lane.b32.xlu0 %v7579_v6, %s7285_s26 }
  0xcc   : > { %1763 = vmatprep.mubr.bf16.mxu0 %v1198_v56  ;;  %1077 = vrot.lane.b32.xlu1 %v7709_v47, %s7285_s26 }
  0xcd   : > { %v980_v59 = vpop.permute.xlu0 %979 }
  0xce   : > { %v956_v3 = vpop.permute.xlu1 %955  ;;  %v1182_v7 = vsel %vm1131_vm2, %v693_v2, %v980_v59  ;;  %v7157_v2 = vld [vmem:[%s7367_s11 + $0xd0] sm:$0xff]  }
  0xcf   : > { %1860 = vmatmul.mubr.bf16.vlgmr.msra.gmra.mrb[0].mxu1 %v1182_v7  ;;  %v1134_v6 = vsel %vm1131_vm2, %v537_v48, %v956_v3  ;;  %1127 = vrot.lane.b32.xlu0 %v7714_v51, %s7285_s26  ;;  %v7163_v48 = vld [vmem:[%s7367_s11 + $0xe8] sm:$0xff]   ;;  %v7166_v3 = vld [vmem:[%s7367_s11 + $0xb0] sm:$0xff]  }
  0xd0   : > { %6303 = vmatpush3.bf16.msra.mxu1 %v7153_v52  ;;  %1764 = vmatmul.mubr.bf16.vlgmr.msra.gmra.mrb[0].mxu0 %v1134_v6 }
  0xd1   : > { %v1030_v21 = vpop.permute.xlu0 %1029  ;;  %6304 = vmatprep.subr.bf16.mxu1 %v7155_v63  ;;  %6923 = vmatpush3.bf16.msra.mxu0 %v7641_v4  ;;  %v7165_v63 = vld [vmem:[%s7367_s11 + $0xf0] sm:$0xff]  }
  0xd2   : > { %v982_v23 = vpop.permute.xlu1 %981  ;;  %v1250_v24 = vsel %vm1131_vm2, %v7702_v31, %v1030_v21  ;;  %6924 = vmatprep.subr.bf16.mxu0 %v7168_v8  ;;  %1079 = vrot.lane.b32.xlu1 %v7726_v20, %s7285_s26 }
  0xd3   : > { %1867 = vmatprep.mubr.bf16.mxu1 %v1250_v24  ;;  %1129 = vrot.lane.b32.xlu0 %v890_v10, %s7285_s26  ;;  %v1186_v4 = vsel %vm1131_vm2, %v7534_v30, %v982_v23 }
  0xd4   : > { %6305 = vmatpush3.bf16.msra.mxu1 %v7156_v17 }
  0xd5   : > { %v1006_v32 = vpop.permute.xlu0 %1005  ;;  %6306 = vmatprep.subr.bf16.mxu1 %v7157_v2  ;;  %6925 = vmatpush3.bf16.msra.mxu0 %v7168_v8  ;;  %v7167_v8 = vld [vmem:[%s7367_s11 + $0xf8] sm:$0xff]  }
  0xd6   : > { %v958_v33 = vpop.permute.xlu1 %957  ;;  %v1202_v35 = vsel %vm1131_vm2, %v7597_v22, %v1006_v32  ;;  %1081 = vrot.lane.b32.xlu1 %v7734_v26, %s7285_s26  ;;  %6926 = vmatprep.subr.bf16.mxu0 %v7170_v27 }
  0xd7   : > { %1771 = vmatprep.mubr.bf16.mxu0 %v1202_v35  ;;  %1868 = vmatmul.mubr.bf16.gmra.mrb[4].mxu1 %v1186_v4  ;;  %v1138_v30 = vsel %vm1131_vm2, %v7536_v34, %v958_v33  ;;  %v7162_v34 = vld [vmem:[%s7367_s11 + $0xa0] sm:$0xff]  }
  0xd8   : > { %6307 = vmatpush3.bf16.msra.mxu1 %v7158_v29  ;;  %1772 = vmatmul.mubr.bf16.gmra.mrb[4].mxu0 %v1138_v30  ;;  %v801_v30 = vld [vmem:[#allocation3 + $0x78] sm:$0xff] }
  0xd9   : > { %v1032_v39 = vpop.permute.xlu0 %1031  ;;  %6308 = vmatprep.subr.bf16.mxu1 %v7159_v37  ;;  %6927 = vmatpush3.bf16.msra.mxu0 %v7170_v27 }
  0xda   : > { %v984_v22 = vpop.permute.xlu1 %983  ;;  %v1254_v45 = vsel %vm1131_vm2, %v7709_v47, %v1032_v39  ;;  %6928 = vmatprep.subr.bf16.mxu0 %v7171_v36 }
  0xdb   : > { %1875 = vmatprep.mubr.bf16.mxu1 %v1254_v45  ;;  %v1190_v46 = vsel %vm1131_vm2, %v7546_v43, %v984_v22  ;;  %v7164_v43 = vld [vmem:[%s7367_s11 + $0xa8] sm:$0xff]  }
  0xdc   : > { %6309 = vmatpush3.bf16.msra.mxu1 %v7160_v44  ;;  %v802_v44 = vld [vmem:[#allocation3 + $0x80] sm:$0xff] }
  0xdd   : > { %v1008_v56 = vpop.permute.xlu0 %1007  ;;  %6310 = vmatprep.subr.bf16.mxu1 %v7161_v40  ;;  %6929 = vmatpush3.bf16.msra.mxu0 %v7171_v36  ;;  %v704_v40 = vld [vmem:[#allocation3 + $0x61] sm:$0xff] }
  0xde   : > { %v960_v52 = vpop.permute.xlu1 %959  ;;  %v1206_v53 = vsel %vm1131_vm2, %v7612_v38, %v1008_v56 }
  0xdf   : > { %1779 = vmatprep.mubr.bf16.mxu0 %v1206_v53  ;;  %1876 = vmatmul.mubr.bf16.gmra.mrb[8].mxu1 %v1190_v46  ;;  %v1142_v57 = vsel %vm1131_vm2, %v7553_v49, %v960_v52  ;;  %v804_v52 = vld [vmem:[#allocation3 + $0x98] sm:$0xff] }
  0xe0   : > { %6311 = vmatpush3.bf16.msra.mxu1 %v7162_v34  ;;  %1780 = vmatmul.mubr.bf16.gmra.mrb[8].mxu0 %v1142_v57 }
  0xe1   : > { %v1034_v59 = vpop.permute.xlu0 %1033  ;;  %6312 = vmatprep.subr.bf16.mxu1 %v7163_v48 }
  0xe2   : > { %v986_v0 = vpop.permute.xlu1 %985  ;;  %v1258_v1 = vsel %vm1131_vm2, %v7726_v20, %v1034_v59 }
  0xe3   : > { %1883 = vmatprep.mubr.bf16.mxu1 %v1258_v1  ;;  %v1194_v38 = vsel %vm1131_vm2, %v7561_v55, %v986_v0 }
  0xe4   : > { %6313 = vmatpush3.bf16.msra.mxu1 %v7164_v43  ;;  %v706_v43 = vld [vmem:[#allocation3 + $0x79] sm:$0xff] }
  0xe5   : > { %v1010_v7 = vpop.permute.xlu0 %1009  ;;  %6314 = vmatprep.subr.bf16.mxu1 %v7165_v63 }
  0xe6   : > { %v962_v6 = vpop.permute.xlu1 %961  ;;  %v1210_v10 = vsel %vm1131_vm2, %v7627_v54, %v1010_v7 }
  0xe7   : > { %1787 = vmatprep.mubr.bf16.mxu0 %v1210_v10  ;;  %1884 = vmatmul.mubr.bf16.gmra.mrb[12].mxu1 %v1194_v38  ;;  %v1146_v14 = vsel %vm1131_vm2, %v7569_v61, %v962_v6  ;;  %v806_v6 = vld [vmem:[#allocation3 + $0xb0] sm:$0xff] }
  0xe8   : > { %6315 = vmatpush3.bf16.msra.mxu1 %v7166_v3  ;;  %1788 = vmatmul.mubr.bf16.gmra.mrb[12].mxu0 %v1146_v14 }
  0xe9   : > { %v1100_v17 = vpop.permute.xlu0 %1099  ;;  %6316 = vmatprep.subr.bf16.mxu1 %v7167_v8  ;;  %v805_v8 = vld [vmem:[#allocation3 + $0xa8] sm:$0xff] }
  0xea   : > { %v1052_v21 = vpop.permute.xlu1 %1051  ;;  %v1326_v55 = vsel %vm1131_vm2, %v7553_v49, %v1100_v17 }
  0xeb   : > { %1924 = vmatprep.mubr.bf16.mxu1 %v1326_v55  ;;  %v1262_v2 = vsel %vm1131_vm2, %v7557_v50, %v1052_v21  ;;  %v832_v55 = vpack.c.bf16 %v806_v6, %v805_v8 }
  0xec   : > { %6317 = vmatpush3.bf16.msra.mxu1 %v7169_v16  ;;  %v708_v16 = vld [vmem:[#allocation3 + $0x91] sm:$0xff] }
  0xed   : > { %v1012_v54 = vpop.permute.xlu0 %1011 }
  0xee   : > { %v964_v23 = vpop.permute.xlu1 %963  ;;  %v1214_v24 = vsel %vm1131_vm2, %v7644_v5, %v1012_v54  ;;  %v523_v54 = vld [vmem:[#allocation3 + $0xd8] sm:$0xff] }
  0xef   : > { %1795 = vmatprep.mubr.bf16.mxu0 %v1214_v24  ;;  %1925 = vmatmul.mubr.bf16.vlgmr.msra.gmra.mrb[16].mxu1 %v1262_v2  ;;  %v1150_v27 = vsel %vm1131_vm2, %v7584_v11, %v964_v23  ;;  %v524_v23 = vld [vmem:[#allocation3 + $0xe0] sm:$0xff] }
  0xf0   : > { %1796 = vmatmul.mubr.bf16.gmra.mrb[16].mxu0 %v1150_v27 }
  0xf1   : > { %v1102_v4 = vpop.permute.xlu0 %1101 }
  0xf2   : > { %v1054_v29 = vpop.permute.xlu1 %1053  ;;  %v1330_v49 = vsel %vm1131_vm2, %v7569_v61, %v1102_v4 }
  0xf3   : > { %1932 = vmatprep.mubr.bf16.mxu1 %v1330_v49  ;;  %v1266_v50 = vsel %vm1131_vm2, %v7573_v62, %v1054_v29  ;;  %v546_v29 = vpack.c.bf16 %v524_v23, %v523_v54  ;;  %v807_v49 = vld [vmem:[#allocation3 + $0xc0] sm:$0xff]  ;;  %v716_v54 = vld [vmem:[#allocation3 + $0xf1] sm:$0xff] }
  0xf4   : > { %v717_v23 = vld [vmem:[#allocation3 + $0xf9] sm:$0xff] }
  0xf5   : > { %v1014_v32 = vpop.permute.xlu0 %1013 }
  0xf6   : > { %v966_v37 = vpop.permute.xlu1 %965  ;;  %v1218_v5 = vsel %vm1131_vm2, %v7655_v19, %v1014_v32  ;;  %v705_v19 = vld [vmem:[#allocation3 + $0x69] sm:$0xff] }
  0xf7   : > { %1803 = vmatprep.mubr.bf16.mxu0 %v1218_v5  ;;  %1933 = vmatmul.mubr.bf16.gmra.mrb[20].mxu1 %v1266_v50  ;;  %v1154_v33 = vsel %vm1131_vm2, %v7603_v25, %v966_v37  ;;  %v830_v25 = vpack.c.bf16 %v802_v44, %v801_v30  ;;  %v808_v50 = vld [vmem:[#allocation3 + $0xc8] sm:$0xff]  ;;  %v711_v5 = vld [vmem:[#allocation3 + $0xb1] sm:$0xff] }
  0xf8   : > { %1804 = vmatmul.mubr.bf16.gmra.mrb[20].mxu0 %v1154_v33  ;;  %v710_v37 = vld [vmem:[#allocation3 + $0xa9] sm:$0xff]  ;;  %v526_v44 = vld [vmem:[#allocation3 + $0xf8] sm:$0xff] }
  0xf9   : > { %v1104_v35 = vpop.permute.xlu0 %1103  ;;  %v525_v30 = vld [vmem:[#allocation3 + $0xf0] sm:$0xff] }
  0xfa   : > { %v1056_v36 = vpop.permute.xlu1 %1055  ;;  %v1334_v61 = vsel %vm1131_vm2, %v7584_v11, %v1104_v35  ;;  %v733_v11 = vpack.c.bf16 %v705_v19, %v704_v40  ;;  %v833_v35 = vpack.c.bf16 %v808_v50, %v807_v49  ;;  %v547_v19 = vpack.c.bf16 %v526_v44, %v525_v30  ;;  %v718_v30 = vld [vmem:[#allocation3 + $0x109] sm:$0xff]  ;;  %v719_v44 = vld [vmem:[#allocation3 + $0x111] sm:$0xff] }
  0xfb   : > { %1940 = vmatprep.mubr.bf16.mxu1 %v1334_v61  ;;  %v1270_v62 = vsel %vm1131_vm2, %v7588_v12, %v1056_v36  ;;  %v803_v12 = vld [vmem:[#allocation3 + $0x90] sm:$0xff]  ;;  %v736_v61 = vpack.c.bf16 %v711_v5, %v710_v37  ;;  %v739_v49 = vpack.c.bf16 %v717_v23, %v716_v54  ;;  %v911_v54 = vld [vmem:[#allocation3 + $0x122] sm:$0xff] }
  0xfc   : > { %v831_v0 = vpack.c.bf16 %v804_v52, %v803_v12  ;;  %v528_v12 = vld [vmem:[#allocation3 + $0x110] sm:$0xff] }
  0xfd   : > { %v1016_v39 = vpop.permute.xlu0 %1015  ;;  %v912_v23 = vld [vmem:[#allocation3 + $0x12a] sm:$0xff] }
  0xfe   : > { %v968_v22 = vpop.permute.xlu1 %967  ;;  %v1222_v45 = vsel %vm1131_vm2, %v7662_v28, %v1016_v39  ;;  %v707_v28 = vld [vmem:[#allocation3 + $0x81] sm:$0xff] }
  0xff   : > { %1811 = vmatprep.mubr.bf16.mxu0 %v1222_v45  ;;  %1941 = vmatmul.mubr.bf16.gmra.mrb[24].mxu1 %v1270_v62  ;;  %v1158_v46 = vsel %vm1131_vm2, %v7618_v41, %v968_v22  ;;  %v734_v1 = vpack.c.bf16 %v707_v28, %v706_v43  ;;  %v891_v43 = vld [vmem:[#allocation3 + $0x32] sm:$0xff]  ;;  %v892_v28 = vld [vmem:[#allocation3 + $0x3a] sm:$0xff] }
 0x100   : > { %1812 = vmatmul.mubr.bf16.gmra.mrb[24].mxu0 %v1158_v46 }
 0x101   : > { %v1106_v34 = vpop.permute.xlu0 %1105 }
 0x102   : > { %v1058_v56 = vpop.permute.xlu1 %1057  ;;  %v1338_v48 = vsel %vm1131_vm2, %v830_v25, %v1106_v34  ;;  %v712_v25 = vld [vmem:[#allocation3 + $0xc1] sm:$0xff] }
 0x103   : > { %1948 = vmatprep.mubr.bf16.mxu1 %v1338_v48  ;;  %v1274_v53 = vsel %vm1131_vm2, %v733_v11, %v1058_v56  ;;  %v527_v48 = vld [vmem:[#allocation3 + $0x108] sm:$0xff] }
 0x105   : > { %v1018_v57 = vpop.permute.xlu0 %1017 }
 0x106   : > { %v970_v59 = vpop.permute.xlu1 %969  ;;  %v1226_v63 = vsel %vm1131_vm2, %v7669_v42, %v1018_v57  ;;  %v709_v42 = vld [vmem:[#allocation3 + $0x99] sm:$0xff] }
 0x107   : > { %1819 = vmatprep.mubr.bf16.mxu0 %v1226_v63  ;;  %1949 = vmatmul.mubr.bf16.gmra.mrb[28].mxu1 %v1274_v53  ;;  %v1162_v41 = vsel %vm1131_vm2, %v7632_v60, %v970_v59  ;;  %v735_v2 = vpack.c.bf16 %v709_v42, %v708_v16  ;;  %v548_v59 = vpack.c.bf16 %v528_v12, %v527_v48 }
 0x108   : > { %1820 = vmatmul.mubr.bf16.gmra.mrb[28].mxu0 %v1162_v41  ;;  %v715_v41 = vld [vmem:[#allocation3 + $0xe1] sm:$0xff] }
 0x109   : > { %v1108_v38 = vpop.permute.xlu0 %1107 }
 0x10a   : > { %v1060_v3 = vpop.permute.xlu1 %1059  ;;  %v1342_v7 = vsel %vm1131_vm2, %v831_v0, %v1108_v38 }
 0x10b   : > { %1956 = vmatprep.mubr.bf16.mxu1 %v1342_v7  ;;  %v1278_v10 = vsel %vm1131_vm2, %v734_v1, %v1060_v3  ;;  %v923_v1 = vpack.c.bf16 %v892_v28, %v891_v43  ;;  %v819_v43 = vld [vmem:[#allocation3 + $0x150] sm:$0xff]  ;;  %v820_v28 = vld [vmem:[#allocation3 + $0x158] sm:$0xff] }
 0x10d   : > { %v1020_v14 = vpop.permute.xlu0 %1019 }
 0x10e   : > { %v972_v17 = vpop.permute.xlu1 %971  ;;  %v1230_v21 = vsel %vm1131_vm2, %v7676_v58, %v1020_v14  ;;  %v894_v14 = vld [vmem:[#allocation3 + $0x52] sm:$0xff] }
 0x10f   : > { %1827 = vmatprep.mubr.bf16.mxu0 %v1230_v21  ;;  %1957 = vmatmul.mubr.bf16.gmra.mrb[32].mxu1 %v1278_v10  ;;  %v1166_v60 = vsel %vm1131_vm2, %v7647_v13, %v972_v17  ;;  %v893_v10 = vld [vmem:[#allocation3 + $0x4a] sm:$0xff]  ;;  %v895_v17 = vld [vmem:[#allocation3 + $0x62] sm:$0xff] }
 0x110   : > { %1828 = vmatmul.mubr.bf16.gmra.mrb[32].mxu0 %v1166_v60  ;;  %v896_v21 = vld [vmem:[#allocation3 + $0x6a] sm:$0xff]  ;;  %v924_v60 = vpack.c.bf16 %v894_v14, %v893_v10  ;;  %v722_v10 = vld [vmem:[#allocation3 + $0x139] sm:$0xff]  ;;  %v723_v14 = vld [vmem:[#allocation3 + $0x141] sm:$0xff] }
 0x111   : > { %v1110_v24 = vpop.permute.xlu0 %1109 }
 0x112   : > { %v1062_v27 = vpop.permute.xlu1 %1061  ;;  %v1346_v4 = vsel %vm1131_vm2, %v832_v55, %v1110_v24  ;;  %v925_v24 = vpack.c.bf16 %v896_v21, %v895_v17  ;;  %v822_v17 = vld [vmem:[#allocation3 + $0x170] sm:$0xff]  ;;  %v742_v21 = vpack.c.bf16 %v723_v14, %v722_v10 }
 0x113   : > { %1964 = vmatprep.mubr.bf16.mxu1 %v1346_v4  ;;  %v1282_v58 = vsel %vm1131_vm2, %v735_v2, %v1062_v27  ;;  %v815_v4 = vld [vmem:[#allocation3 + $0x120] sm:$0xff] }
 0x115   : > { %v1022_v32 = vpop.permute.xlu0 %1021 }
 0x116   : > { %v974_v33 = vpop.permute.xlu1 %973  ;;  %v1234_v13 = vsel %vm1131_vm2, %v7683_v9, %v1022_v32  ;;  %v713_v9 = vld [vmem:[#allocation3 + $0xc9] sm:$0xff] }
 0x117   : > { %1835 = vmatprep.mubr.bf16.mxu0 %v1234_v13  ;;  %1965 = vmatmul.mubr.bf16.gmra.mrb[36].mxu1 %v1282_v58  ;;  %v1170_v36 = vsel %vm1131_vm2, %v546_v29, %v974_v33  ;;  %v737_v56 = vpack.c.bf16 %v713_v9, %v712_v25  ;;  %v897_v58 = vld [vmem:[#allocation3 + $0x7a] sm:$0xff]  ;;  %v898_v32 = vld [vmem:[#allocation3 + $0x82] sm:$0xff]  ;;  %v899_v33 = vld [vmem:[#allocation3 + $0x92] sm:$0xff] }
 0x118   : > { %1836 = vmatmul.mubr.bf16.gmra.mrb[36].mxu0 %v1170_v36  ;;  %v900_v13 = vld [vmem:[#allocation3 + $0x9a] sm:$0xff]  ;;  %v926_v36 = vpack.c.bf16 %v898_v32, %v897_v58  ;;  %v902_v25 = vld [vmem:[#allocation3 + $0xb2] sm:$0xff]  ;;  %v824_v58 = vld [vmem:[#allocation3 + $0x188] sm:$0xff] }
 0x119   : > { %v1112_v62 = vpop.permute.xlu0 %1111 }
 0x11a   : > { %v1064_v39 = vpop.permute.xlu1 %1063  ;;  %v1350_v40 = vsel %vm1131_vm2, %v833_v35, %v1112_v62  ;;  %v927_v62 = vpack.c.bf16 %v900_v13, %v899_v33 }
 0x11b   : > { %1972 = vmatprep.mubr.bf16.mxu1 %v1350_v40  ;;  %v1286_v22 = vsel %vm1131_vm2, %v736_v61, %v1064_v39  ;;  %v817_v39 = vld [vmem:[#allocation3 + $0x138] sm:$0xff]  ;;  %v818_v40 = vld [vmem:[#allocation3 + $0x140] sm:$0xff] }
 0x11c   : > { %v838_v9 = vpack.c.bf16 %v818_v40, %v817_v39 }
 0x11d   : > { %v1024_v45 = vpop.permute.xlu0 %1023 }
 0x11e   : > { %v976_v46 = vpop.permute.xlu1 %975  ;;  %v1238_v11 = vsel %vm1131_vm2, %v7688_v15, %v1024_v45  ;;  %v714_v15 = vld [vmem:[#allocation3 + $0xd9] sm:$0xff]  ;;  %v901_v45 = vld [vmem:[#allocation3 + $0xaa] sm:$0xff] }
 0x11f   : > { %1843 = vmatprep.mubr.bf16.mxu0 %v1238_v11  ;;  %1973 = vmatmul.mubr.bf16.gmra.mrb[40].mxu1 %v1286_v22  ;;  %v1174_v34 = vsel %vm1131_vm2, %v547_v19, %v976_v46  ;;  %v738_v8 = vpack.c.bf16 %v715_v41, %v714_v15  ;;  %v903_v11 = vld [vmem:[#allocation3 + $0xc2] sm:$0xff]  ;;  %v928_v48 = vpack.c.bf16 %v902_v25, %v901_v45 }
 0x120   : > { %1844 = vmatmul.mubr.bf16.gmra.mrb[40].mxu0 %v1174_v34  ;;  %v904_v34 = vld [vmem:[#allocation3 + $0xca] sm:$0xff]  ;;  %v906_v15 = vld [vmem:[#allocation3 + $0xe2] sm:$0xff]  ;;  %v839_v41 = vpack.c.bf16 %v820_v28, %v819_v43 }
 0x121   : > { %v1114_v52 = vpop.permute.xlu0 %1113  ;;  %v922_v25 = vld [vmem:[#allocation3 + $0x1a2] sm:$0xff] }
 0x122   : > { %v1066_v53 = vpop.permute.xlu1 %1065  ;;  %v1354_v57 = vsel %vm1131_vm2, %v546_v29, %v1114_v52  ;;  %v816_v29 = vld [vmem:[#allocation3 + $0x128] sm:$0xff] }
 0x123   : > { %1980 = vmatprep.mubr.bf16.mxu1 %v1354_v57  ;;  %v1290_v63 = vsel %vm1131_vm2, %v737_v56, %v1066_v53  ;;  %v837_v37 = vpack.c.bf16 %v816_v29, %v815_v4  ;;  %v720_v52 = vld [vmem:[#allocation3 + $0x121] sm:$0xff]  ;;  %v721_v53 = vld [vmem:[#allocation3 + $0x129] sm:$0xff]  ;;  %v929_v57 = vpack.c.bf16 %v904_v34, %v903_v11  ;;  %v724_v4 = vld [vmem:[#allocation3 + $0x151] sm:$0xff] }
 0x124   : > { %v725_v29 = vld [vmem:[#allocation3 + $0x159] sm:$0xff] }
 0x125   : > { %v1026_v0 = vpop.permute.xlu0 %1025  ;;  %v743_v32 = vpack.c.bf16 %v725_v29, %v724_v4 }
 0x126   : > { %v978_v38 = vpop.permute.xlu1 %977  ;;  %v1242_v3 = vsel %vm1131_vm2, %v7693_v18, %v1026_v0  ;;  %v905_v0 = vld [vmem:[#allocation3 + $0xda] sm:$0xff] }
 0x127   : > { %1851 = vmatprep.mubr.bf16.mxu0 %v1242_v3  ;;  %1981 = vmatmul.mubr.bf16.gmra.mrb[44].mxu1 %v1290_v63  ;;  %v1178_v7 = vsel %vm1131_vm2, %v548_v59, %v978_v38  ;;  %v907_v38 = vld [vmem:[#allocation3 + $0xf2] sm:$0xff]  ;;  %v908_v3 = vld [vmem:[#allocation3 + $0xfa] sm:$0xff] }
 0x128   : > { %1852 = vmatmul.mubr.bf16.gmra.mrb[44].mxu0 %v1178_v7 }
 0x129   : > { %v1116_v6 = vpop.permute.xlu0 %1115  ;;  %6930 = vmatprep.mubr.msk.bf16.mxu0 %vm1131_vm2, %v923_v1 }
 0x12a   : > { %v1068_v16 = vpop.permute.xlu1 %1067  ;;  %v1358_v42 = vsel %vm1131_vm2, %v547_v19, %v1116_v6  ;;  %v740_v19 = vpack.c.bf16 %v719_v44, %v718_v30  ;;  %v825_v30 = vld [vmem:[#allocation3 + $0x198] sm:$0xff]  ;;  %v826_v44 = vld [vmem:[#allocation3 + $0x1a0] sm:$0xff] }
 0x12b   : > { %1988 = vmatprep.mubr.bf16.mxu1 %v1358_v42  ;;  %v1294_v55 = vsel %vm1131_vm2, %v738_v8, %v1068_v16  ;;  %v930_v8 = vpack.c.bf16 %v906_v15, %v905_v0  ;;  %v931_v16 = vpack.c.bf16 %v908_v3, %v907_v38  ;;  %v821_v42 = vld [vmem:[#allocation3 + $0x168] sm:$0xff]  ;;  %v842_v39 = vpack.c.bf16 %v826_v44, %v825_v30 }
 0x12d   : > { %v1118_v2 = vpop.permute.xlu0 %1117 }
 0x12e   : > { %v1362_v27 = vsel %vm1131_vm2, %v548_v59, %v1118_v2  ;;  %v1070_v50 = vpop.permute.xlu1 %1069  ;;  %v741_v59 = vpack.c.bf16 %v721_v53, %v720_v52 }
 0x12f   : > { %1989 = vmatmul.mubr.bf16.gmra.mrb[48].mxu1 %v1294_v55  ;;  %v1298_v35 = vsel %vm1131_vm2, %v739_v49, %v1070_v50  ;;  %v933_v49 = vpack.c.bf16 %v912_v23, %v911_v54  ;;  %v823_v50 = vld [vmem:[#allocation3 + $0x180] sm:$0xff] }
 0x130   : > { %6931 = vmatmul.mubr.msk.bf16.vlgmr.msra.gmra.mrb[48].mxu0 %vm1131_vm2, %v924_v60  ;;  %1996 = vmatprep.mubr.bf16.mxu1 %v1362_v27  ;;  %v840_v60 = vpack.c.bf16 %v822_v17, %v821_v42 }
 0x131   : > { %6934 = vmatprep.mubr.msk.bf16.mxu0 %vm1131_vm2, %v925_v24  ;;  %v1120_v5 = vpop.permute.xlu0 %1119 }
 0x132   : > { %v1366_v61 = vsel %vm1131_vm2, %v837_v37, %v1120_v5  ;;  %v1072_v22 = vpop.permute.xlu1 %1071  ;;  %v841_v5 = vpack.c.bf16 %v824_v58, %v823_v50 }
 0x133   : > { %v1302_v56 = vsel %vm1131_vm2, %v740_v19, %v1072_v22 }
 0x135   : > { %v1122_v46 = vpop.permute.xlu0 %1121 }
 0x136   : > { %v1370_v12 = vsel %vm1131_vm2, %v838_v9, %v1122_v46  ;;  %v1074_v63 = vpop.permute.xlu1 %1073 }
 0x137   : > { %1997 = vmatmul.mubr.bf16.gmra.mrb[52].mxu1 %v1298_v35  ;;  %v1306_v7 = vsel %vm1131_vm2, %v741_v59, %v1074_v63 }
 0x138   : > { %6935 = vmatmul.mubr.msk.bf16.gmra.mrb[52].mxu0 %vm1131_vm2, %v926_v36  ;;  %2004 = vmatprep.mubr.bf16.mxu1 %v1366_v61  ;;  %v726_v36 = vld [vmem:[#allocation3 + $0x169] sm:$0xff]  ;;  %v727_v61 = vld [vmem:[#allocation3 + $0x171] sm:$0xff] }
 0x139   : > { %6938 = vmatprep.mubr.msk.bf16.mxu0 %vm1131_vm2, %v927_v62  ;;  %v1124_v1 = vpop.permute.xlu0 %1123 }
 0x13a   : > { %v1374_v6 = vsel %vm1131_vm2, %v839_v41, %v1124_v1  ;;  %v1076_v55 = vpop.permute.xlu1 %1075 }
 0x13b   : > { %v1310_v24 = vsel %vm1131_vm2, %v742_v21, %v1076_v55 }
 0x13d   : > { %v1126_v2 = vpop.permute.xlu0 %1125 }
 0x13e   : > { %v1378_v27 = vsel %vm1131_vm2, %v840_v60, %v1126_v2  ;;  %v1078_v37 = vpop.permute.xlu1 %1077 }
 0x13f   : > { %2005 = vmatmul.mubr.bf16.gmra.mrb[56].mxu1 %v1302_v56  ;;  %v1314_v13 = vsel %vm1131_vm2, %v743_v32, %v1078_v37 }
 0x140   : > { %6939 = vmatmul.mubr.msk.bf16.gmra.mrb[56].mxu0 %vm1131_vm2, %v928_v48  ;;  %2012 = vmatprep.mubr.bf16.mxu1 %v1370_v12 }
 0x141   : > { %6942 = vmatprep.mubr.msk.bf16.mxu0 %vm1131_vm2, %v929_v57  ;;  %v1128_v33 = vpop.permute.xlu0 %1127 }
 0x142   : > { %v1382_v35 = vsel %vm1131_vm2, %v841_v5, %v1128_v33 }
 0x144   : > { %v1080_v62 = vpop.permute.xlu1 %1079 }
 0x145   : > { %v1130_v40 = vpop.permute.xlu0 %1129 }
 0x146   : > { %v1386_v22 = vsel %vm1131_vm2, %v842_v39, %v1130_v40 }
 0x147   : > { %2013 = vmatmul.mubr.bf16.gmra.mrb[60].mxu1 %v1306_v7 }
 0x148   : > { %6943 = vmatmul.mubr.msk.bf16.gmra.mrb[60].mxu0 %vm1131_vm2, %v930_v8  ;;  %2020 = vmatprep.mubr.bf16.mxu1 %v1374_v6  ;;  %v1082_v45 = vpop.permute.xlu1 %1081 }
 0x149   : > { %6946 = vmatprep.mubr.msk.bf16.mxu0 %vm1131_vm2, %v931_v16 }
 0x14f   : > { %2021 = vmatmul.mubr.bf16.gmra.mrb[64].mxu1 %v1310_v24 }
 0x150   : > { %6947 = vmatmul.mubr.msk.bf16.gmra.mrb[64].mxu0 %vm1131_vm2, %v7693_v18  ;;  %2028 = vmatprep.mubr.bf16.mxu1 %v1378_v27  ;;  %v744_v18 = vpack.c.bf16 %v727_v61, %v726_v36  ;;  %v7880_v36 = vld [vmem:[%s7362_s8] ss:$0 sm:$0xff] }
 0x151   : > { %6950 = vmatprep.mubr.msk.bf16.mxu0 %vm1131_vm2, %v933_v49 }
 0x152   : > { %v1318_v19 = vsel %vm1131_vm2, %v744_v18, %v1080_v62 }
 0x157   : > { %2029 = vmatmul.mubr.bf16.gmra.mrb[68].mxu1 %v1314_v13 }
 0x158   : > { %6951 = vmatmul.mubr.msk.bf16.gmra.mrb[68].mxu0 %vm1131_vm2, %v7702_v31  ;;  %2036 = vmatprep.mubr.bf16.mxu1 %v1382_v35  ;;  %v921_v31 = vld [vmem:[#allocation3 + $0x19a] sm:$0xff] }
 0x159   : > { %6954 = vmatprep.mubr.msk.bf16.mxu0 %vm1131_vm2, %v7709_v47  ;;  %v1322_v47 = vsel %vm1131_vm2, %v7714_v51, %v1082_v45  ;;  %v938_v9 = vpack.c.bf16 %v922_v25, %v921_v31 }
 0x15f   : > { %2037 = vmatmul.mubr.bf16.gmra.mrb[72].mxu1 %v1318_v19 }
 0x160   : > { %6955 = vmatmul.mubr.msk.bf16.gmra.mrb[72].mxu0 %vm1131_vm2, %v7726_v20  ;;  %2044 = vmatprep.mubr.bf16.mxu1 %v1386_v22 }
 0x161   : > { %6958 = vmatprep.mubr.msk.bf16.mxu0 %vm1131_vm2, %v7734_v26 }
 0x167   : > { %2045 = vmatmul.mubr.bf16.gmra.mrb[76].mxu1 %v1322_v47 }
 0x168   : > { %6959 = vmatmul.mubr.msk.bf16.gmra.mrb[76].mxu0 %vm1131_vm2, %v938_v9 }
 0x1a2   : > { %v6278_v46 = vpop.f32.mrb[0].mxu1 }
 0x1a3   : > { %v6206_v11 = vpop.f32.mrb[0].mxu0  ;;  %v6279_v34 = vpop.f32.mrb[1].mxu1 }
 0x1a4   : > { %v7863_v56 = vadd.f32 %v6279_v34, %v6278_v46  ;;  %v6207_v20 = vpop.f32.mrb[1].mxu0  ;;  %v6281_v48 = vpop.f32.mrb[2].mxu1 }
 0x1a5   : > { %v6208_v12 = vadd.f32 %v6207_v20, %v6206_v11  ;;  %v6209_v52 = vpop.f32.mrb[2].mxu0  ;;  %v6282_v53 = vpop.f32.mrb[3].mxu1 }
 0x1a6   : > { %v7865_v26 = vadd.f32 %v6282_v53, %v6281_v48  ;;  %v6210_v57 = vpop.f32.mrb[3].mxu0 }
 0x1a7   : > { %v6211_v43 = vadd.f32 %v6210_v57, %v6209_v52  ;;  %v1766_v44 = vadd.f32 %v6208_v12, %v7880_v36 }
 0x1a9   : > { %v1769_v45 = vadd.f32 %v6211_v43, %v7880_v36 }
 0x1aa   : > { %v6284_v28 = vpop.f32.mrb[4].mxu1 }
 0x1ab   : > { %v6212_v51 = vpop.f32.mrb[4].mxu0  ;;  %v6285_v59 = vpop.f32.mrb[5].mxu1 }
 0x1ac   : > { %v7867_v63 = vadd.f32 %v6285_v59, %v6284_v28  ;;  %v6213_v0 = vpop.f32.mrb[5].mxu0  ;;  %v6287_v15 = vpop.f32.mrb[6].mxu1 }
 0x1ad   : > { %v6214_v41 = vadd.f32 %v6213_v0, %v6212_v51  ;;  %v6215_v1 = vpop.f32.mrb[6].mxu0  ;;  %v6288_v38 = vpop.f32.mrb[7].mxu1 }
 0x1ae   : > { %v7869_v3 = vadd.f32 %v6288_v38, %v6287_v15  ;;  %v6216_v7 = vpop.f32.mrb[7].mxu0 }
 0x1af   : > { %v6217_v8 = vadd.f32 %v6216_v7, %v6215_v1  ;;  %v1774_v48 = vadd.f32 %v6214_v41, %v7880_v36 }
 0x1b1   : > { %v1777_v43 = vadd.f32 %v6217_v8, %v7880_v36 }
 0x1b2   : > { %v6290_v6 = vpop.f32.mrb[8].mxu1 }
 0x1b3   : > { %v6218_v10 = vpop.f32.mrb[8].mxu0  ;;  %v6291_v14 = vpop.f32.mrb[9].mxu1 }
 0x1b4   : > { %v7871_v16 = vadd.f32 %v6291_v14, %v6290_v6  ;;  %v6219_v42 = vpop.f32.mrb[9].mxu0  ;;  %v6293_v17 = vpop.f32.mrb[10].mxu1 }
 0x1b5   : > { %v6220_v21 = vadd.f32 %v6219_v42, %v6218_v10  ;;  %v6221_v55 = vpop.f32.mrb[10].mxu0  ;;  %v6294_v60 = vpop.f32.mrb[11].mxu1 }
 0x1b6   : > { %v7873_v2 = vadd.f32 %v6294_v60, %v6293_v17  ;;  %v6222_v54 = vpop.f32.mrb[11].mxu0 }
 0x1b7   : > { %v6223_v23 = vadd.f32 %v6222_v54, %v6221_v55  ;;  %v1782_v41 = vadd.f32 %v6220_v21, %v7880_v36 }
 0x1b9   : > { %v1785_v8 = vadd.f32 %v6223_v23, %v7880_v36 }
 0x1ba   : > { %v6296_v24 = vpop.f32.mrb[12].mxu1 }
 0x1bb   : > { %v6224_v27 = vpop.f32.mrb[12].mxu0  ;;  %v6297_v4 = vpop.f32.mrb[13].mxu1 }
 0x1bc   : > { %v7875_v29 = vadd.f32 %v6297_v4, %v6296_v24  ;;  %v6225_v49 = vpop.f32.mrb[13].mxu0  ;;  %v6299_v50 = vpop.f32.mrb[14].mxu1 }
 0x1bd   : > { %v6226_v58 = vadd.f32 %v6225_v49, %v6224_v27  ;;  %v6227_v32 = vpop.f32.mrb[14].mxu0  ;;  %v6300_v37 = vpop.f32.mrb[15].mxu1 }
 0x1be   : > { %v7877_v5 = vadd.f32 %v6300_v37, %v6299_v50  ;;  %v6228_v33 = vpop.f32.mrb[15].mxu0 }
 0x1bf   : > { %v6229_v13 = vadd.f32 %v6228_v33, %v6227_v32  ;;  %v1790_v21 = vadd.f32 %v6226_v58, %v7880_v36 }
 0x1c1   : > { %v1793_v23 = vadd.f32 %v6229_v13, %v7880_v36 }
 0x1c2   : > { %v6318_v35 = vpop.f32.mrb[16].mxu1 }
 0x1c3   : > { %v6230_v61 = vpop.f32.mrb[16].mxu0  ;;  %v6319_v30 = vpop.f32.mrb[17].mxu1 }
 0x1c4   : > { %v6320_v18 = vadd.f32 %v6319_v30, %v6318_v35  ;;  %v6231_v62 = vpop.f32.mrb[17].mxu0  ;;  %v6321_v39 = vpop.f32.mrb[18].mxu1 }
 0x1c5   : > { %v6232_v40 = vadd.f32 %v6231_v62, %v6230_v61  ;;  %v6233_v19 = vpop.f32.mrb[18].mxu0  ;;  %v6322_v22 = vpop.f32.mrb[19].mxu1 }
 0x1c6   : > { %v6323_v31 = vadd.f32 %v6322_v22, %v6321_v39  ;;  %v6234_v25 = vpop.f32.mrb[19].mxu0  ;;  %v7884_v47 = vadd.f32 %v6320_v18, %v1766_v44 }
 0x1c7   : > { %v6235_v9 = vadd.f32 %v6234_v25, %v6233_v19  ;;  %v1798_v58 = vadd.f32 %v6232_v40, %v7880_v36 }
 0x1c8   : > { %v7886_v46 = vadd.f32 %v6323_v31, %v1769_v45 }
 0x1c9   : > { %v1801_v13 = vadd.f32 %v6235_v9, %v7880_v36 }
 0x1ca   : > { %v6324_v11 = vpop.f32.mrb[20].mxu1 }
 0x1cb   : > { %v6236_v34 = vpop.f32.mrb[20].mxu0  ;;  %v6325_v20 = vpop.f32.mrb[21].mxu1 }
 0x1cc   : > { %v6326_v12 = vadd.f32 %v6325_v20, %v6324_v11  ;;  %v6237_v52 = vpop.f32.mrb[21].mxu0  ;;  %v6327_v53 = vpop.f32.mrb[22].mxu1 }
 0x1cd   : > { %v6238_v57 = vadd.f32 %v6237_v52, %v6236_v34  ;;  %v6239_v28 = vpop.f32.mrb[22].mxu0  ;;  %v6328_v51 = vpop.f32.mrb[23].mxu1 }
 0x1ce   : > { %v6329_v59 = vadd.f32 %v6328_v51, %v6327_v53  ;;  %v6240_v0 = vpop.f32.mrb[23].mxu0  ;;  %v7890_v15 = vadd.f32 %v6326_v12, %v1774_v48 }
 0x1cf   : > { %v6241_v1 = vadd.f32 %v6240_v0, %v6239_v28  ;;  %v1806_v40 = vadd.f32 %v6238_v57, %v7880_v36 }
 0x1d0   : > { %v7892_v38 = vadd.f32 %v6329_v59, %v1777_v43 }
 0x1d1   : > { %v1809_v9 = vadd.f32 %v6241_v1, %v7880_v36 }
 0x1d2   : > { %v6330_v7 = vpop.f32.mrb[24].mxu1 }
 0x1d3   : > { %v6242_v6 = vpop.f32.mrb[24].mxu0  ;;  %v6331_v10 = vpop.f32.mrb[25].mxu1 }
 0x1d4   : > { %v6332_v14 = vadd.f32 %v6331_v10, %v6330_v7  ;;  %v6243_v42 = vpop.f32.mrb[25].mxu0  ;;  %v6333_v17 = vpop.f32.mrb[26].mxu1 }
 0x1d5   : > { %v6244_v55 = vadd.f32 %v6243_v42, %v6242_v6  ;;  %v6245_v60 = vpop.f32.mrb[26].mxu0  ;;  %v6334_v54 = vpop.f32.mrb[27].mxu1 }
 0x1d6   : > { %v6335_v24 = vadd.f32 %v6334_v54, %v6333_v17  ;;  %v6246_v27 = vpop.f32.mrb[27].mxu0  ;;  %v7896_v4 = vadd.f32 %v6332_v14, %v1782_v41 }
 0x1d7   : > { %v6247_v49 = vadd.f32 %v6246_v27, %v6245_v60 }
 0x1d8   : > { %v7898_v50 = vadd.f32 %v6335_v24, %v1785_v8 }
 0x1da   : > { %v6336_v32 = vpop.f32.mrb[28].mxu1 }
 0x1db   : > { %v6248_v37 = vpop.f32.mrb[28].mxu0  ;;  %v6337_v33 = vpop.f32.mrb[29].mxu1 }
 0x1dc   : > { %v6338_v35 = vadd.f32 %v6337_v33, %v6336_v32  ;;  %v6249_v61 = vpop.f32.mrb[29].mxu0  ;;  %v6339_v30 = vpop.f32.mrb[30].mxu1 }
 0x1dd   : > { %v6250_v44 = vadd.f32 %v6249_v61, %v6248_v37  ;;  %v6251_v18 = vpop.f32.mrb[30].mxu0  ;;  %v6340_v62 = vpop.f32.mrb[31].mxu1  ;;  %v1814_v61 = vadd.f32 %v6244_v55, %v7880_v36 }
 0x1de   : > { %v6341_v39 = vadd.f32 %v6340_v62, %v6339_v30  ;;  %v6252_v19 = vpop.f32.mrb[31].mxu0  ;;  %v7902_v22 = vadd.f32 %v6338_v35, %v1790_v21 }
 0x1df   : > { %v6253_v45 = vadd.f32 %v6252_v19, %v6251_v18  ;;  %v1817_v19 = vadd.f32 %v6247_v49, %v7880_v36 }
 0x1e0   : > { %v7904_v31 = vadd.f32 %v6341_v39, %v1793_v23 }
 0x1e2   : > { %v6342_v25 = vpop.f32.mrb[32].mxu1 }
 0x1e3   : > { %v6254_v11 = vpop.f32.mrb[32].mxu0  ;;  %v6343_v34 = vpop.f32.mrb[33].mxu1 }
 0x1e4   : > { %v6344_v20 = vadd.f32 %v6343_v34, %v6342_v25  ;;  %v6255_v48 = vpop.f32.mrb[33].mxu0  ;;  %v6345_v12 = vpop.f32.mrb[34].mxu1 }
 0x1e5   : > { %v6256_v52 = vadd.f32 %v6255_v48, %v6254_v11  ;;  %v6257_v53 = vpop.f32.mrb[34].mxu0  ;;  %v6346_v28 = vpop.f32.mrb[35].mxu1 }
 0x1e6   : > { %v6347_v51 = vadd.f32 %v6346_v28, %v6345_v12  ;;  %v6258_v43 = vpop.f32.mrb[35].mxu0  ;;  %v7908_v59 = vadd.f32 %v6344_v20, %v1798_v58 }
 0x1e7   : > { %v6259_v0 = vadd.f32 %v6258_v43, %v6257_v53  ;;  %v1822_v53 = vadd.f32 %v6250_v44, %v7880_v36 }
 0x1e8   : > { %v7910_v7 = vadd.f32 %v6347_v51, %v1801_v13 }
 0x1ea   : > { %v6348_v6 = vpop.f32.mrb[36].mxu1 }
 0x1eb   : > { %v6260_v10 = vpop.f32.mrb[36].mxu0  ;;  %v6349_v41 = vpop.f32.mrb[37].mxu1 }
 0x1ec   : > { %v6350_v14 = vadd.f32 %v6349_v41, %v6348_v6  ;;  %v6261_v42 = vpop.f32.mrb[37].mxu0  ;;  %v6351_v17 = vpop.f32.mrb[38].mxu1 }
 0x1ed   : > { %v7913_v60 = vadd.f32 %v6261_v42, %v6260_v10  ;;  %v6263_v54 = vpop.f32.mrb[38].mxu0  ;;  %v6352_v8 = vpop.f32.mrb[39].mxu1  ;;  %v1825_v10 = vadd.f32 %v6253_v45, %v7880_v36  ;;  %v1833_v45 = vadd.f32 %v6259_v0, %v7880_v36 }
 0x1ee   : > { %v6353_v24 = vadd.f32 %v6352_v8, %v6351_v17  ;;  %v6264_v27 = vpop.f32.mrb[39].mxu0  ;;  %v7916_v32 = vadd.f32 %v6350_v14, %v1806_v40 }
 0x1ef   : > { %v7918_v37 = vadd.f32 %v6264_v27, %v6263_v54 }
 0x1f0   : > { %v7920_v33 = vadd.f32 %v6353_v24, %v1809_v9  ;;  %v1830_v9 = vadd.f32 %v6256_v52, %v7880_v36 }
 0x1f2   : > { %v6354_v21 = vpop.f32.mrb[40].mxu1 }
 0x1f3   : > { %v6266_v35 = vpop.f32.mrb[40].mxu0  ;;  %v6355_v57 = vpop.f32.mrb[41].mxu1 }
 0x1f4   : > { %v6356_v30 = vadd.f32 %v6355_v57, %v6354_v21  ;;  %v6267_v18 = vpop.f32.mrb[41].mxu0  ;;  %v6357_v62 = vpop.f32.mrb[42].mxu1 }
 0x1f5   : > { %v7923_v23 = vadd.f32 %v6267_v18, %v6266_v35  ;;  %v6269_v39 = vpop.f32.mrb[42].mxu0  ;;  %v6358_v1 = vpop.f32.mrb[43].mxu1 }
 0x1f6   : > { %v6359_v25 = vadd.f32 %v6358_v1, %v6357_v62  ;;  %v6270_v11 = vpop.f32.mrb[43].mxu0  ;;  %v7926_v34 = vadd.f32 %v6356_v30, %v1814_v61 }
 0x1f7   : > { %v7928_v58 = vadd.f32 %v6270_v11, %v6269_v39 }
 0x1f8   : > { %v7930_v20 = vadd.f32 %v6359_v25, %v1817_v19 }
 0x1fa   : > { %v6360_v48 = vpop.f32.mrb[44].mxu1 }
 0x1fb   : > { %v6272_v12 = vpop.f32.mrb[44].mxu0  ;;  %v6361_v55 = vpop.f32.mrb[45].mxu1 }
 0x1fc   : > { %v6362_v28 = vadd.f32 %v6361_v55, %v6360_v48  ;;  %v6273_v13 = vpop.f32.mrb[45].mxu0  ;;  %v6363_v51 = vpop.f32.mrb[46].mxu1 }
 0x1fd   : > { %v7933_v43 = vadd.f32 %v6273_v13, %v6272_v12  ;;  %v6275_v6 = vpop.f32.mrb[46].mxu0  ;;  %v6364_v49 = vpop.f32.mrb[47].mxu1  ;;  %v1838_v12 = vadd.f32 %v7913_v60, %v7880_v36  ;;  %v1841_v13 = vadd.f32 %v7918_v37, %v7880_v36 }
 0x1fe   : > { %v6365_v41 = vadd.f32 %v6364_v49, %v6363_v51  ;;  %v6276_v40 = vpop.f32.mrb[47].mxu0  ;;  %v7936_v14 = vadd.f32 %v6362_v28, %v1822_v53 }
 0x1ff   : > { %v7938_v42 = vadd.f32 %v6276_v40, %v6275_v6 }
 0x200   : > { %v7940_v17 = vadd.f32 %v6365_v41, %v1825_v10 }
 0x202   : > { %v6366_v54 = vpop.f32.mrb[48].mxu1 }
 0x203   : > { %v6367_v8 = vpop.f32.mrb[49].mxu1  ;;  %v6932_v44 = vpop.f32.mrb[48].mxu0 }
 0x204   : > { %v6368_v24 = vadd.f32 %v6367_v8, %v6366_v54  ;;  %v2096_v27 = vadd.f32 %v6932_v44, %v7890_v15  ;;  %v6369_v21 = vpop.f32.mrb[50].mxu1  ;;  %v2087_v35 = vpop.f32.mrb[49].mxu0 }
 0x205   : > { %v2088_v57 = vadd.f32 %v2087_v35, %v7884_v47  ;;  %v6370_v61 = vpop.f32.mrb[51].mxu1  ;;  %v6933_v30 = vpop.f32.mrb[50].mxu0 }
 0x206   : > { %v2216_v18 = vmax.f32 %v2096_v27, 0.0  ;;  %v6371_v62 = vadd.f32 %v6370_v61, %v6369_v21  ;;  %v2099_v39 = vadd.f32 %v6933_v30, %v7892_v38  ;;  %v2090_v1 = vpop.f32.mrb[51].mxu0  ;;  %v7947_v19 = vadd.f32 %v6368_v24, %v1830_v9 }
 0x207   : > { %v2214_v25 = vmax.f32 %v2088_v57, 0.0  ;;  %v2091_v52 = vadd.f32 %v2090_v1, %v7886_v46  ;;  %v1846_v27 = vadd.f32 %v7923_v23, %v7880_v36  ;;  %v1849_v57 = vadd.f32 %v7928_v58, %v7880_v36 }
 0x208   : > { %2249 = vst.msk [vmem:[#allocation2 + $0x31] sm:$0xff] %vm1131_vm2, %v2216_v18  ;;  %v2217_v15 = vmax.f32 %v2099_v39, 0.0  ;;  %v7951_v11 = vadd.f32 %v6371_v62, %v1833_v45 }
 0x209   : > { %2247 = vst.msk [vmem:[#allocation2 + $0x19] sm:$0xff] %vm1131_vm2, %v2214_v25  ;;  %v2215_v47 = vmax.f32 %v2091_v52, 0.0 }
 0x20a   : > { %2250 = vst.msk [vmem:[#allocation2 + $0x39] sm:$0xff] %vm1131_vm2, %v2217_v15  ;;  %v6372_v0 = vpop.f32.mrb[52].mxu1 }
 0x20b   : > { %2248 = vst.msk [vmem:[#allocation2 + $0x21] sm:$0xff] %vm1131_vm2, %v2215_v47  ;;  %v6373_v38 = vpop.f32.mrb[53].mxu1  ;;  %v6936_v48 = vpop.f32.mrb[52].mxu0 }
 0x20c   : > { %v6374_v55 = vadd.f32 %v6373_v38, %v6372_v0  ;;  %v2112_v46 = vadd.f32 %v6936_v48, %v7902_v22  ;;  %v6375_v53 = vpop.f32.mrb[54].mxu1  ;;  %v2103_v28 = vpop.f32.mrb[53].mxu0  ;;  %v1854_v38 = vadd.f32 %v7933_v43, %v7880_v36 }
 0x20d   : > { %v2104_v51 = vadd.f32 %v2103_v28, %v7896_v4  ;;  %v6376_v6 = vpop.f32.mrb[55].mxu1  ;;  %v6937_v49 = vpop.f32.mrb[54].mxu0 }
 0x20e   : > { %v2220_v10 = vmax.f32 %v2112_v46, 0.0  ;;  %v6377_v41 = vadd.f32 %v6376_v6, %v6375_v53  ;;  %v2115_v40 = vadd.f32 %v6937_v49, %v7904_v31  ;;  %v2106_v54 = vpop.f32.mrb[55].mxu0  ;;  %v7963_v8 = vadd.f32 %v6374_v55, %v1838_v12 }
 0x20f   : > { %v2218_v60 = vmax.f32 %v2104_v51, 0.0  ;;  %v2107_v44 = vadd.f32 %v2106_v54, %v7898_v50  ;;  %v1857_v46 = vadd.f32 %v7938_v42, %v7880_v36 }
 0x210   : > { %2253 = vst.msk [vmem:[#allocation2 + $0x61] sm:$0xff] %vm1131_vm2, %v2220_v10  ;;  %v2221_v22 = vmax.f32 %v2115_v40, 0.0  ;;  %v7967_v9 = vadd.f32 %v6377_v41, %v1841_v13 }
 0x211   : > { %2251 = vst.msk [vmem:[#allocation2 + $0x49] sm:$0xff] %vm1131_vm2, %v2218_v60  ;;  %v2219_v4 = vmax.f32 %v2107_v44, 0.0 }
 0x212   : > { %2254 = vst.msk [vmem:[#allocation2 + $0x69] sm:$0xff] %vm1131_vm2, %v2221_v22  ;;  %v6378_v37 = vpop.f32.mrb[56].mxu1 }
 0x213   : > { %2252 = vst.msk [vmem:[#allocation2 + $0x51] sm:$0xff] %vm1131_vm2, %v2219_v4  ;;  %v6379_v31 = vpop.f32.mrb[57].mxu1  ;;  %v6940_v24 = vpop.f32.mrb[56].mxu0 }
 0x214   : > { %v6380_v21 = vadd.f32 %v6379_v31, %v6378_v37  ;;  %v2128_v50 = vadd.f32 %v6940_v24, %v7916_v32  ;;  %v6381_v35 = vpop.f32.mrb[58].mxu1  ;;  %v2119_v45 = vpop.f32.mrb[57].mxu0  ;;  %v1865_v31 = vadd.f32 %v7865_v26, %v7880_v36 }
 0x215   : > { %v2120_v61 = vadd.f32 %v2119_v45, %v7908_v59  ;;  %v6382_v30 = vpop.f32.mrb[59].mxu1  ;;  %v6941_v18 = vpop.f32.mrb[58].mxu0 }
 0x216   : > { %v2224_v62 = vmax.f32 %v2128_v50, 0.0  ;;  %v6383_v39 = vadd.f32 %v6382_v30, %v6381_v35  ;;  %v2131_v1 = vadd.f32 %v6941_v18, %v7920_v33  ;;  %v2122_v25 = vpop.f32.mrb[59].mxu0  ;;  %v7979_v52 = vadd.f32 %v6380_v21, %v1846_v27 }
 0x217   : > { %v2222_v23 = vmax.f32 %v2120_v61, 0.0  ;;  %v2123_v15 = vadd.f32 %v2122_v25, %v7910_v7 }
 0x218   : > { %2257 = vst.msk [vmem:[#allocation2 + $0x91] sm:$0xff] %vm1131_vm2, %v2224_v62  ;;  %v2225_v32 = vmax.f32 %v2131_v1, 0.0  ;;  %v7983_v47 = vadd.f32 %v6383_v39, %v1849_v57 }
 0x219   : > { %2255 = vst.msk [vmem:[#allocation2 + $0x79] sm:$0xff] %vm1131_vm2, %v2222_v23  ;;  %v2223_v59 = vmax.f32 %v2123_v15, 0.0  ;;  %v1873_v15 = vadd.f32 %v7869_v3, %v7880_v36 }
 0x21a   : > { %2258 = vst.msk [vmem:[#allocation2 + $0x99] sm:$0xff] %vm1131_vm2, %v2225_v32  ;;  %v6384_v58 = vpop.f32.mrb[60].mxu1 }
 0x21b   : > { %2256 = vst.msk [vmem:[#allocation2 + $0x81] sm:$0xff] %vm1131_vm2, %v2223_v59  ;;  %v6385_v33 = vpop.f32.mrb[61].mxu1  ;;  %v6944_v0 = vpop.f32.mrb[60].mxu0 }
 0x21c   : > { %v6386_v48 = vadd.f32 %v6385_v33, %v6384_v58  ;;  %v2144_v7 = vadd.f32 %v6944_v0, %v7936_v14  ;;  %v6387_v12 = vpop.f32.mrb[62].mxu1  ;;  %v2135_v55 = vpop.f32.mrb[61].mxu0 }
 0x21d   : > { %v2136_v53 = vadd.f32 %v2135_v55, %v7926_v34  ;;  %v6388_v28 = vpop.f32.mrb[63].mxu1  ;;  %v6945_v13 = vpop.f32.mrb[62].mxu0 }
 0x21e   : > { %v2228_v51 = vmax.f32 %v2144_v7, 0.0  ;;  %v6389_v6 = vadd.f32 %v6388_v28, %v6387_v12  ;;  %v2147_v49 = vadd.f32 %v6945_v13, %v7940_v17  ;;  %v2138_v10 = vpop.f32.mrb[63].mxu0  ;;  %v2015_v41 = vadd.f32 %v6386_v48, %v1854_v38 }
 0x21f   : > { %v2226_v40 = vmax.f32 %v2136_v53, 0.0  ;;  %v2139_v43 = vadd.f32 %v2138_v10, %v7930_v20  ;;  %v1862_v17 = vadd.f32 %v7863_v56, %v7880_v36  ;;  %v1878_v13 = vadd.f32 %v7871_v16, %v7880_v36 }
 0x220   : > { %2261 = vst.msk [vmem:[#allocation2 + $0xc1] sm:$0xff] %vm1131_vm2, %v2228_v51  ;;  %v2229_v14 = vmax.f32 %v2147_v49, 0.0  ;;  %v2018_v54 = vadd.f32 %v6389_v6, %v1857_v46  ;;  %v1881_v10 = vadd.f32 %v7873_v2, %v7880_v36 }
 0x221   : > { %2259 = vst.msk [vmem:[#allocation2 + $0xa9] sm:$0xff] %vm1131_vm2, %v2226_v40  ;;  %v2227_v42 = vmax.f32 %v2139_v43, 0.0 }
 0x222   : > { %2262 = vst.msk [vmem:[#allocation2 + $0xc9] sm:$0xff] %vm1131_vm2, %v2229_v14  ;;  %v6390_v34 = vpop.f32.mrb[64].mxu1 }
 0x223   : > { %2260 = vst.msk [vmem:[#allocation2 + $0xb1] sm:$0xff] %vm1131_vm2, %v2227_v42  ;;  %v6391_v60 = vpop.f32.mrb[65].mxu1  ;;  %v6948_v44 = vpop.f32.mrb[64].mxu0 }
 0x224   : > { %v6392_v22 = vadd.f32 %v6391_v60, %v6390_v34  ;;  %v2160_v20 = vadd.f32 %v6948_v44, %v7963_v8  ;;  %v6393_v4 = vpop.f32.mrb[66].mxu1  ;;  %v2151_v37 = vpop.f32.mrb[65].mxu0 }
 0x225   : > { %v2152_v24 = vadd.f32 %v2151_v37, %v7947_v19  ;;  %v6394_v27 = vpop.f32.mrb[67].mxu1  ;;  %v6949_v21 = vpop.f32.mrb[66].mxu0 }
 0x226   : > { %v2232_v50 = vmax.f32 %v2160_v20, 0.0  ;;  %v6395_v35 = vadd.f32 %v6394_v27, %v6393_v4  ;;  %v2163_v45 = vadd.f32 %v6949_v21, %v7967_v9  ;;  %v2154_v57 = vpop.f32.mrb[67].mxu0  ;;  %v2023_v61 = vadd.f32 %v6392_v22, %v1862_v17 }
 0x227   : > { %v2230_v30 = vmax.f32 %v2152_v24, 0.0  ;;  %v2155_v56 = vadd.f32 %v2154_v57, %v7951_v11  ;;  %v1870_v9 = vadd.f32 %v7867_v63, %v7880_v36  ;;  %v1889_v57 = vadd.f32 %v7877_v5, %v7880_v36 }
 0x228   : > { %2265 = vst.msk [vmem:[#allocation2 + $0xf1] sm:$0xff] %vm1131_vm2, %v2232_v50  ;;  %v2233_v8 = vmax.f32 %v2163_v45, 0.0  ;;  %v2026_v18 = vadd.f32 %v6395_v35, %v1865_v31  ;;  %v1886_v31 = vadd.f32 %v7875_v29, %v7880_v36 }
 0x229   : > { %2263 = vst.msk [vmem:[#allocation2 + $0xd9] sm:$0xff] %vm1131_vm2, %v2230_v30  ;;  %v2231_v26 = vmax.f32 %v2155_v56, 0.0 }
 0x22a   : > { %2266 = vst.msk [vmem:[#allocation2 + $0xf9] sm:$0xff] %vm1131_vm2, %v2233_v8  ;;  %v6396_v19 = vpop.f32.mrb[68].mxu1 }
 0x22b   : > { %2264 = vst.msk [vmem:[#allocation2 + $0xe1] sm:$0xff] %vm1131_vm2, %v2231_v26  ;;  %v6397_v62 = vpop.f32.mrb[69].mxu1  ;;  %v6952_v39 = vpop.f32.mrb[68].mxu0 }
 0x22c   : > { %v6398_v1 = vadd.f32 %v6397_v62, %v6396_v19  ;;  %v2176_v25 = vadd.f32 %v6952_v39, %v2015_v41  ;;  %v6399_v11 = vpop.f32.mrb[70].mxu1  ;;  %v2167_v23 = vpop.f32.mrb[69].mxu0 }
 0x22d   : > { %v2168_v32 = vadd.f32 %v2167_v23, %v7979_v52  ;;  %v6400_v59 = vpop.f32.mrb[71].mxu1  ;;  %v6953_v58 = vpop.f32.mrb[70].mxu0 }
 0x22e   : > { %v2236_v33 = vmax.f32 %v2176_v25, 0.0  ;;  %v6401_v0 = vadd.f32 %v6400_v59, %v6399_v11  ;;  %v2179_v38 = vadd.f32 %v6953_v58, %v2018_v54  ;;  %v2170_v48 = vpop.f32.mrb[71].mxu0  ;;  %v2031_v7 = vadd.f32 %v6398_v1, %v1870_v9 }
 0x22f   : > { %v2234_v12 = vmax.f32 %v2168_v32, 0.0  ;;  %v2171_v55 = vadd.f32 %v2170_v48, %v7983_v47 }
 0x230   : > { %2269 = vst.msk [vmem:[#allocation2 + $0x121] sm:$0xff] %vm1131_vm2, %v2236_v33  ;;  %v2237_v63 = vmax.f32 %v2179_v38, 0.0  ;;  %v2034_v46 = vadd.f32 %v6401_v0, %v1873_v15 }
 0x231   : > { %2267 = vst.msk [vmem:[#allocation2 + $0x109] sm:$0xff] %vm1131_vm2, %v2234_v12  ;;  %v2235_v53 = vmax.f32 %v2171_v55, 0.0 }
 0x232   : > { %2270 = vst.msk [vmem:[#allocation2 + $0x129] sm:$0xff] %vm1131_vm2, %v2237_v63  ;;  %v6402_v3 = vpop.f32.mrb[72].mxu1 }
 0x233   : > { %2268 = vst.msk [vmem:[#allocation2 + $0x111] sm:$0xff] %vm1131_vm2, %v2235_v53  ;;  %v6403_v52 = vpop.f32.mrb[73].mxu1  ;;  %v6956_v28 = vpop.f32.mrb[72].mxu0 }
 0x234   : > { %v6404_v51 = vadd.f32 %v6403_v52, %v6402_v3  ;;  %v2192_v6 = vadd.f32 %v6956_v28, %v2031_v7  ;;  %v6405_v47 = vpop.f32.mrb[74].mxu1  ;;  %v2183_v49 = vpop.f32.mrb[73].mxu0 }
 0x235   : > { %v2184_v41 = vadd.f32 %v2183_v49, %v2023_v61  ;;  %v6406_v40 = vpop.f32.mrb[75].mxu1  ;;  %v6957_v43 = vpop.f32.mrb[74].mxu0 }
 0x236   : > { %v2240_v14 = vmax.f32 %v2192_v6, 0.0  ;;  %v6407_v54 = vadd.f32 %v6406_v40, %v6405_v47  ;;  %v2195_v42 = vadd.f32 %v6957_v43, %v2034_v46  ;;  %v2186_v34 = vpop.f32.mrb[75].mxu0  ;;  %v2039_v60 = vadd.f32 %v6404_v51, %v1878_v13 }
 0x237   : > { %v2238_v44 = vmax.f32 %v2184_v41, 0.0  ;;  %v2187_v17 = vadd.f32 %v2186_v34, %v2026_v18 }
 0x238   : > { %2273 = vst.msk [vmem:[#allocation2 + $0x151] sm:$0xff] %vm1131_vm2, %v2240_v14  ;;  %v2241_v16 = vmax.f32 %v2195_v42, 0.0  ;;  %v2042_v22 = vadd.f32 %v6407_v54, %v1881_v10 }
 0x239   : > { %2271 = vst.msk [vmem:[#allocation2 + $0x139] sm:$0xff] %vm1131_vm2, %v2238_v44  ;;  %v2239_v20 = vmax.f32 %v2187_v17, 0.0 }
 0x23a   : > { %2274 = vst.msk [vmem:[#allocation2 + $0x159] sm:$0xff] %vm1131_vm2, %v2241_v16  ;;  %v6408_v2 = vpop.f32.mrb[76].mxu1 }
 0x23b   : > { %2272 = vst.msk [vmem:[#allocation2 + $0x141] sm:$0xff] %vm1131_vm2, %v2239_v20  ;;  %v6409_v4 = vpop.f32.mrb[77].mxu1  ;;  %v6960_v37 = vpop.f32.mrb[76].mxu0 }
 0x23c   : > { %v6410_v24 = vadd.f32 %v6409_v4, %v6408_v2  ;;  %v6411_v27 = vpop.f32.mrb[78].mxu1  ;;  %v2199_v21 = vpop.f32.mrb[77].mxu0 }
 0x23d   : > { %v2200_v50 = vadd.f32 %v2199_v21, %v2039_v60  ;;  %v6412_v35 = vpop.f32.mrb[79].mxu1  ;;  %v6961_v45 = vpop.f32.mrb[78].mxu0 }
 0x23e   : > { %v2047_v61 = vadd.f32 %v6410_v24, %v1886_v31  ;;  %v6413_v30 = vadd.f32 %v6412_v35, %v6411_v27  ;;  %v2202_v56 = vpop.f32.mrb[79].mxu0 }
 0x23f   : > { %v2242_v8 = vmax.f32 %v2200_v50, 0.0  ;;  %v2203_v18 = vadd.f32 %v2202_v56, %v2042_v22 }
 0x240   : > { %v2208_v26 = vadd.f32 %v6960_v37, %v2047_v61  ;;  %v2050_v19 = vadd.f32 %v6413_v30, %v1889_v57 }
 0x241   : > { %2275 = vst.msk [vmem:[#allocation2 + $0x169] sm:$0xff] %vm1131_vm2, %v2242_v8  ;;  %v2243_v62 = vmax.f32 %v2203_v18, 0.0 }
 0x242   : > { %v2244_v29 = vmax.f32 %v2208_v26, 0.0  ;;  %v2211_v39 = vadd.f32 %v6961_v45, %v2050_v19 }
 0x243   : > { %2276 = vst.msk [vmem:[#allocation2 + $0x171] sm:$0xff] %vm1131_vm2, %v2243_v62 }
 0x244   : > { %2277 = vst.msk [vmem:[#allocation2 + $0x181] sm:$0xff] %vm1131_vm2, %v2244_v29  ;;  %v2245_v9 = vmax.f32 %v2211_v39, 0.0 }
 0x246   : > { %2278 = vst.msk [vmem:[#allocation2 + $0x189] sm:$0xff] %vm1131_vm2, %v2245_v9 }
 0x247 PF: > { %p2279_p12 = scmp.eq.s32.totalorder %s9149_s25, 1 }
 0x249   : > { %p2280_p13 = pnand %p2279_p12, %p251_p6 }
 0x24a   : > { %v2453_v5 = vld [vmem:[#allocation2 + $0x138] sm:$0xff] (!%p2280_p13)  ;;  %v2454_v36 = vld [vmem:[#allocation2 + $0x140] sm:$0xff] (!%p2280_p13)  ;;  %v2357_v15 = vld [vmem:[#allocation2 + $0x129] sm:$0xff] (!%p2280_p13)  ;;  %s7286_s28 = smov (!%p2280_p13), 64   ;;  %vm2910_vm3 = vcmask (!%p2280_p13), 523264  }
 0x24b   : > { %2283 = sbr.rel (%p2280_p13) target bundleno = 1085 (0x43d), region = 48  ;;  %v2429_v1 = vld [vmem:[#allocation2 + $0x18] sm:$0xff] (!%p2280_p13)  ;;  %v8041_v25 = vpack.c.bf16 (!%p2280_p13), %v2454_v36, %v2453_v5  ;;  %v2430_v11 = vld [vmem:[#allocation2 + $0x20] sm:$0xff] (!%p2280_p13)  ;;  %v2333_v58 = vld [vmem:[#allocation2 + $0x9] sm:$0xff] (!%p2280_p13) }
 0x24c   : > { %v2356_v23 = vld [vmem:[#allocation2 + $0x121] sm:$0xff] (!%p2280_p13)  ;;  %v8043_v32 = vpack.c.bf16 (!%p2280_p13), %v2430_v11, %v2429_v1  ;;  %v2455_v38 = vld [vmem:[#allocation2 + $0x150] sm:$0xff] (!%p2280_p13)  ;;  %v2456_v48 = vld [vmem:[#allocation2 + $0x158] sm:$0xff] (!%p2280_p13) }
 0x24d   : > { %v2332_v59 = vld [vmem:[#allocation2 + $0x1] sm:$0xff] (!%p2280_p13)  ;;  %2806 = vrot.lane.b32.xlu0 (!%p2280_p13), %v8041_v25, %s7286_s28  ;;  %v8047_v33 = vpack.c.bf16 (!%p2280_p13), %v2357_v15, %v2356_v23  ;;  %v2358_v7 = vld [vmem:[#allocation2 + $0x139] sm:$0xff] (!%p2280_p13)  ;;  %v8053_v55 = vpack.c.bf16 (!%p2280_p13), %v2456_v48, %v2455_v38  ;;  %v2431_v46 = vld [vmem:[#allocation2 + $0x30] sm:$0xff] (!%p2280_p13) }
 0x24e   : > { %2782 = vrot.lane.b32.xlu1 (!%p2280_p13), %v8043_v32, %s7286_s28  ;;  %v2364_v0 = vpack.c.bf16 (!%p2280_p13), %v2333_v58, %v2332_v59  ;;  %v2359_v12 = vld [vmem:[#allocation2 + $0x141] sm:$0xff] (!%p2280_p13)  ;;  %v2432_v53 = vld [vmem:[#allocation2 + $0x38] sm:$0xff] (!%p2280_p13)  ;;  %v2458_v6 = vld [vmem:[#allocation2 + $0x170] sm:$0xff] (!%p2280_p13) }
 0x24f   : > { %v8056_v63 = vpack.c.bf16 (!%p2280_p13), %v2359_v12, %v2358_v7  ;;  %v2334_v3 = vld [vmem:[#allocation2 + $0x19] sm:$0xff] (!%p2280_p13)  ;;  %v2335_v52 = vld [vmem:[#allocation2 + $0x21] sm:$0xff] (!%p2280_p13)  ;;  %v8060_v28 = vpack.c.bf16 (!%p2280_p13), %v2432_v53, %v2431_v46  ;;  %v2360_v47 = vld [vmem:[#allocation2 + $0x151] sm:$0xff] (!%p2280_p13) }
 0x250   : > { %v8064_v13 = vpack.c.bf16 (!%p2280_p13), %v2335_v52, %v2334_v3  ;;  %v2457_v51 = vld [vmem:[#allocation2 + $0x168] sm:$0xff] (!%p2280_p13)  ;;  %v2361_v49 = vld [vmem:[#allocation2 + $0x159] sm:$0xff] (!%p2280_p13)  ;;  %v2434_v43 = vld [vmem:[#allocation2 + $0x50] sm:$0xff] (!%p2280_p13) }
 0x251   : > { %2758 = vrot.lane.b32.xlu0 (!%p2280_p13), %v8047_v33, %s7286_s28  ;;  %v8068_v10 = vpack.c.bf16 (!%p2280_p13), %v2458_v6, %v2457_v51  ;;  %v8072_v41 = vpack.c.bf16 (!%p2280_p13), %v2361_v49, %v2360_v47  ;;  %v2433_v40 = vld [vmem:[#allocation2 + $0x48] sm:$0xff] (!%p2280_p13)  ;;  %v2336_v14 = vld [vmem:[#allocation2 + $0x31] sm:$0xff] (!%p2280_p13)  ;;  %v2337_v54 = vld [vmem:[#allocation2 + $0x39] sm:$0xff] (!%p2280_p13) }
 0x252   : > { %2734 = vrot.lane.b32.xlu1 %v2364_v0, %s7286_s28  ;;  %v8076_v42 = vpack.c.bf16 %v2434_v43, %v2433_v40  ;;  %v8080_v34 = vpack.c.bf16 %v2337_v54, %v2336_v14  ;;  %v2459_v60 = vld [vmem:[#allocation2 + $0x180] sm:$0xff]  ;;  %v2460_v44 = vld [vmem:[#allocation2 + $0x188] sm:$0xff]  ;;  %v2363_v16 = vld [vmem:[#allocation2 + $0x171] sm:$0xff] }
 0x253   : > { %v2362_v17 = vld [vmem:[#allocation2 + $0x169] sm:$0xff]  ;;  %v2476_v22 = vpack.c.bf16 %v2460_v44, %v2459_v60  ;;  %v2435_v20 = vld [vmem:[#allocation2 + $0x60] sm:$0xff]  ;;  %v2339_v31 = vld [vmem:[#allocation2 + $0x51] sm:$0xff] }
 0x254   : > { %v2436_v2 = vld [vmem:[#allocation2 + $0x68] sm:$0xff]  ;;  %v8086_v4 = vpack.c.bf16 %v2363_v16, %v2362_v17  ;;  %v7172_v24 = vld [vmem:[%s7367_s11 + $0x40] sm:$0xff]   ;;  %v2437_v30 = vld [vmem:[#allocation2 + $0x78] sm:$0xff] }
 0x255   : > { %2808 = vrot.lane.b32.xlu0 %v8053_v55, %s7286_s28  ;;  %v2338_v37 = vld [vmem:[#allocation2 + $0x49] sm:$0xff]  ;;  %v7173_v27 = vld [vmem:[%s7367_s11] sm:$0xff]   ;;  %v8091_v21 = vpack.c.bf16 %v2436_v2, %v2435_v20  ;;  %7058 = vmatprep.subr.bf16.mxu1 %v7172_v24  ;;  %v7178_v29 = vld [vmem:[%s7367_s11 + $0x58] sm:$0xff]  }
 0x256   : > { %2760 = vrot.lane.b32.xlu1 %v8056_v63, %s7286_s28  ;;  %v8095_v50 = vpack.c.bf16 %v2339_v31, %v2338_v37  ;;  %7066 = vmatpush3.bf16.msra.mxu1 %v7173_v27  ;;  %v7174_v35 = vld [vmem:[%s7367_s11 + $0x48] sm:$0xff]   ;;  %v2525_v45 = vld [vmem:[#allocation2 + $0x1a] sm:$0xff]  ;;  %v7176_v26 = vld [vmem:[%s7367_s11 + $0x50] sm:$0xff]  }
 0x257   : > { %v2526_v57 = vld [vmem:[#allocation2 + $0x22] sm:$0xff]  ;;  %6434 = vmatprep.subr.bf16.mxu0 %v7172_v24  ;;  %7059 = vmatprep.subr.bf16.mxu1 %v7174_v35  ;;  %v7177_v62 = vld [vmem:[%s7367_s11 + $0x10] sm:$0xff]   ;;  %v2528_v5 = vld [vmem:[#allocation2 + $0x3a] sm:$0xff] }
 0x258   : > { %v7175_v61 = vld [vmem:[%s7367_s11 + $0x8] sm:$0xff]   ;;  %v2438_v56 = vld [vmem:[#allocation2 + $0x80] sm:$0xff]  ;;  %6435 = vmatpush3.bf16.msra.mxu0 %v7173_v27  ;;  %v8104_v19 = vpack.c.bf16 %v2526_v57, %v2525_v45  ;;  %v2527_v9 = vld [vmem:[#allocation2 + $0x32] sm:$0xff] }
 0x259   : > { %2784 = vrot.lane.b32.xlu0 %v8060_v28, %s7286_s28  ;;  %v2340_v8 = vld [vmem:[#allocation2 + $0x61] sm:$0xff]  ;;  %v2341_v18 = vld [vmem:[#allocation2 + $0x69] sm:$0xff]  ;;  %6436 = vmatprep.subr.bf16.mxu0 %v7174_v35  ;;  %v8110_v39 = vpack.c.bf16 %v2438_v56, %v2437_v30  ;;  %v7179_v1 = vld [vmem:[%s7367_s11 + $0x18] sm:$0xff]   ;;  %v8119_v0 = vpack.c.bf16 %v2528_v5, %v2527_v9 }
 0x25a   : > { %2736 = vrot.lane.b32.xlu1 %v8064_v13, %s7286_s28  ;;  %7067 = vmatpush3.bf16.msra.mxu1 %v7175_v61  ;;  %v2368_v36 = vpack.c.bf16 %v2341_v18, %v2340_v8  ;;  %v7180_v11 = vld [vmem:[%s7367_s11 + $0x60] sm:$0xff]   ;;  %v2439_v23 = vld [vmem:[#allocation2 + $0x90] sm:$0xff]  ;;  %v2440_v15 = vld [vmem:[#allocation2 + $0x98] sm:$0xff] }
 0x25b   : > { %7060 = vmatprep.subr.bf16.mxu1 %v7176_v26  ;;  %v2342_v59 = vld [vmem:[#allocation2 + $0x79] sm:$0xff]  ;;  %v2343_v58 = vld [vmem:[#allocation2 + $0x81] sm:$0xff]  ;;  %v8125_v7 = vpack.c.bf16 %v2440_v15, %v2439_v23  ;;  %v2529_v46 = vld [vmem:[#allocation2 + $0x4a] sm:$0xff] }
 0x25c   : > { %6437 = vmatpush3.bf16.msra.mxu0 %v7175_v61  ;;  %v7181_v38 = vld [vmem:[%s7367_s11 + $0x20] sm:$0xff]   ;;  %v7182_v48 = vld [vmem:[%s7367_s11 + $0x68] sm:$0xff]   ;;  %v2369_v12 = vpack.c.bf16 %v2343_v58, %v2342_v59  ;;  %v2530_v53 = vld [vmem:[#allocation2 + $0x52] sm:$0xff] }
 0x25d   : > { %2810 = vrot.lane.b32.xlu0 %v8068_v10, %s7286_s28  ;;  %6438 = vmatprep.subr.bf16.mxu0 %v7176_v26  ;;  %v7183_v3 = vld [vmem:[%s7367_s11 + $0x28] sm:$0xff]   ;;  %v7184_v52 = vld [vmem:[%s7367_s11 + $0x70] sm:$0xff]   ;;  %v8134_v49 = vpack.c.bf16 %v2530_v53, %v2529_v46  ;;  %v2345_v40 = vld [vmem:[#allocation2 + $0x99] sm:$0xff] }
 0x25e   : > { %2762 = vrot.lane.b32.xlu1 %v8072_v41, %s7286_s28  ;;  %7068 = vmatpush3.bf16.msra.mxu1 %v7177_v62  ;;  %v2441_v51 = vld [vmem:[#allocation2 + $0xa8] sm:$0xff]  ;;  %v2442_v6 = vld [vmem:[#allocation2 + $0xb0] sm:$0xff]  ;;  %v7186_v14 = vld [vmem:[%s7367_s11 + $0x78] sm:$0xff]  }
 0x25f   : > { %7061 = vmatprep.subr.bf16.mxu1 %v7178_v29  ;;  %v2344_v47 = vld [vmem:[#allocation2 + $0x91] sm:$0xff]  ;;  %v8139_v54 = vpack.c.bf16 %v2442_v6, %v2441_v51  ;;  %v2531_v60 = vld [vmem:[#allocation2 + $0x62] sm:$0xff]  ;;  %v2533_v57 = vld [vmem:[#allocation2 + $0x7a] sm:$0xff] }
 0x260   : > { %6439 = vmatpush3.bf16.msra.mxu0 %v7177_v62  ;;  %v7185_v43 = vld [vmem:[%s7367_s11 + $0x30] sm:$0xff]   ;;  %v2370_v17 = vpack.c.bf16 %v2345_v40, %v2344_v47  ;;  %v7187_v16 = vld [vmem:[%s7367_s11 + $0x38] sm:$0xff]   ;;  %v8148_v20 = vld [vmem:[%s7367_s11 + $0x100] sm:$0xff]  }
 0x261   : > { %2786 = vrot.lane.b32.xlu0 %v8076_v42, %s7286_s28  ;;  %6440 = vmatprep.subr.bf16.mxu0 %v7178_v29  ;;  %v2532_v44 = vld [vmem:[#allocation2 + $0x6a] sm:$0xff]  ;;  %v2443_v37 = vld [vmem:[#allocation2 + $0xc0] sm:$0xff]  ;;  %v2445_v30 = vld [vmem:[#allocation2 + $0xd8] sm:$0xff] }
 0x262   : > { %2738 = vrot.lane.b32.xlu1 %v8080_v34, %s7286_s28  ;;  %7069 = vmatpush3.bf16.msra.mxu1 %v7179_v1  ;;  %v8151_v2 = vpack.c.bf16 %v2532_v44, %v2531_v60  ;;  %v2444_v31 = vld [vmem:[#allocation2 + $0xc8] sm:$0xff]  ;;  %v2347_v27 = vld [vmem:[#allocation2 + $0xb1] sm:$0xff]  ;;  %v2446_v56 = vld [vmem:[#allocation2 + $0xe0] sm:$0xff] }
 0x263   : > { %7062 = vmatprep.subr.bf16.mxu1 %v7180_v11  ;;  %v2346_v24 = vld [vmem:[#allocation2 + $0xa9] sm:$0xff]  ;;  %v8154_v35 = vpack.c.bf16 %v2444_v31, %v2443_v37  ;;  %v2348_v18 = vld [vmem:[#allocation2 + $0xc1] sm:$0xff]  ;;  %v2469_v62 = vpack.c.bf16 %v2446_v56, %v2445_v30  ;;  %v2535_v9 = vld [vmem:[#allocation2 + $0x92] sm:$0xff] }
 0x264   : > { %6441 = vmatpush3.bf16.msra.mxu0 %v7179_v1  ;;  %v2371_v45 = vpack.c.bf16 %v2347_v27, %v2346_v24  ;;  %v2534_v61 = vld [vmem:[#allocation2 + $0x82] sm:$0xff]  ;;  %v2536_v5 = vld [vmem:[#allocation2 + $0x9a] sm:$0xff]  ;;  %v2447_v1 = vld [vmem:[#allocation2 + $0xf0] sm:$0xff] }
 0x265   : > { %2812 = vrot.lane.b32.xlu0 %v2476_v22, %s7286_s28  ;;  %6442 = vmatprep.subr.bf16.mxu0 %v7180_v11  ;;  %v7188_v22 = vld [vmem:[%s7367_s11 + $0xc0] sm:$0xff]   ;;  %v8162_v8 = vpack.c.bf16 %v2534_v61, %v2533_v57  ;;  %v2349_v26 = vld [vmem:[#allocation2 + $0xc9] sm:$0xff]  ;;  %v2448_v11 = vld [vmem:[#allocation2 + $0xf8] sm:$0xff] }
 0x266   : > { %2764 = vrot.lane.b32.xlu1 %v8086_v4, %s7286_s28  ;;  %7070 = vmatpush3.bf16.msra.mxu1 %v7181_v38  ;;  %v2372_v29 = vpack.c.bf16 %v2349_v26, %v2348_v18  ;;  %v2350_v23 = vld [vmem:[#allocation2 + $0xd9] sm:$0xff]  ;;  %v2351_v15 = vld [vmem:[#allocation2 + $0xe1] sm:$0xff]  ;;  %v2470_v59 = vpack.c.bf16 %v2448_v11, %v2447_v1  ;;  %v2450_v53 = vld [vmem:[#allocation2 + $0x110] sm:$0xff] }
 0x267   : > { %7063 = vmatprep.subr.bf16.mxu1 %v7182_v48  ;;  %v2373_v58 = vpack.c.bf16 %v2351_v15, %v2350_v23  ;;  %v2449_v46 = vld [vmem:[#allocation2 + $0x108] sm:$0xff]  ;;  %v2541_v37 = vld [vmem:[#allocation2 + $0xda] sm:$0xff]  ;;  %v2543_v27 = vld [vmem:[#allocation2 + $0xf2] sm:$0xff] }
 0x268   : > { %6443 = vmatpush3.bf16.msra.mxu0 %v7181_v38  ;;  %v2537_v38 = vld [vmem:[#allocation2 + $0xaa] sm:$0xff]  ;;  %v2471_v51 = vpack.c.bf16 %v2450_v53, %v2449_v46  ;;  %v2539_v47 = vld [vmem:[#allocation2 + $0xc2] sm:$0xff]  ;;  %v2546_v30 = vld [vmem:[#allocation2 + $0x112] sm:$0xff] }
 0x269   : > { %2788 = vrot.lane.b32.xlu0 %v8091_v21, %s7286_s28  ;;  %6444 = vmatprep.subr.bf16.mxu0 %v7182_v48  ;;  %v2538_v48 = vld [vmem:[#allocation2 + $0xb2] sm:$0xff]  ;;  %v2540_v40 = vld [vmem:[#allocation2 + $0xca] sm:$0xff]  ;;  %v2542_v31 = vld [vmem:[#allocation2 + $0xe2] sm:$0xff] }
 0x26a   : > { %2740 = vrot.lane.b32.xlu1 %v8095_v50, %s7286_s28  ;;  %7071 = vmatpush3.bf16.msra.mxu1 %v7183_v3  ;;  %v2452_v60 = vld [vmem:[#allocation2 + $0x128] sm:$0xff]  ;;  %v8190_v24 = vpack.c.bf16 %v2542_v31, %v2541_v37  ;;  %v2408_v15 = vld [vmem:[#allocation2 + $0x152] sm:$0xff] }
 0x26b   : > { %7064 = vmatprep.subr.bf16.mxu1 %v7184_v52  ;;  %v2354_v44 = vld [vmem:[#allocation2 + $0x109] sm:$0xff] }
 0x26c   : > { %6445 = vmatpush3.bf16.msra.mxu0 %v7183_v3  ;;  %v2352_v3 = vld [vmem:[#allocation2 + $0xf1] sm:$0xff]  ;;  %v2404_v18 = vld [vmem:[#allocation2 + $0x122] sm:$0xff] }
 0x26d   : > { %2878 = vrot.lane.b32.xlu0 %v8080_v34, %s7286_s28  ;;  %6446 = vmatprep.subr.bf16.mxu0 %v7184_v52  ;;  %v2353_v52 = vld [vmem:[#allocation2 + $0xf9] sm:$0xff]  ;;  %v2545_v61 = vld [vmem:[#allocation2 + $0x10a] sm:$0xff] }
 0x26e   : > { %2830 = vrot.lane.b32.xlu1 %v8104_v19, %s7286_s28  ;;  %7072 = vmatpush3.bf16.msra.mxu1 %v7185_v43  ;;  %v2374_v6 = vpack.c.bf16 %v2353_v52, %v2352_v3  ;;  %v8200_v56 = vpack.c.bf16 %v2546_v30, %v2545_v61  ;;  %v2405_v26 = vld [vmem:[#allocation2 + $0x12a] sm:$0xff] }
 0x26f   : > { %7065 = vmatprep.subr.bf16.mxu1 %v7186_v14  ;;  %v2381_v1 = vld [vmem:[#allocation2 + $0xa] sm:$0xff] }
 0x270   : > { %6447 = vmatpush3.bf16.msra.mxu0 %v7185_v43  ;;  %v8183_v43 = vpack.c.bf16 %v2540_v40, %v2539_v47  ;;  %v2652_v47 = vld [vmem:[#allocation2 + $0x199] sm:$0xff]  ;;  %v2653_v40 = vld [vmem:[#allocation2 + $0x1a1] sm:$0xff]  ;;  %v2556_v61 = vld [vmem:[#allocation2 + $0x18a] sm:$0xff] }
 0x271   : > { %2790 = vrot.lane.b32.xlu0 %v8110_v39, %s7286_s28  ;;  %6448 = vmatprep.subr.bf16.mxu0 %v7186_v14  ;;  %v2451_v14 = vld [vmem:[#allocation2 + $0x120] sm:$0xff]  ;;  %v7204_v31 = vld [vmem:[%s7367_s11 + $0x108] sm:$0xff]  }
 0x272   : > { %2742 = vrot.lane.b32.xlu1 %v2368_v36, %s7286_s28  ;;  %7073 = vmatpush3.bf16.msra.mxu1 %v7187_v16  ;;  %v7192_v30 = vld [vmem:[%s7367_s11 + $0x88] sm:$0xff]  }
 0x273   : > { %6546 = vmatprep.subr.bf16.mxu1 %v7188_v22 }
 0x274   : > { %6449 = vmatpush3.bf16.msra.mxu0 %v7187_v16  ;;  %v2472_v16 = vpack.c.bf16 %v2452_v60, %v2451_v14  ;;  %v7191_v60 = vld [vmem:[%s7367_s11 + $0xc8] sm:$0xff]  }
 0x275   : > { %2880 = vrot.lane.b32.xlu0 %v8095_v50, %s7286_s28  ;;  %6962 = vmatprep.subr.bf16.mxu0 %v8148_v20 }
 0x276   : > { %2832 = vrot.lane.b32.xlu1 %v8119_v0, %s7286_s28 }
 0x279   : > { %2792 = vrot.lane.b32.xlu0 %v8125_v7, %s7286_s28 }
 0x27a   : > { %2744 = vrot.lane.b32.xlu1 %v2369_v12, %s7286_s28 }
 0x27d   : > { %2882 = vrot.lane.b32.xlu0 %v2368_v36, %s7286_s28  ;;  %v8169_v36 = vpack.c.bf16 %v2536_v5, %v2535_v9  ;;  %v2407_v9 = vld [vmem:[#allocation2 + $0x142] sm:$0xff] }
 0x27e   : > { %2834 = vrot.lane.b32.xlu1 %v8134_v49, %s7286_s28  ;;  %v2380_v5 = vld [vmem:[#allocation2 + $0x2] sm:$0xff] }
 0x27f   : > { %v2412_v23 = vpack.c.bf16 %v2381_v1, %v2380_v5  ;;  %v7206_v5 = vld [vmem:[%s7367_s11 + $0x110] sm:$0xff]  }
 0x280   : > { %v7194_v1 = vld [vmem:[%s7367_s11 + $0x90] sm:$0xff]  }
 0x281   : > { %2794 = vrot.lane.b32.xlu0 %v8139_v54, %s7286_s28 }
 0x282   : > { %2746 = vrot.lane.b32.xlu1 %v2370_v17, %s7286_s28 }
 0x285   : > { %2884 = vrot.lane.b32.xlu0 %v2369_v12, %s7286_s28  ;;  %v8176_v12 = vpack.c.bf16 %v2538_v48, %v2537_v38  ;;  %v2651_v38 = vld [vmem:[#allocation2 + $0x189] sm:$0xff] }
 0x286   : > { %2836 = vrot.lane.b32.xlu1 %v8151_v2, %s7286_s28 }
 0x289   : > { %2796 = vrot.lane.b32.xlu0 %v8154_v35, %s7286_s28 }
 0x28a   : > { %2748 = vrot.lane.b32.xlu1 %v2371_v45, %s7286_s28 }
 0x28d   : > { %2886 = vrot.lane.b32.xlu0 %v2370_v17, %s7286_s28  ;;  %v2355_v17 = vld [vmem:[#allocation2 + $0x111] sm:$0xff] }
 0x28e   : > { %2838 = vrot.lane.b32.xlu1 %v8162_v8, %s7286_s28  ;;  %v2375_v22 = vpack.c.bf16 %v2355_v17, %v2354_v44  ;;  %v2410_v44 = vld [vmem:[#allocation2 + $0x16a] sm:$0xff]  ;;  %v2411_v17 = vld [vmem:[#allocation2 + $0x172] sm:$0xff] }
 0x291   : > { %2798 = vrot.lane.b32.xlu0 %v2469_v62, %s7286_s28  ;;  %v2424_v62 = vpack.c.bf16 %v2405_v26, %v2404_v18  ;;  %v8233_v18 = vpack.c.bf16 %v2411_v17, %v2410_v44 }
 0x292   : > { %2750 = vrot.lane.b32.xlu1 %v2372_v29, %s7286_s28 }
 0x295   : > { %2888 = vrot.lane.b32.xlu0 %v2371_v45, %s7286_s28  ;;  %v2544_v45 = vld [vmem:[#allocation2 + $0xfa] sm:$0xff] }
 0x296   : > { %2840 = vrot.lane.b32.xlu1 %v8169_v36, %s7286_s28  ;;  %v8195_v57 = vpack.c.bf16 %v2544_v45, %v2543_v27  ;;  %v2669_v27 = vpack.c.bf16 %v2653_v40, %v2652_v47  ;;  %v2555_v45 = vld [vmem:[#allocation2 + $0x182] sm:$0xff] }
 0x299   : > { %2800 = vrot.lane.b32.xlu0 %v2470_v59, %s7286_s28  ;;  %v2409_v59 = vld [vmem:[#allocation2 + $0x15a] sm:$0xff] }
 0x29a   : > { %2752 = vrot.lane.b32.xlu1 %v2373_v58, %s7286_s28  ;;  %v8216_v3 = vpack.c.bf16 %v2409_v59, %v2408_v15 }
 0x29d   : > { %2890 = vrot.lane.b32.xlu0 %v2372_v29, %s7286_s28  ;;  %v2406_v29 = vld [vmem:[#allocation2 + $0x13a] sm:$0xff] }
 0x29e   : > { %2842 = vrot.lane.b32.xlu1 %v8176_v12, %s7286_s28  ;;  %v8209_v11 = vpack.c.bf16 %v2407_v9, %v2406_v29  ;;  %v8241_v9 = vpack.c.bf16 %v2556_v61, %v2555_v45  ;;  %v7205_v61 = vld [vmem:[%s7367_s11 + $0xb8] sm:$0xff]  }
 0x2a1   : > { %2802 = vrot.lane.b32.xlu0 %v2471_v51, %s7286_s28 }
 0x2a2   : > { %2754 = vrot.lane.b32.xlu1 %v2374_v6, %s7286_s28 }
 0x2a5   : > { %2892 = vrot.lane.b32.xlu0 %v2373_v58, %s7286_s28  ;;  %v2285_v58 = vld [vmem:[#allocation2 + $0x8] sm:$0xff] }
 0x2a6   : > { %2844 = vrot.lane.b32.xlu1 %v8183_v43, %s7286_s28 }
 0x2a9   : > { %2804 = vrot.lane.b32.xlu0 %v2472_v16, %s7286_s28 }
 0x2aa   : > { %2756 = vrot.lane.b32.xlu1 %v2375_v22, %s7286_s28 }
 0x2ad   : > { %2894 = vrot.lane.b32.xlu0 %v2374_v6, %s7286_s28  ;;  %v7189_v6 = vld [vmem:[%s7367_s11 + $0x80] sm:$0xff]  }
 0x2ae   : > { %2846 = vrot.lane.b32.xlu1 %v8190_v24, %s7286_s28 }
 0x2b1   : > { %2896 = vrot.lane.b32.xlu0 %v2375_v22, %s7286_s28 }
 0x2b2   : > { %2848 = vrot.lane.b32.xlu1 %v8195_v57, %s7286_s28 }
 0x2b5   : > { %2898 = vrot.lane.b32.xlu0 %v8047_v33, %s7286_s28  ;;  %v2284_v33 = vld [vmem:[#allocation2] sm:$0xff] }
 0x2b6   : > { %2850 = vrot.lane.b32.xlu1 %v8200_v56, %s7286_s28  ;;  %v2316_v52 = vpack.c.bf16 %v2285_v58, %v2284_v33  ;;  %v7195_v33 = vld [vmem:[%s7367_s11 + $0xd8] sm:$0xff]  }
 0x2b7   : > { %v7207_v58 = vld [vmem:[%s7367_s11 + $0x118] sm:$0xff]  }
 0x2b9   : > { %2900 = vrot.lane.b32.xlu0 %v8056_v63, %s7286_s28  ;;  %v2650_v63 = vld [vmem:[#allocation2 + $0x181] sm:$0xff] }
 0x2ba   : > { %2852 = vrot.lane.b32.xlu1 %v2424_v62, %s7286_s28  ;;  %v8221_v51 = vpack.c.bf16 %v2651_v38, %v2650_v63  ;;  %v7196_v63 = vld [vmem:[%s7367_s11 + $0x98] sm:$0xff]  }
 0x2bd   : > { %2902 = vrot.lane.b32.xlu0 %v8072_v41, %s7286_s28 }
 0x2be   : > { %2854 = vrot.lane.b32.xlu1 %v8209_v11, %s7286_s28 }
 0x2bf   : > { %v2807_v48 = vpop.permute.xlu0 %2806 }
 0x2c0   : > { %v2783_v46 = vpop.permute.xlu1 %2782  ;;  %v3025_v53 = vsel %vm2910_vm3, %v2424_v62, %v2807_v48  ;;  %v7197_v48 = vld [vmem:[%s7367_s11 + $0xe0] sm:$0xff]  }
 0x2c1   : > { %3638 = vmatprep.mubr.bf16.mxu1 %v3025_v53  ;;  %v2977_v41 = vsel %vm2910_vm3, %v2412_v23, %v2783_v46  ;;  %2904 = vrot.lane.b32.xlu0 %v8086_v4, %s7286_s28 }
 0x2c2   : > { %3542 = vmatprep.mubr.bf16.mxu0 %v2977_v41  ;;  %2856 = vrot.lane.b32.xlu1 %v8216_v3, %s7286_s28 }
 0x2c3   : > { %v2759_v14 = vpop.permute.xlu0 %2758 }
 0x2c4   : > { %v2735_v22 = vpop.permute.xlu1 %2734  ;;  %v2961_v37 = vsel %vm2910_vm3, %v2472_v16, %v2759_v14  ;;  %v7193_v16 = vld [vmem:[%s7367_s11 + $0xd0] sm:$0xff]  }
 0x2c5   : > { %3639 = vmatmul.mubr.bf16.vlgmr.msra.gmra.mrb[0].mxu1 %v2961_v37  ;;  %v2913_v4 = vsel %vm2910_vm3, %v2316_v52, %v2735_v22  ;;  %2906 = vrot.lane.b32.xlu0 %v8221_v51, %s7286_s28  ;;  %v7199_v52 = vld [vmem:[%s7367_s11 + $0xe8] sm:$0xff]   ;;  %v7202_v22 = vld [vmem:[%s7367_s11 + $0xb0] sm:$0xff]  }
 0x2c6   : > { %6547 = vmatpush3.bf16.msra.mxu1 %v7189_v6  ;;  %3543 = vmatmul.mubr.bf16.vlgmr.msra.gmra.mrb[0].mxu0 %v2913_v4 }
 0x2c7   : > { %v2809_v26 = vpop.permute.xlu0 %2808  ;;  %6548 = vmatprep.subr.bf16.mxu1 %v7191_v60  ;;  %6963 = vmatpush3.bf16.msra.mxu0 %v8148_v20  ;;  %v7201_v60 = vld [vmem:[%s7367_s11 + $0xf0] sm:$0xff]  }
 0x2c8   : > { %v2761_v62 = vpop.permute.xlu1 %2760  ;;  %v3029_v29 = vsel %vm2910_vm3, %v8209_v11, %v2809_v26  ;;  %6964 = vmatprep.subr.bf16.mxu0 %v7204_v31  ;;  %2858 = vrot.lane.b32.xlu1 %v8233_v18, %s7286_s28 }
 0x2c9   : > { %3646 = vmatprep.mubr.bf16.mxu1 %v3029_v29  ;;  %2908 = vrot.lane.b32.xlu0 %v2669_v27, %s7286_s28  ;;  %v2965_v20 = vsel %vm2910_vm3, %v8041_v25, %v2761_v62 }
 0x2ca   : > { %6549 = vmatpush3.bf16.msra.mxu1 %v7192_v30 }
 0x2cb   : > { %v2785_v23 = vpop.permute.xlu0 %2784  ;;  %6550 = vmatprep.subr.bf16.mxu1 %v7193_v16  ;;  %6965 = vmatpush3.bf16.msra.mxu0 %v7204_v31  ;;  %v7203_v31 = vld [vmem:[%s7367_s11 + $0xf8] sm:$0xff]  }
 0x2cc   : > { %v2737_v15 = vpop.permute.xlu1 %2736  ;;  %v2981_v59 = vsel %vm2910_vm3, %v8104_v19, %v2785_v23  ;;  %2860 = vrot.lane.b32.xlu1 %v8241_v9, %s7286_s28  ;;  %6966 = vmatprep.subr.bf16.mxu0 %v7206_v5 }
 0x2cd   : > { %3550 = vmatprep.mubr.bf16.mxu0 %v2981_v59  ;;  %3647 = vmatmul.mubr.bf16.gmra.mrb[4].mxu1 %v2965_v20  ;;  %v2917_v25 = vsel %vm2910_vm3, %v8043_v32, %v2737_v15  ;;  %v7198_v32 = vld [vmem:[%s7367_s11 + $0xa0] sm:$0xff]  }
 0x2ce   : > { %6551 = vmatpush3.bf16.msra.mxu1 %v7194_v1  ;;  %3551 = vmatmul.mubr.bf16.gmra.mrb[4].mxu0 %v2917_v25  ;;  %v2580_v25 = vld [vmem:[#allocation2 + $0x78] sm:$0xff] }
 0x2cf   : > { %v2811_v38 = vpop.permute.xlu0 %2810  ;;  %6552 = vmatprep.subr.bf16.mxu1 %v7195_v33  ;;  %6967 = vmatpush3.bf16.msra.mxu0 %v7206_v5 }
 0x2d0   : > { %v2763_v19 = vpop.permute.xlu1 %2762  ;;  %v3033_v46 = vsel %vm2910_vm3, %v8216_v3, %v2811_v38  ;;  %6968 = vmatprep.subr.bf16.mxu0 %v7207_v58 }
 0x2d1   : > { %3654 = vmatprep.mubr.bf16.mxu1 %v3033_v46  ;;  %v2969_v53 = vsel %vm2910_vm3, %v8053_v55, %v2763_v19  ;;  %v7200_v55 = vld [vmem:[%s7367_s11 + $0xa8] sm:$0xff]  }
 0x2d2   : > { %6553 = vmatpush3.bf16.msra.mxu1 %v7196_v63  ;;  %v2581_v63 = vld [vmem:[#allocation2 + $0x80] sm:$0xff] }
 0x2d3   : > { %v2787_v41 = vpop.permute.xlu0 %2786  ;;  %6554 = vmatprep.subr.bf16.mxu1 %v7197_v48  ;;  %6969 = vmatpush3.bf16.msra.mxu0 %v7207_v58  ;;  %v2483_v48 = vld [vmem:[#allocation2 + $0x61] sm:$0xff] }
 0x2d4   : > { %v2739_v6 = vpop.permute.xlu1 %2738  ;;  %v2985_v47 = vsel %vm2910_vm3, %v8119_v0, %v2787_v41 }
 0x2d5   : > { %3558 = vmatprep.mubr.bf16.mxu0 %v2985_v47  ;;  %3655 = vmatmul.mubr.bf16.gmra.mrb[8].mxu1 %v2969_v53  ;;  %v2921_v40 = vsel %vm2910_vm3, %v8060_v28, %v2739_v6  ;;  %v2583_v6 = vld [vmem:[#allocation2 + $0x98] sm:$0xff] }
 0x2d6   : > { %6555 = vmatpush3.bf16.msra.mxu1 %v7198_v32  ;;  %3559 = vmatmul.mubr.bf16.gmra.mrb[8].mxu0 %v2921_v40 }
 0x2d7   : > { %v2813_v14 = vpop.permute.xlu0 %2812  ;;  %6556 = vmatprep.subr.bf16.mxu1 %v7199_v52 }
 0x2d8   : > { %v2765_v44 = vpop.permute.xlu1 %2764  ;;  %v3037_v17 = vsel %vm2910_vm3, %v8233_v18, %v2813_v14 }
 0x2d9   : > { %3662 = vmatprep.mubr.bf16.mxu1 %v3037_v17  ;;  %v2973_v0 = vsel %vm2910_vm3, %v8068_v10, %v2765_v44 }
 0x2da   : > { %6557 = vmatpush3.bf16.msra.mxu1 %v7200_v55  ;;  %v2485_v55 = vld [vmem:[#allocation2 + $0x79] sm:$0xff] }
 0x2db   : > { %v2789_v37 = vpop.permute.xlu0 %2788  ;;  %6558 = vmatprep.subr.bf16.mxu1 %v7201_v60 }
 0x2dc   : > { %v2741_v4 = vpop.permute.xlu1 %2740  ;;  %v2989_v27 = vsel %vm2910_vm3, %v8134_v49, %v2789_v37 }
 0x2dd   : > { %3566 = vmatprep.mubr.bf16.mxu0 %v2989_v27  ;;  %3663 = vmatmul.mubr.bf16.gmra.mrb[12].mxu1 %v2973_v0  ;;  %v2925_v45 = vsel %vm2910_vm3, %v8076_v42, %v2741_v4  ;;  %v2585_v4 = vld [vmem:[#allocation2 + $0xb0] sm:$0xff] }
 0x2de   : > { %6559 = vmatpush3.bf16.msra.mxu1 %v7202_v22  ;;  %3567 = vmatmul.mubr.bf16.gmra.mrb[12].mxu0 %v2925_v45 }
 0x2df   : > { %v2879_v30 = vpop.permute.xlu0 %2878  ;;  %6560 = vmatprep.subr.bf16.mxu1 %v7203_v31  ;;  %v2584_v31 = vld [vmem:[#allocation2 + $0xa8] sm:$0xff] }
 0x2e0   : > { %v2831_v26 = vpop.permute.xlu1 %2830  ;;  %v3105_v10 = vsel %vm2910_vm3, %v8060_v28, %v2879_v30 }
 0x2e1   : > { %3703 = vmatprep.mubr.bf16.mxu1 %v3105_v10  ;;  %v3041_v16 = vsel %vm2910_vm3, %v8064_v13, %v2831_v26  ;;  %v2611_v10 = vpack.c.bf16 %v2585_v4, %v2584_v31 }
 0x2e2   : > { %6561 = vmatpush3.bf16.msra.mxu1 %v7205_v61  ;;  %v2487_v61 = vld [vmem:[#allocation2 + $0x91] sm:$0xff] }
 0x2e3   : > { %v2791_v49 = vpop.permute.xlu0 %2790 }
 0x2e4   : > { %v2743_v62 = vpop.permute.xlu1 %2742  ;;  %v2993_v29 = vsel %vm2910_vm3, %v8151_v2, %v2791_v49  ;;  %v2302_v49 = vld [vmem:[#allocation2 + $0xd8] sm:$0xff] }
 0x2e5   : > { %3574 = vmatprep.mubr.bf16.mxu0 %v2993_v29  ;;  %3704 = vmatmul.mubr.bf16.vlgmr.msra.gmra.mrb[16].mxu1 %v3041_v16  ;;  %v2929_v5 = vsel %vm2910_vm3, %v8091_v21, %v2743_v62  ;;  %v2303_v62 = vld [vmem:[#allocation2 + $0xe0] sm:$0xff] }
 0x2e6   : > { %3575 = vmatmul.mubr.bf16.gmra.mrb[16].mxu0 %v2929_v5 }
 0x2e7   : > { %v2881_v20 = vpop.permute.xlu0 %2880 }
 0x2e8   : > { %v2833_v1 = vpop.permute.xlu1 %2832  ;;  %v3109_v28 = vsel %vm2910_vm3, %v8076_v42, %v2881_v20 }
 0x2e9   : > { %3711 = vmatprep.mubr.bf16.mxu1 %v3109_v28  ;;  %v3045_v13 = vsel %vm2910_vm3, %v8080_v34, %v2833_v1  ;;  %v2325_v1 = vpack.c.bf16 %v2303_v62, %v2302_v49  ;;  %v2586_v28 = vld [vmem:[#allocation2 + $0xc0] sm:$0xff]  ;;  %v2495_v49 = vld [vmem:[#allocation2 + $0xf1] sm:$0xff] }
 0x2ea   : > { %v2496_v62 = vld [vmem:[#allocation2 + $0xf9] sm:$0xff] }
 0x2eb   : > { %v2793_v23 = vpop.permute.xlu0 %2792 }
 0x2ec   : > { %v2745_v33 = vpop.permute.xlu1 %2744  ;;  %v2997_v2 = vsel %vm2910_vm3, %v8162_v8, %v2793_v23  ;;  %v2484_v8 = vld [vmem:[#allocation2 + $0x69] sm:$0xff] }
 0x2ed   : > { %3582 = vmatprep.mubr.bf16.mxu0 %v2997_v2  ;;  %3712 = vmatmul.mubr.bf16.gmra.mrb[20].mxu1 %v3045_v13  ;;  %v2933_v15 = vsel %vm2910_vm3, %v8110_v39, %v2745_v33  ;;  %v2609_v39 = vpack.c.bf16 %v2581_v63, %v2580_v25  ;;  %v2587_v13 = vld [vmem:[#allocation2 + $0xc8] sm:$0xff]  ;;  %v2490_v2 = vld [vmem:[#allocation2 + $0xb1] sm:$0xff] }
 0x2ee   : > { %3583 = vmatmul.mubr.bf16.gmra.mrb[20].mxu0 %v2933_v15  ;;  %v2489_v33 = vld [vmem:[#allocation2 + $0xa9] sm:$0xff]  ;;  %v2305_v63 = vld [vmem:[#allocation2 + $0xf8] sm:$0xff] }
 0x2ef   : > { %v2883_v59 = vpop.permute.xlu0 %2882  ;;  %v2304_v25 = vld [vmem:[#allocation2 + $0xf0] sm:$0xff] }
 0x2f0   : > { %v2835_v58 = vpop.permute.xlu1 %2834  ;;  %v3113_v42 = vsel %vm2910_vm3, %v8091_v21, %v2883_v59  ;;  %v2512_v21 = vpack.c.bf16 %v2484_v8, %v2483_v48  ;;  %v2612_v59 = vpack.c.bf16 %v2587_v13, %v2586_v28  ;;  %v2326_v8 = vpack.c.bf16 %v2305_v63, %v2304_v25  ;;  %v2497_v25 = vld [vmem:[#allocation2 + $0x109] sm:$0xff]  ;;  %v2498_v63 = vld [vmem:[#allocation2 + $0x111] sm:$0xff] }
 0x2f1   : > { %3719 = vmatprep.mubr.bf16.mxu1 %v3113_v42  ;;  %v3049_v34 = vsel %vm2910_vm3, %v8095_v50, %v2835_v58  ;;  %v2582_v50 = vld [vmem:[#allocation2 + $0x90] sm:$0xff]  ;;  %v2515_v42 = vpack.c.bf16 %v2490_v2, %v2489_v33  ;;  %v2518_v28 = vpack.c.bf16 %v2496_v62, %v2495_v49  ;;  %v2690_v49 = vld [vmem:[#allocation2 + $0x122] sm:$0xff] }
 0x2f2   : > { %v2610_v44 = vpack.c.bf16 %v2583_v6, %v2582_v50  ;;  %v2307_v50 = vld [vmem:[#allocation2 + $0x110] sm:$0xff] }
 0x2f3   : > { %v2795_v38 = vpop.permute.xlu0 %2794  ;;  %v2691_v62 = vld [vmem:[#allocation2 + $0x12a] sm:$0xff] }
 0x2f4   : > { %v2747_v19 = vpop.permute.xlu1 %2746  ;;  %v3001_v46 = vsel %vm2910_vm3, %v8169_v36, %v2795_v38  ;;  %v2486_v36 = vld [vmem:[#allocation2 + $0x81] sm:$0xff] }
 0x2f5   : > { %3590 = vmatprep.mubr.bf16.mxu0 %v3001_v46  ;;  %3720 = vmatmul.mubr.bf16.gmra.mrb[24].mxu1 %v3049_v34  ;;  %v2937_v53 = vsel %vm2910_vm3, %v8125_v7, %v2747_v19  ;;  %v2513_v17 = vpack.c.bf16 %v2486_v36, %v2485_v55  ;;  %v2670_v55 = vld [vmem:[#allocation2 + $0x32] sm:$0xff]  ;;  %v2671_v36 = vld [vmem:[#allocation2 + $0x3a] sm:$0xff] }
 0x2f6   : > { %3591 = vmatmul.mubr.bf16.gmra.mrb[24].mxu0 %v2937_v53 }
 0x2f7   : > { %v2885_v32 = vpop.permute.xlu0 %2884 }
 0x2f8   : > { %v2837_v41 = vpop.permute.xlu1 %2836  ;;  %v3117_v52 = vsel %vm2910_vm3, %v2609_v39, %v2885_v32  ;;  %v2491_v39 = vld [vmem:[#allocation2 + $0xc1] sm:$0xff] }
 0x2f9   : > { %3727 = vmatprep.mubr.bf16.mxu1 %v3117_v52  ;;  %v3053_v47 = vsel %vm2910_vm3, %v2512_v21, %v2837_v41  ;;  %v2306_v52 = vld [vmem:[#allocation2 + $0x108] sm:$0xff] }
 0x2fb   : > { %v2797_v40 = vpop.permute.xlu0 %2796 }
 0x2fc   : > { %v2749_v14 = vpop.permute.xlu1 %2748  ;;  %v3005_v60 = vsel %vm2910_vm3, %v8176_v12, %v2797_v40  ;;  %v2488_v12 = vld [vmem:[#allocation2 + $0x99] sm:$0xff] }
 0x2fd   : > { %3598 = vmatprep.mubr.bf16.mxu0 %v3005_v60  ;;  %3728 = vmatmul.mubr.bf16.gmra.mrb[28].mxu1 %v3053_v47  ;;  %v2941_v7 = vsel %vm2910_vm3, %v8139_v54, %v2749_v14  ;;  %v2514_v16 = vpack.c.bf16 %v2488_v12, %v2487_v61  ;;  %v2327_v14 = vpack.c.bf16 %v2307_v50, %v2306_v52 }
 0x2fe   : > { %3599 = vmatmul.mubr.bf16.gmra.mrb[28].mxu0 %v2941_v7  ;;  %v2494_v7 = vld [vmem:[#allocation2 + $0xe1] sm:$0xff] }
 0x2ff   : > { %v2887_v0 = vpop.permute.xlu0 %2886 }
 0x300   : > { %v2839_v22 = vpop.permute.xlu1 %2838  ;;  %v3121_v37 = vsel %vm2910_vm3, %v2610_v44, %v2887_v0 }
 0x301   : > { %3735 = vmatprep.mubr.bf16.mxu1 %v3121_v37  ;;  %v3057_v27 = vsel %vm2910_vm3, %v2513_v17, %v2839_v22  ;;  %v2702_v17 = vpack.c.bf16 %v2671_v36, %v2670_v55  ;;  %v2598_v55 = vld [vmem:[#allocation2 + $0x150] sm:$0xff]  ;;  %v2599_v36 = vld [vmem:[#allocation2 + $0x158] sm:$0xff] }
 0x303   : > { %v2799_v45 = vpop.permute.xlu0 %2798 }
 0x304   : > { %v2751_v30 = vpop.permute.xlu1 %2750  ;;  %v3009_v26 = vsel %vm2910_vm3, %v8183_v43, %v2799_v45  ;;  %v2673_v45 = vld [vmem:[#allocation2 + $0x52] sm:$0xff] }
 0x305   : > { %3606 = vmatprep.mubr.bf16.mxu0 %v3009_v26  ;;  %3736 = vmatmul.mubr.bf16.gmra.mrb[32].mxu1 %v3057_v27  ;;  %v2945_v54 = vsel %vm2910_vm3, %v8154_v35, %v2751_v30  ;;  %v2672_v27 = vld [vmem:[#allocation2 + $0x4a] sm:$0xff]  ;;  %v2674_v30 = vld [vmem:[#allocation2 + $0x62] sm:$0xff] }
 0x306   : > { %3607 = vmatmul.mubr.bf16.gmra.mrb[32].mxu0 %v2945_v54  ;;  %v2675_v26 = vld [vmem:[#allocation2 + $0x6a] sm:$0xff]  ;;  %v2703_v54 = vpack.c.bf16 %v2673_v45, %v2672_v27  ;;  %v2501_v27 = vld [vmem:[#allocation2 + $0x139] sm:$0xff]  ;;  %v2502_v45 = vld [vmem:[#allocation2 + $0x141] sm:$0xff] }
 0x307   : > { %v2889_v29 = vpop.permute.xlu0 %2888 }
 0x308   : > { %v2841_v5 = vpop.permute.xlu1 %2840  ;;  %v3125_v20 = vsel %vm2910_vm3, %v2611_v10, %v2889_v29  ;;  %v2704_v29 = vpack.c.bf16 %v2675_v26, %v2674_v30  ;;  %v2601_v30 = vld [vmem:[#allocation2 + $0x170] sm:$0xff]  ;;  %v2521_v26 = vpack.c.bf16 %v2502_v45, %v2501_v27 }
 0x309   : > { %3743 = vmatprep.mubr.bf16.mxu1 %v3125_v20  ;;  %v3061_v43 = vsel %vm2910_vm3, %v2514_v16, %v2841_v5  ;;  %v2594_v20 = vld [vmem:[#allocation2 + $0x120] sm:$0xff] }
 0x30b   : > { %v2801_v23 = vpop.permute.xlu0 %2800 }
 0x30c   : > { %v2753_v15 = vpop.permute.xlu1 %2752  ;;  %v3013_v35 = vsel %vm2910_vm3, %v8190_v24, %v2801_v23  ;;  %v2492_v24 = vld [vmem:[#allocation2 + $0xc9] sm:$0xff] }
 0x30d   : > { %3614 = vmatprep.mubr.bf16.mxu0 %v3013_v35  ;;  %3744 = vmatmul.mubr.bf16.gmra.mrb[36].mxu1 %v3061_v43  ;;  %v2949_v58 = vsel %vm2910_vm3, %v2325_v1, %v2753_v15  ;;  %v2516_v41 = vpack.c.bf16 %v2492_v24, %v2491_v39  ;;  %v2676_v43 = vld [vmem:[#allocation2 + $0x7a] sm:$0xff]  ;;  %v2677_v23 = vld [vmem:[#allocation2 + $0x82] sm:$0xff]  ;;  %v2678_v15 = vld [vmem:[#allocation2 + $0x92] sm:$0xff] }
 0x30e   : > { %3615 = vmatmul.mubr.bf16.gmra.mrb[36].mxu0 %v2949_v58  ;;  %v2679_v35 = vld [vmem:[#allocation2 + $0x9a] sm:$0xff]  ;;  %v2705_v58 = vpack.c.bf16 %v2677_v23, %v2676_v43  ;;  %v2681_v39 = vld [vmem:[#allocation2 + $0xb2] sm:$0xff]  ;;  %v2603_v43 = vld [vmem:[#allocation2 + $0x188] sm:$0xff] }
 0x30f   : > { %v2891_v34 = vpop.permute.xlu0 %2890 }
 0x310   : > { %v2843_v38 = vpop.permute.xlu1 %2842  ;;  %v3129_v48 = vsel %vm2910_vm3, %v2612_v59, %v2891_v34  ;;  %v2706_v34 = vpack.c.bf16 %v2679_v35, %v2678_v15 }
 0x311   : > { %3751 = vmatprep.mubr.bf16.mxu1 %v3129_v48  ;;  %v3065_v19 = vsel %vm2910_vm3, %v2515_v42, %v2843_v38  ;;  %v2596_v38 = vld [vmem:[#allocation2 + $0x138] sm:$0xff]  ;;  %v2597_v48 = vld [vmem:[#allocation2 + $0x140] sm:$0xff] }
 0x312   : > { %v2617_v24 = vpack.c.bf16 %v2597_v48, %v2596_v38 }
 0x313   : > { %v2803_v46 = vpop.permute.xlu0 %2802 }
 0x314   : > { %v2755_v53 = vpop.permute.xlu1 %2754  ;;  %v3017_v21 = vsel %vm2910_vm3, %v8195_v57, %v2803_v46  ;;  %v2493_v57 = vld [vmem:[#allocation2 + $0xd9] sm:$0xff]  ;;  %v2680_v46 = vld [vmem:[#allocation2 + $0xaa] sm:$0xff] }
 0x315   : > { %3622 = vmatprep.mubr.bf16.mxu0 %v3017_v21  ;;  %3752 = vmatmul.mubr.bf16.gmra.mrb[40].mxu1 %v3065_v19  ;;  %v2953_v32 = vsel %vm2910_vm3, %v2326_v8, %v2755_v53  ;;  %v2517_v31 = vpack.c.bf16 %v2494_v7, %v2493_v57  ;;  %v2682_v21 = vld [vmem:[#allocation2 + $0xc2] sm:$0xff]  ;;  %v2707_v52 = vpack.c.bf16 %v2681_v39, %v2680_v46 }
 0x316   : > { %3623 = vmatmul.mubr.bf16.gmra.mrb[40].mxu0 %v2953_v32  ;;  %v2683_v32 = vld [vmem:[#allocation2 + $0xca] sm:$0xff]  ;;  %v2685_v57 = vld [vmem:[#allocation2 + $0xe2] sm:$0xff]  ;;  %v2618_v7 = vpack.c.bf16 %v2599_v36, %v2598_v55 }
 0x317   : > { %v2893_v6 = vpop.permute.xlu0 %2892  ;;  %v2701_v39 = vld [vmem:[#allocation2 + $0x1a2] sm:$0xff] }
 0x318   : > { %v2845_v47 = vpop.permute.xlu1 %2844  ;;  %v3133_v40 = vsel %vm2910_vm3, %v2325_v1, %v2893_v6  ;;  %v2595_v1 = vld [vmem:[#allocation2 + $0x128] sm:$0xff] }
 0x319   : > { %3759 = vmatprep.mubr.bf16.mxu1 %v3133_v40  ;;  %v3069_v60 = vsel %vm2910_vm3, %v2516_v41, %v2845_v47  ;;  %v2616_v33 = vpack.c.bf16 %v2595_v1, %v2594_v20  ;;  %v2499_v6 = vld [vmem:[#allocation2 + $0x121] sm:$0xff]  ;;  %v2500_v47 = vld [vmem:[#allocation2 + $0x129] sm:$0xff]  ;;  %v2708_v40 = vpack.c.bf16 %v2683_v32, %v2682_v21  ;;  %v2503_v20 = vld [vmem:[#allocation2 + $0x151] sm:$0xff] }
 0x31a   : > { %v2504_v1 = vld [vmem:[#allocation2 + $0x159] sm:$0xff] }
 0x31b   : > { %v2805_v44 = vpop.permute.xlu0 %2804  ;;  %v2522_v23 = vpack.c.bf16 %v2504_v1, %v2503_v20 }
 0x31c   : > { %v2757_v0 = vpop.permute.xlu1 %2756  ;;  %v3021_v22 = vsel %vm2910_vm3, %v8200_v56, %v2805_v44  ;;  %v2684_v44 = vld [vmem:[#allocation2 + $0xda] sm:$0xff] }
 0x31d   : > { %3630 = vmatprep.mubr.bf16.mxu0 %v3021_v22  ;;  %3760 = vmatmul.mubr.bf16.gmra.mrb[44].mxu1 %v3069_v60  ;;  %v2957_v37 = vsel %vm2910_vm3, %v2327_v14, %v2757_v0  ;;  %v2686_v0 = vld [vmem:[#allocation2 + $0xf2] sm:$0xff]  ;;  %v2687_v22 = vld [vmem:[#allocation2 + $0xfa] sm:$0xff] }
 0x31e   : > { %3631 = vmatmul.mubr.bf16.gmra.mrb[44].mxu0 %v2957_v37 }
 0x31f   : > { %v2895_v4 = vpop.permute.xlu0 %2894  ;;  %6970 = vmatprep.mubr.msk.bf16.mxu0 %vm2910_vm3, %v2702_v17 }
 0x320   : > { %v2847_v61 = vpop.permute.xlu1 %2846  ;;  %v3137_v12 = vsel %vm2910_vm3, %v2326_v8, %v2895_v4  ;;  %v2519_v8 = vpack.c.bf16 %v2498_v63, %v2497_v25  ;;  %v2604_v25 = vld [vmem:[#allocation2 + $0x198] sm:$0xff]  ;;  %v2605_v63 = vld [vmem:[#allocation2 + $0x1a0] sm:$0xff] }
 0x321   : > { %3767 = vmatprep.mubr.bf16.mxu1 %v3137_v12  ;;  %v3073_v10 = vsel %vm2910_vm3, %v2517_v31, %v2847_v61  ;;  %v2709_v31 = vpack.c.bf16 %v2685_v57, %v2684_v44  ;;  %v2710_v61 = vpack.c.bf16 %v2687_v22, %v2686_v0  ;;  %v2600_v12 = vld [vmem:[#allocation2 + $0x168] sm:$0xff]  ;;  %v2621_v38 = vpack.c.bf16 %v2605_v63, %v2604_v25 }
 0x323   : > { %v2897_v16 = vpop.permute.xlu0 %2896 }
 0x324   : > { %v3141_v5 = vsel %vm2910_vm3, %v2327_v14, %v2897_v16  ;;  %v2849_v13 = vpop.permute.xlu1 %2848  ;;  %v2520_v14 = vpack.c.bf16 %v2500_v47, %v2499_v6 }
 0x325   : > { %3768 = vmatmul.mubr.bf16.gmra.mrb[48].mxu1 %v3073_v10  ;;  %v3077_v59 = vsel %vm2910_vm3, %v2518_v28, %v2849_v13  ;;  %v2712_v28 = vpack.c.bf16 %v2691_v62, %v2690_v49  ;;  %v2602_v13 = vld [vmem:[#allocation2 + $0x180] sm:$0xff] }
 0x326   : > { %6971 = vmatmul.mubr.msk.bf16.vlgmr.msra.gmra.mrb[48].mxu0 %vm2910_vm3, %v2703_v54  ;;  %3775 = vmatprep.mubr.bf16.mxu1 %v3141_v5  ;;  %v2619_v54 = vpack.c.bf16 %v2601_v30, %v2600_v12 }
 0x327   : > { %6974 = vmatprep.mubr.msk.bf16.mxu0 %vm2910_vm3, %v2704_v29  ;;  %v2899_v2 = vpop.permute.xlu0 %2898 }
 0x328   : > { %v3145_v42 = vsel %vm2910_vm3, %v2616_v33, %v2899_v2  ;;  %v2851_v19 = vpop.permute.xlu1 %2850  ;;  %v2620_v2 = vpack.c.bf16 %v2603_v43, %v2602_v13 }
 0x329   : > { %v3081_v41 = vsel %vm2910_vm3, %v2519_v8, %v2851_v19 }
 0x32b   : > { %v2901_v53 = vpop.permute.xlu0 %2900 }
 0x32c   : > { %v3149_v50 = vsel %vm2910_vm3, %v2617_v24, %v2901_v53  ;;  %v2853_v60 = vpop.permute.xlu1 %2852 }
 0x32d   : > { %3776 = vmatmul.mubr.bf16.gmra.mrb[52].mxu1 %v3077_v59  ;;  %v3085_v37 = vsel %vm2910_vm3, %v2520_v14, %v2853_v60 }
 0x32e   : > { %6975 = vmatmul.mubr.msk.bf16.gmra.mrb[52].mxu0 %vm2910_vm3, %v2705_v58  ;;  %3783 = vmatprep.mubr.bf16.mxu1 %v3145_v42  ;;  %v2505_v58 = vld [vmem:[#allocation2 + $0x169] sm:$0xff]  ;;  %v2506_v42 = vld [vmem:[#allocation2 + $0x171] sm:$0xff] }
 0x32f   : > { %6978 = vmatprep.mubr.msk.bf16.mxu0 %vm2910_vm3, %v2706_v34  ;;  %v2903_v17 = vpop.permute.xlu0 %2902 }
 0x330   : > { %v3153_v4 = vsel %vm2910_vm3, %v2618_v7, %v2903_v17  ;;  %v2855_v10 = vpop.permute.xlu1 %2854 }
 0x331   : > { %v3089_v29 = vsel %vm2910_vm3, %v2521_v26, %v2855_v10 }
 0x333   : > { %v2905_v16 = vpop.permute.xlu0 %2904 }
 0x334   : > { %v3157_v5 = vsel %vm2910_vm3, %v2619_v54, %v2905_v16  ;;  %v2857_v33 = vpop.permute.xlu1 %2856 }
 0x335   : > { %3784 = vmatmul.mubr.bf16.gmra.mrb[56].mxu1 %v3081_v41  ;;  %v3093_v35 = vsel %vm2910_vm3, %v2522_v23, %v2857_v33 }
 0x336   : > { %6979 = vmatmul.mubr.msk.bf16.gmra.mrb[56].mxu0 %vm2910_vm3, %v2707_v52  ;;  %3791 = vmatprep.mubr.bf16.mxu1 %v3149_v50 }
 0x337   : > { %6982 = vmatprep.mubr.msk.bf16.mxu0 %vm2910_vm3, %v2708_v40  ;;  %v2907_v15 = vpop.permute.xlu0 %2906 }
 0x338   : > { %v3161_v59 = vsel %vm2910_vm3, %v2620_v2, %v2907_v15 }
 0x33a   : > { %v2859_v34 = vpop.permute.xlu1 %2858 }
 0x33b   : > { %v2909_v48 = vpop.permute.xlu0 %2908 }
 0x33c   : > { %v3165_v19 = vsel %vm2910_vm3, %v2621_v38, %v2909_v48 }
 0x33d   : > { %3792 = vmatmul.mubr.bf16.gmra.mrb[60].mxu1 %v3085_v37 }
 0x33e   : > { %6983 = vmatmul.mubr.msk.bf16.gmra.mrb[60].mxu0 %vm2910_vm3, %v2709_v31  ;;  %3799 = vmatprep.mubr.bf16.mxu1 %v3153_v4  ;;  %v2861_v46 = vpop.permute.xlu1 %2860 }
 0x33f   : > { %6986 = vmatprep.mubr.msk.bf16.mxu0 %vm2910_vm3, %v2710_v61 }
 0x345   : > { %3800 = vmatmul.mubr.bf16.gmra.mrb[64].mxu1 %v3089_v29 }
 0x346   : > { %6987 = vmatmul.mubr.msk.bf16.gmra.mrb[64].mxu0 %vm2910_vm3, %v8200_v56  ;;  %3807 = vmatprep.mubr.bf16.mxu1 %v3157_v5  ;;  %v2523_v56 = vpack.c.bf16 %v2506_v42, %v2505_v58  ;;  %v8387_v58 = vld [vmem:[%s7362_s8] ss:$0 sm:$0xff] }
 0x347   : > { %6990 = vmatprep.mubr.msk.bf16.mxu0 %vm2910_vm3, %v2712_v28 }
 0x348   : > { %v3097_v8 = vsel %vm2910_vm3, %v2523_v56, %v2859_v34 }
 0x34d   : > { %3808 = vmatmul.mubr.bf16.gmra.mrb[68].mxu1 %v3093_v35 }
 0x34e   : > { %6991 = vmatmul.mubr.msk.bf16.gmra.mrb[68].mxu0 %vm2910_vm3, %v8209_v11  ;;  %3815 = vmatprep.mubr.bf16.mxu1 %v3161_v59  ;;  %v2700_v11 = vld [vmem:[#allocation2 + $0x19a] sm:$0xff] }
 0x34f   : > { %6994 = vmatprep.mubr.msk.bf16.mxu0 %vm2910_vm3, %v8216_v3  ;;  %v3101_v3 = vsel %vm2910_vm3, %v8221_v51, %v2861_v46  ;;  %v2717_v24 = vpack.c.bf16 %v2701_v39, %v2700_v11 }
 0x355   : > { %3816 = vmatmul.mubr.bf16.gmra.mrb[72].mxu1 %v3097_v8 }
 0x356   : > { %6995 = vmatmul.mubr.msk.bf16.gmra.mrb[72].mxu0 %vm2910_vm3, %v8233_v18  ;;  %3823 = vmatprep.mubr.bf16.mxu1 %v3165_v19 }
 0x357   : > { %6998 = vmatprep.mubr.msk.bf16.mxu0 %vm2910_vm3, %v8241_v9 }
 0x35d   : > { %3824 = vmatmul.mubr.bf16.gmra.mrb[76].mxu1 %v3101_v3 }
 0x35e   : > { %6999 = vmatmul.mubr.msk.bf16.gmra.mrb[76].mxu0 %vm2910_vm3, %v2717_v24 }
 0x398   : > { %v6522_v53 = vpop.f32.mrb[0].mxu1 }
 0x399   : > { %v6450_v21 = vpop.f32.mrb[0].mxu0  ;;  %v6523_v32 = vpop.f32.mrb[1].mxu1 }
 0x39a   : > { %v8370_v41 = vadd.f32 %v6523_v32, %v6522_v53  ;;  %v6451_v18 = vpop.f32.mrb[1].mxu0  ;;  %v6525_v52 = vpop.f32.mrb[2].mxu1 }
 0x39b   : > { %v6452_v50 = vadd.f32 %v6451_v18, %v6450_v21  ;;  %v6453_v6 = vpop.f32.mrb[2].mxu0  ;;  %v6526_v47 = vpop.f32.mrb[3].mxu1 }
 0x39c   : > { %v8372_v9 = vadd.f32 %v6526_v47, %v6525_v52  ;;  %v6454_v40 = vpop.f32.mrb[3].mxu0 }
 0x39d   : > { %v6455_v55 = vadd.f32 %v6454_v40, %v6453_v6  ;;  %v3545_v63 = vadd.f32 %v6452_v50, %v8387_v58 }
 0x39f   : > { %v3548_v46 = vadd.f32 %v6455_v55, %v8387_v58 }
 0x3a0   : > { %v6528_v36 = vpop.f32.mrb[4].mxu1 }
 0x3a1   : > { %v6456_v51 = vpop.f32.mrb[4].mxu0  ;;  %v6529_v14 = vpop.f32.mrb[5].mxu1 }
 0x3a2   : > { %v8374_v60 = vadd.f32 %v6529_v14, %v6528_v36  ;;  %v6457_v44 = vpop.f32.mrb[5].mxu0  ;;  %v6531_v57 = vpop.f32.mrb[6].mxu1 }
 0x3a3   : > { %v6458_v7 = vadd.f32 %v6457_v44, %v6456_v51  ;;  %v6459_v17 = vpop.f32.mrb[6].mxu0  ;;  %v6532_v0 = vpop.f32.mrb[7].mxu1 }
 0x3a4   : > { %v8376_v22 = vadd.f32 %v6532_v0, %v6531_v57  ;;  %v6460_v37 = vpop.f32.mrb[7].mxu0 }
 0x3a5   : > { %v6461_v31 = vadd.f32 %v6460_v37, %v6459_v17  ;;  %v3553_v52 = vadd.f32 %v6458_v7, %v8387_v58 }
 0x3a7   : > { %v3556_v55 = vadd.f32 %v6461_v31, %v8387_v58 }
 0x3a8   : > { %v6534_v4 = vpop.f32.mrb[8].mxu1 }
 0x3a9   : > { %v6462_v27 = vpop.f32.mrb[8].mxu0  ;;  %v6535_v45 = vpop.f32.mrb[9].mxu1 }
 0x3aa   : > { %v8378_v61 = vadd.f32 %v6535_v45, %v6534_v4  ;;  %v6463_v12 = vpop.f32.mrb[9].mxu0  ;;  %v6537_v30 = vpop.f32.mrb[10].mxu1 }
 0x3ab   : > { %v6464_v26 = vadd.f32 %v6463_v12, %v6462_v27  ;;  %v6465_v10 = vpop.f32.mrb[10].mxu0  ;;  %v6538_v54 = vpop.f32.mrb[11].mxu1 }
 0x3ac   : > { %v8380_v16 = vadd.f32 %v6538_v54, %v6537_v30  ;;  %v6466_v49 = vpop.f32.mrb[11].mxu0 }
 0x3ad   : > { %v6467_v62 = vadd.f32 %v6466_v49, %v6465_v10  ;;  %v3561_v7 = vadd.f32 %v6464_v26, %v8387_v58 }
 0x3af   : > { %v3564_v31 = vadd.f32 %v6467_v62, %v8387_v58 }
 0x3b0   : > { %v6540_v29 = vpop.f32.mrb[12].mxu1 }
 0x3b1   : > { %v6468_v5 = vpop.f32.mrb[12].mxu0  ;;  %v6541_v20 = vpop.f32.mrb[13].mxu1 }
 0x3b2   : > { %v8382_v1 = vadd.f32 %v6541_v20, %v6540_v29  ;;  %v6469_v28 = vpop.f32.mrb[13].mxu0  ;;  %v6543_v13 = vpop.f32.mrb[14].mxu1 }
 0x3b3   : > { %v6470_v43 = vadd.f32 %v6469_v28, %v6468_v5  ;;  %v6471_v23 = vpop.f32.mrb[14].mxu0  ;;  %v6544_v33 = vpop.f32.mrb[15].mxu1 }
 0x3b4   : > { %v8384_v2 = vadd.f32 %v6544_v33, %v6543_v13  ;;  %v6472_v15 = vpop.f32.mrb[15].mxu0 }
 0x3b5   : > { %v6473_v35 = vadd.f32 %v6472_v15, %v6471_v23  ;;  %v3569_v26 = vadd.f32 %v6470_v43, %v8387_v58 }
 0x3b7   : > { %v3572_v62 = vadd.f32 %v6473_v35, %v8387_v58 }
 0x3b8   : > { %v6562_v59 = vpop.f32.mrb[16].mxu1 }
 0x3b9   : > { %v6474_v42 = vpop.f32.mrb[16].mxu0  ;;  %v6563_v25 = vpop.f32.mrb[17].mxu1 }
 0x3ba   : > { %v6564_v56 = vadd.f32 %v6563_v25, %v6562_v59  ;;  %v6475_v34 = vpop.f32.mrb[17].mxu0  ;;  %v6565_v38 = vpop.f32.mrb[18].mxu1 }
 0x3bb   : > { %v6476_v48 = vadd.f32 %v6475_v34, %v6474_v42  ;;  %v6477_v8 = vpop.f32.mrb[18].mxu0  ;;  %v6566_v19 = vpop.f32.mrb[19].mxu1 }
 0x3bc   : > { %v6567_v11 = vadd.f32 %v6566_v19, %v6565_v38  ;;  %v6478_v39 = vpop.f32.mrb[19].mxu0  ;;  %v8391_v3 = vadd.f32 %v6564_v56, %v3545_v63 }
 0x3bd   : > { %v6479_v24 = vadd.f32 %v6478_v39, %v6477_v8  ;;  %v3577_v43 = vadd.f32 %v6476_v48, %v8387_v58 }
 0x3be   : > { %v8393_v53 = vadd.f32 %v6567_v11, %v3548_v46 }
 0x3bf   : > { %v3580_v35 = vadd.f32 %v6479_v24, %v8387_v58 }
 0x3c0   : > { %v6568_v21 = vpop.f32.mrb[20].mxu1 }
 0x3c1   : > { %v6480_v32 = vpop.f32.mrb[20].mxu0  ;;  %v6569_v18 = vpop.f32.mrb[21].mxu1 }
 0x3c2   : > { %v6570_v50 = vadd.f32 %v6569_v18, %v6568_v21  ;;  %v6481_v6 = vpop.f32.mrb[21].mxu0  ;;  %v6571_v47 = vpop.f32.mrb[22].mxu1 }
 0x3c3   : > { %v6482_v40 = vadd.f32 %v6481_v6, %v6480_v32  ;;  %v6483_v36 = vpop.f32.mrb[22].mxu0  ;;  %v6572_v51 = vpop.f32.mrb[23].mxu1 }
 0x3c4   : > { %v6573_v14 = vadd.f32 %v6572_v51, %v6571_v47  ;;  %v6484_v44 = vpop.f32.mrb[23].mxu0  ;;  %v8397_v57 = vadd.f32 %v6570_v50, %v3553_v52 }
 0x3c5   : > { %v6485_v17 = vadd.f32 %v6484_v44, %v6483_v36  ;;  %v3585_v48 = vadd.f32 %v6482_v40, %v8387_v58 }
 0x3c6   : > { %v8399_v0 = vadd.f32 %v6573_v14, %v3556_v55 }
 0x3c7   : > { %v3588_v24 = vadd.f32 %v6485_v17, %v8387_v58 }
 0x3c8   : > { %v6574_v37 = vpop.f32.mrb[24].mxu1 }
 0x3c9   : > { %v6486_v4 = vpop.f32.mrb[24].mxu0  ;;  %v6575_v27 = vpop.f32.mrb[25].mxu1 }
 0x3ca   : > { %v6576_v45 = vadd.f32 %v6575_v27, %v6574_v37  ;;  %v6487_v12 = vpop.f32.mrb[25].mxu0  ;;  %v6577_v30 = vpop.f32.mrb[26].mxu1 }
 0x3cb   : > { %v6488_v10 = vadd.f32 %v6487_v12, %v6486_v4  ;;  %v6489_v54 = vpop.f32.mrb[26].mxu0  ;;  %v6578_v49 = vpop.f32.mrb[27].mxu1 }
 0x3cc   : > { %v6579_v29 = vadd.f32 %v6578_v49, %v6577_v30  ;;  %v6490_v5 = vpop.f32.mrb[27].mxu0  ;;  %v8403_v20 = vadd.f32 %v6576_v45, %v3561_v7 }
 0x3cd   : > { %v6491_v28 = vadd.f32 %v6490_v5, %v6489_v54 }
 0x3ce   : > { %v8405_v13 = vadd.f32 %v6579_v29, %v3564_v31 }
 0x3d0   : > { %v6580_v23 = vpop.f32.mrb[28].mxu1 }
 0x3d1   : > { %v6492_v33 = vpop.f32.mrb[28].mxu0  ;;  %v6581_v15 = vpop.f32.mrb[29].mxu1 }
 0x3d2   : > { %v6582_v59 = vadd.f32 %v6581_v15, %v6580_v23  ;;  %v6493_v42 = vpop.f32.mrb[29].mxu0  ;;  %v6583_v25 = vpop.f32.mrb[30].mxu1 }
 0x3d3   : > { %v6494_v63 = vadd.f32 %v6493_v42, %v6492_v33  ;;  %v6495_v56 = vpop.f32.mrb[30].mxu0  ;;  %v6584_v34 = vpop.f32.mrb[31].mxu1  ;;  %v3593_v42 = vadd.f32 %v6488_v10, %v8387_v58 }
 0x3d4   : > { %v6585_v38 = vadd.f32 %v6584_v34, %v6583_v25  ;;  %v6496_v8 = vpop.f32.mrb[31].mxu0  ;;  %v8409_v19 = vadd.f32 %v6582_v59, %v3569_v26 }
 0x3d5   : > { %v6497_v46 = vadd.f32 %v6496_v8, %v6495_v56  ;;  %v3596_v8 = vadd.f32 %v6491_v28, %v8387_v58 }
 0x3d6   : > { %v8411_v11 = vadd.f32 %v6585_v38, %v3572_v62 }
 0x3d8   : > { %v6586_v39 = vpop.f32.mrb[32].mxu1 }
 0x3d9   : > { %v6498_v21 = vpop.f32.mrb[32].mxu0  ;;  %v6587_v32 = vpop.f32.mrb[33].mxu1 }
 0x3da   : > { %v6588_v18 = vadd.f32 %v6587_v32, %v6586_v39  ;;  %v6499_v52 = vpop.f32.mrb[33].mxu0  ;;  %v6589_v50 = vpop.f32.mrb[34].mxu1 }
 0x3db   : > { %v6500_v6 = vadd.f32 %v6499_v52, %v6498_v21  ;;  %v6501_v47 = vpop.f32.mrb[34].mxu0  ;;  %v6590_v36 = vpop.f32.mrb[35].mxu1 }
 0x3dc   : > { %v6591_v51 = vadd.f32 %v6590_v36, %v6589_v50  ;;  %v6502_v55 = vpop.f32.mrb[35].mxu0  ;;  %v8415_v14 = vadd.f32 %v6588_v18, %v3577_v43 }
 0x3dd   : > { %v6503_v44 = vadd.f32 %v6502_v55, %v6501_v47  ;;  %v3601_v47 = vadd.f32 %v6494_v63, %v8387_v58 }
 0x3de   : > { %v8417_v37 = vadd.f32 %v6591_v51, %v3580_v35 }
 0x3e0   : > { %v6592_v4 = vpop.f32.mrb[36].mxu1 }
 0x3e1   : > { %v6504_v27 = vpop.f32.mrb[36].mxu0  ;;  %v6593_v7 = vpop.f32.mrb[37].mxu1 }
 0x3e2   : > { %v6594_v45 = vadd.f32 %v6593_v7, %v6592_v4  ;;  %v6505_v12 = vpop.f32.mrb[37].mxu0  ;;  %v6595_v30 = vpop.f32.mrb[38].mxu1 }
 0x3e3   : > { %v8420_v54 = vadd.f32 %v6505_v12, %v6504_v27  ;;  %v6507_v49 = vpop.f32.mrb[38].mxu0  ;;  %v6596_v31 = vpop.f32.mrb[39].mxu1  ;;  %v3604_v27 = vadd.f32 %v6497_v46, %v8387_v58  ;;  %v3612_v46 = vadd.f32 %v6503_v44, %v8387_v58 }
 0x3e4   : > { %v6597_v29 = vadd.f32 %v6596_v31, %v6595_v30  ;;  %v6508_v5 = vpop.f32.mrb[39].mxu0  ;;  %v8423_v23 = vadd.f32 %v6594_v45, %v3585_v48 }
 0x3e5   : > { %v8425_v33 = vadd.f32 %v6508_v5, %v6507_v49 }
 0x3e6   : > { %v8427_v15 = vadd.f32 %v6597_v29, %v3588_v24  ;;  %v3609_v24 = vadd.f32 %v6500_v6, %v8387_v58 }
 0x3e8   : > { %v6598_v26 = vpop.f32.mrb[40].mxu1 }
 0x3e9   : > { %v6510_v59 = vpop.f32.mrb[40].mxu0  ;;  %v6599_v40 = vpop.f32.mrb[41].mxu1 }
 0x3ea   : > { %v6600_v25 = vadd.f32 %v6599_v40, %v6598_v26  ;;  %v6511_v56 = vpop.f32.mrb[41].mxu0  ;;  %v6601_v34 = vpop.f32.mrb[42].mxu1 }
 0x3eb   : > { %v8430_v62 = vadd.f32 %v6511_v56, %v6510_v59  ;;  %v6513_v38 = vpop.f32.mrb[42].mxu0  ;;  %v6602_v17 = vpop.f32.mrb[43].mxu1 }
 0x3ec   : > { %v6603_v39 = vadd.f32 %v6602_v17, %v6601_v34  ;;  %v6514_v21 = vpop.f32.mrb[43].mxu0  ;;  %v8433_v32 = vadd.f32 %v6600_v25, %v3593_v42 }
 0x3ed   : > { %v8435_v43 = vadd.f32 %v6514_v21, %v6513_v38 }
 0x3ee   : > { %v8437_v18 = vadd.f32 %v6603_v39, %v3596_v8 }
 0x3f0   : > { %v6604_v52 = vpop.f32.mrb[44].mxu1 }
 0x3f1   : > { %v6516_v50 = vpop.f32.mrb[44].mxu0  ;;  %v6605_v10 = vpop.f32.mrb[45].mxu1 }
 0x3f2   : > { %v6606_v36 = vadd.f32 %v6605_v10, %v6604_v52  ;;  %v6517_v35 = vpop.f32.mrb[45].mxu0  ;;  %v6607_v51 = vpop.f32.mrb[46].mxu1 }
 0x3f3   : > { %v8440_v55 = vadd.f32 %v6517_v35, %v6516_v50  ;;  %v6519_v4 = vpop.f32.mrb[46].mxu0  ;;  %v6608_v28 = vpop.f32.mrb[47].mxu1  ;;  %v3617_v50 = vadd.f32 %v8420_v54, %v8387_v58  ;;  %v3620_v35 = vadd.f32 %v8425_v33, %v8387_v58 }
 0x3f4   : > { %v6609_v7 = vadd.f32 %v6608_v28, %v6607_v51  ;;  %v6520_v48 = vpop.f32.mrb[47].mxu0  ;;  %v8443_v45 = vadd.f32 %v6606_v36, %v3601_v47 }
 0x3f5   : > { %v8445_v12 = vadd.f32 %v6520_v48, %v6519_v4 }
 0x3f6   : > { %v8447_v30 = vadd.f32 %v6609_v7, %v3604_v27 }
 0x3f8   : > { %v6610_v49 = vpop.f32.mrb[48].mxu1 }
 0x3f9   : > { %v6611_v31 = vpop.f32.mrb[49].mxu1  ;;  %v6972_v63 = vpop.f32.mrb[48].mxu0 }
 0x3fa   : > { %v6612_v29 = vadd.f32 %v6611_v31, %v6610_v49  ;;  %v3875_v5 = vadd.f32 %v6972_v63, %v8397_v57  ;;  %v6613_v26 = vpop.f32.mrb[50].mxu1  ;;  %v3866_v59 = vpop.f32.mrb[49].mxu0 }
 0x3fb   : > { %v3867_v40 = vadd.f32 %v3866_v59, %v8391_v3  ;;  %v6614_v42 = vpop.f32.mrb[51].mxu1  ;;  %v6973_v25 = vpop.f32.mrb[50].mxu0 }
 0x3fc   : > { %v3995_v56 = vmax.f32 %v3875_v5, 0.0  ;;  %v6615_v34 = vadd.f32 %v6614_v42, %v6613_v26  ;;  %v3878_v38 = vadd.f32 %v6973_v25, %v8399_v0  ;;  %v3869_v17 = vpop.f32.mrb[51].mxu0  ;;  %v8454_v8 = vadd.f32 %v6612_v29, %v3609_v24 }
 0x3fd   : > { %v3993_v39 = vmax.f32 %v3867_v40, 0.0  ;;  %v3870_v6 = vadd.f32 %v3869_v17, %v8393_v53  ;;  %v3625_v5 = vadd.f32 %v8430_v62, %v8387_v58  ;;  %v3628_v40 = vadd.f32 %v8435_v43, %v8387_v58 }
 0x3fe   : > { %4028 = vst.msk [vmem:[#allocation3 + $0x31] sm:$0xff] %vm2910_vm3, %v3995_v56  ;;  %v3996_v57 = vmax.f32 %v3878_v38, 0.0  ;;  %v8458_v21 = vadd.f32 %v6615_v34, %v3612_v46 }
 0x3ff   : > { %4026 = vst.msk [vmem:[#allocation3 + $0x19] sm:$0xff] %vm2910_vm3, %v3993_v39  ;;  %v3994_v3 = vmax.f32 %v3870_v6, 0.0 }
 0x400   : > { %4029 = vst.msk [vmem:[#allocation3 + $0x39] sm:$0xff] %vm2910_vm3, %v3996_v57  ;;  %v6616_v44 = vpop.f32.mrb[52].mxu1 }
 0x401   : > { %4027 = vst.msk [vmem:[#allocation3 + $0x21] sm:$0xff] %vm2910_vm3, %v3994_v3  ;;  %v6617_v0 = vpop.f32.mrb[53].mxu1  ;;  %v6976_v52 = vpop.f32.mrb[52].mxu0 }
 0x402   : > { %v6618_v10 = vadd.f32 %v6617_v0, %v6616_v44  ;;  %v3891_v53 = vadd.f32 %v6976_v52, %v8409_v19  ;;  %v6619_v47 = vpop.f32.mrb[54].mxu1  ;;  %v3882_v36 = vpop.f32.mrb[53].mxu0  ;;  %v3633_v0 = vadd.f32 %v8440_v55, %v8387_v58 }
 0x403   : > { %v3883_v51 = vadd.f32 %v3882_v36, %v8403_v20  ;;  %v6620_v4 = vpop.f32.mrb[55].mxu1  ;;  %v6977_v28 = vpop.f32.mrb[54].mxu0 }
 0x404   : > { %v3999_v27 = vmax.f32 %v3891_v53, 0.0  ;;  %v6621_v7 = vadd.f32 %v6620_v4, %v6619_v47  ;;  %v3894_v48 = vadd.f32 %v6977_v28, %v8411_v11  ;;  %v3885_v49 = vpop.f32.mrb[55].mxu0  ;;  %v8470_v31 = vadd.f32 %v6618_v10, %v3617_v50 }
 0x405   : > { %v3997_v54 = vmax.f32 %v3883_v51, 0.0  ;;  %v3886_v63 = vadd.f32 %v3885_v49, %v8405_v13  ;;  %v3636_v53 = vadd.f32 %v8445_v12, %v8387_v58 }
 0x406   : > { %4032 = vst.msk [vmem:[#allocation3 + $0x61] sm:$0xff] %vm2910_vm3, %v3999_v27  ;;  %v4000_v19 = vmax.f32 %v3894_v48, 0.0  ;;  %v8474_v24 = vadd.f32 %v6621_v7, %v3620_v35 }
 0x407   : > { %4030 = vst.msk [vmem:[#allocation3 + $0x49] sm:$0xff] %vm2910_vm3, %v3997_v54  ;;  %v3998_v20 = vmax.f32 %v3886_v63, 0.0 }
 0x408   : > { %4033 = vst.msk [vmem:[#allocation3 + $0x69] sm:$0xff] %vm2910_vm3, %v4000_v19  ;;  %v6622_v33 = vpop.f32.mrb[56].mxu1 }
 0x409   : > { %4031 = vst.msk [vmem:[#allocation3 + $0x51] sm:$0xff] %vm2910_vm3, %v3998_v20  ;;  %v6623_v11 = vpop.f32.mrb[57].mxu1  ;;  %v6980_v29 = vpop.f32.mrb[56].mxu0 }
 0x40a   : > { %v6624_v26 = vadd.f32 %v6623_v11, %v6622_v33  ;;  %v3907_v13 = vadd.f32 %v6980_v29, %v8423_v23  ;;  %v6625_v59 = vpop.f32.mrb[58].mxu1  ;;  %v3898_v46 = vpop.f32.mrb[57].mxu0  ;;  %v3644_v11 = vadd.f32 %v8372_v9, %v8387_v58 }
 0x40b   : > { %v3899_v42 = vadd.f32 %v3898_v46, %v8415_v14  ;;  %v6626_v25 = vpop.f32.mrb[59].mxu1  ;;  %v6981_v56 = vpop.f32.mrb[58].mxu0 }
 0x40c   : > { %v4003_v34 = vmax.f32 %v3907_v13, 0.0  ;;  %v6627_v38 = vadd.f32 %v6626_v25, %v6625_v59  ;;  %v3910_v17 = vadd.f32 %v6981_v56, %v8427_v15  ;;  %v3901_v39 = vpop.f32.mrb[59].mxu0  ;;  %v8486_v6 = vadd.f32 %v6624_v26, %v3625_v5 }
 0x40d   : > { %v4001_v62 = vmax.f32 %v3899_v42, 0.0  ;;  %v3902_v57 = vadd.f32 %v3901_v39, %v8417_v37 }
 0x40e   : > { %4036 = vst.msk [vmem:[#allocation3 + $0x91] sm:$0xff] %vm2910_vm3, %v4003_v34  ;;  %v4004_v23 = vmax.f32 %v3910_v17, 0.0  ;;  %v8490_v3 = vadd.f32 %v6627_v38, %v3628_v40 }
 0x40f   : > { %4034 = vst.msk [vmem:[#allocation3 + $0x79] sm:$0xff] %vm2910_vm3, %v4001_v62  ;;  %v4002_v14 = vmax.f32 %v3902_v57, 0.0  ;;  %v3652_v57 = vadd.f32 %v8376_v22, %v8387_v58 }
 0x410   : > { %4037 = vst.msk [vmem:[#allocation3 + $0x99] sm:$0xff] %vm2910_vm3, %v4004_v23  ;;  %v6628_v43 = vpop.f32.mrb[60].mxu1 }
 0x411   : > { %4035 = vst.msk [vmem:[#allocation3 + $0x81] sm:$0xff] %vm2910_vm3, %v4002_v14  ;;  %v6629_v15 = vpop.f32.mrb[61].mxu1  ;;  %v6984_v44 = vpop.f32.mrb[60].mxu0 }
 0x412   : > { %v6630_v52 = vadd.f32 %v6629_v15, %v6628_v43  ;;  %v3923_v37 = vadd.f32 %v6984_v44, %v8443_v45  ;;  %v6631_v50 = vpop.f32.mrb[62].mxu1  ;;  %v3914_v10 = vpop.f32.mrb[61].mxu0 }
 0x413   : > { %v3915_v47 = vadd.f32 %v3914_v10, %v8433_v32  ;;  %v6632_v36 = vpop.f32.mrb[63].mxu1  ;;  %v6985_v35 = vpop.f32.mrb[62].mxu0 }
 0x414   : > { %v4007_v51 = vmax.f32 %v3923_v37, 0.0  ;;  %v6633_v4 = vadd.f32 %v6632_v36, %v6631_v50  ;;  %v3926_v28 = vadd.f32 %v6985_v35, %v8447_v30  ;;  %v3917_v27 = vpop.f32.mrb[63].mxu0  ;;  %v3794_v7 = vadd.f32 %v6630_v52, %v3633_v0 }
 0x415   : > { %v4005_v48 = vmax.f32 %v3915_v47, 0.0  ;;  %v3918_v55 = vadd.f32 %v3917_v27, %v8437_v18  ;;  %v3641_v30 = vadd.f32 %v8370_v41, %v8387_v58  ;;  %v3657_v35 = vadd.f32 %v8378_v61, %v8387_v58 }
 0x416   : > { %4040 = vst.msk [vmem:[#allocation3 + $0xc1] sm:$0xff] %vm2910_vm3, %v4007_v51  ;;  %v4008_v45 = vmax.f32 %v3926_v28, 0.0  ;;  %v3797_v49 = vadd.f32 %v6633_v4, %v3636_v53  ;;  %v3660_v27 = vadd.f32 %v8380_v16, %v8387_v58 }
 0x417   : > { %4038 = vst.msk [vmem:[#allocation3 + $0xa9] sm:$0xff] %vm2910_vm3, %v4005_v48  ;;  %v4006_v12 = vmax.f32 %v3918_v55, 0.0 }
 0x418   : > { %4041 = vst.msk [vmem:[#allocation3 + $0xc9] sm:$0xff] %vm2910_vm3, %v4008_v45  ;;  %v6634_v32 = vpop.f32.mrb[64].mxu1 }
 0x419   : > { %4039 = vst.msk [vmem:[#allocation3 + $0xb1] sm:$0xff] %vm2910_vm3, %v4006_v12  ;;  %v6635_v54 = vpop.f32.mrb[65].mxu1  ;;  %v6988_v63 = vpop.f32.mrb[64].mxu0 }
 0x41a   : > { %v6636_v19 = vadd.f32 %v6635_v54, %v6634_v32  ;;  %v3939_v18 = vadd.f32 %v6988_v63, %v8470_v31  ;;  %v6637_v20 = vpop.f32.mrb[66].mxu1  ;;  %v3930_v33 = vpop.f32.mrb[65].mxu0 }
 0x41b   : > { %v3931_v29 = vadd.f32 %v3930_v33, %v8454_v8  ;;  %v6638_v5 = vpop.f32.mrb[67].mxu1  ;;  %v6989_v26 = vpop.f32.mrb[66].mxu0 }
 0x41c   : > { %v4011_v13 = vmax.f32 %v3939_v18, 0.0  ;;  %v6639_v59 = vadd.f32 %v6638_v5, %v6637_v20  ;;  %v3942_v46 = vadd.f32 %v6989_v26, %v8474_v24  ;;  %v3933_v40 = vpop.f32.mrb[67].mxu0  ;;  %v3802_v42 = vadd.f32 %v6636_v19, %v3641_v30 }
 0x41d   : > { %v4009_v25 = vmax.f32 %v3931_v29, 0.0  ;;  %v3934_v41 = vadd.f32 %v3933_v40, %v8458_v21  ;;  %v3649_v24 = vadd.f32 %v8374_v60, %v8387_v58  ;;  %v3668_v40 = vadd.f32 %v8384_v2, %v8387_v58 }
 0x41e   : > { %4044 = vst.msk [vmem:[#allocation3 + $0xf1] sm:$0xff] %vm2910_vm3, %v4011_v13  ;;  %v4012_v31 = vmax.f32 %v3942_v46, 0.0  ;;  %v3805_v56 = vadd.f32 %v6639_v59, %v3644_v11  ;;  %v3665_v11 = vadd.f32 %v8382_v1, %v8387_v58 }
 0x41f   : > { %4042 = vst.msk [vmem:[#allocation3 + $0xd9] sm:$0xff] %vm2910_vm3, %v4009_v25  ;;  %v4010_v9 = vmax.f32 %v3934_v41, 0.0 }
 0x420   : > { %4045 = vst.msk [vmem:[#allocation3 + $0xf9] sm:$0xff] %vm2910_vm3, %v4012_v31  ;;  %v6640_v8 = vpop.f32.mrb[68].mxu1 }
 0x421   : > { %4043 = vst.msk [vmem:[#allocation3 + $0xe1] sm:$0xff] %vm2910_vm3, %v4010_v9  ;;  %v6641_v34 = vpop.f32.mrb[69].mxu1  ;;  %v6992_v38 = vpop.f32.mrb[68].mxu0 }
 0x422   : > { %v6642_v17 = vadd.f32 %v6641_v34, %v6640_v8  ;;  %v3955_v39 = vadd.f32 %v6992_v38, %v3794_v7  ;;  %v6643_v21 = vpop.f32.mrb[70].mxu1  ;;  %v3946_v62 = vpop.f32.mrb[69].mxu0 }
 0x423   : > { %v3947_v23 = vadd.f32 %v3946_v62, %v8486_v6  ;;  %v6644_v14 = vpop.f32.mrb[71].mxu1  ;;  %v6993_v43 = vpop.f32.mrb[70].mxu0 }
 0x424   : > { %v4015_v15 = vmax.f32 %v3955_v39, 0.0  ;;  %v6645_v44 = vadd.f32 %v6644_v14, %v6643_v21  ;;  %v3958_v0 = vadd.f32 %v6993_v43, %v3797_v49  ;;  %v3949_v52 = vpop.f32.mrb[71].mxu0  ;;  %v3810_v37 = vadd.f32 %v6642_v17, %v3649_v24 }
 0x425   : > { %v4013_v50 = vmax.f32 %v3947_v23, 0.0  ;;  %v3950_v10 = vadd.f32 %v3949_v52, %v8490_v3 }
 0x426   : > { %4048 = vst.msk [vmem:[#allocation3 + $0x121] sm:$0xff] %vm2910_vm3, %v4015_v15  ;;  %v4016_v60 = vmax.f32 %v3958_v0, 0.0  ;;  %v3813_v53 = vadd.f32 %v6645_v44, %v3652_v57 }
 0x427   : > { %4046 = vst.msk [vmem:[#allocation3 + $0x109] sm:$0xff] %vm2910_vm3, %v4013_v50  ;;  %v4014_v47 = vmax.f32 %v3950_v10, 0.0 }
 0x428   : > { %4049 = vst.msk [vmem:[#allocation3 + $0x129] sm:$0xff] %vm2910_vm3, %v4016_v60  ;;  %v6646_v22 = vpop.f32.mrb[72].mxu1 }
 0x429   : > { %4047 = vst.msk [vmem:[#allocation3 + $0x111] sm:$0xff] %vm2910_vm3, %v4014_v47  ;;  %v6647_v6 = vpop.f32.mrb[73].mxu1  ;;  %v6996_v36 = vpop.f32.mrb[72].mxu0 }
 0x42a   : > { %v6648_v51 = vadd.f32 %v6647_v6, %v6646_v22  ;;  %v3971_v4 = vadd.f32 %v6996_v36, %v3810_v37  ;;  %v6649_v3 = vpop.f32.mrb[74].mxu1  ;;  %v3962_v28 = vpop.f32.mrb[73].mxu0 }
 0x42b   : > { %v3963_v7 = vadd.f32 %v3962_v28, %v3802_v42  ;;  %v6650_v48 = vpop.f32.mrb[75].mxu1  ;;  %v6997_v55 = vpop.f32.mrb[74].mxu0 }
 0x42c   : > { %v4019_v45 = vmax.f32 %v3971_v4, 0.0  ;;  %v6651_v49 = vadd.f32 %v6650_v48, %v6649_v3  ;;  %v3974_v12 = vadd.f32 %v6997_v55, %v3813_v53  ;;  %v3965_v32 = vpop.f32.mrb[75].mxu0  ;;  %v3818_v54 = vadd.f32 %v6648_v51, %v3657_v35 }
 0x42d   : > { %v4017_v63 = vmax.f32 %v3963_v7, 0.0  ;;  %v3966_v30 = vadd.f32 %v3965_v32, %v3805_v56 }
 0x42e   : > { %4052 = vst.msk [vmem:[#allocation3 + $0x151] sm:$0xff] %vm2910_vm3, %v4019_v45  ;;  %v4020_v61 = vmax.f32 %v3974_v12, 0.0  ;;  %v3821_v19 = vadd.f32 %v6651_v49, %v3660_v27 }
 0x42f   : > { %4050 = vst.msk [vmem:[#allocation3 + $0x139] sm:$0xff] %vm2910_vm3, %v4017_v63  ;;  %v4018_v18 = vmax.f32 %v3966_v30, 0.0 }
 0x430   : > { %4053 = vst.msk [vmem:[#allocation3 + $0x159] sm:$0xff] %vm2910_vm3, %v4020_v61  ;;  %v6652_v16 = vpop.f32.mrb[76].mxu1 }
 0x431   : > { %4051 = vst.msk [vmem:[#allocation3 + $0x141] sm:$0xff] %vm2910_vm3, %v4018_v18  ;;  %v6653_v20 = vpop.f32.mrb[77].mxu1  ;;  %v7000_v33 = vpop.f32.mrb[76].mxu0 }
 0x432   : > { %v6654_v29 = vadd.f32 %v6653_v20, %v6652_v16  ;;  %v6655_v5 = vpop.f32.mrb[78].mxu1  ;;  %v3978_v26 = vpop.f32.mrb[77].mxu0 }
 0x433   : > { %v3979_v13 = vadd.f32 %v3978_v26, %v3818_v54  ;;  %v6656_v59 = vpop.f32.mrb[79].mxu1  ;;  %v7001_v46 = vpop.f32.mrb[78].mxu0 }
 0x434   : > { %v3826_v42 = vadd.f32 %v6654_v29, %v3665_v11  ;;  %v6657_v25 = vadd.f32 %v6656_v59, %v6655_v5  ;;  %v3981_v41 = vpop.f32.mrb[79].mxu0 }
 0x435   : > { %v4021_v31 = vmax.f32 %v3979_v13, 0.0  ;;  %v3982_v56 = vadd.f32 %v3981_v41, %v3821_v19 }
 0x436   : > { %v3987_v9 = vadd.f32 %v7000_v33, %v3826_v42  ;;  %v3829_v8 = vadd.f32 %v6657_v25, %v3668_v40 }
 0x437   : > { %4054 = vst.msk [vmem:[#allocation3 + $0x169] sm:$0xff] %vm2910_vm3, %v4021_v31  ;;  %v4022_v34 = vmax.f32 %v3982_v56, 0.0 }
 0x438   : > { %v4023_v1 = vmax.f32 %v3987_v9, 0.0  ;;  %v3990_v38 = vadd.f32 %v7001_v46, %v3829_v8 }
 0x439   : > { %4055 = vst.msk [vmem:[#allocation3 + $0x171] sm:$0xff] %vm2910_vm3, %v4022_v34 }
 0x43a   : > { %4056 = vst.msk [vmem:[#allocation3 + $0x181] sm:$0xff] %vm2910_vm3, %v4023_v1  ;;  %v4024_v24 = vmax.f32 %v3990_v38, 0.0 }
 0x43c   : > { %4057 = vst.msk [vmem:[#allocation3 + $0x189] sm:$0xff] %vm2910_vm3, %v4024_v24 }
 0x43d PF: > { %p6088_p0 = scmp.ne.s32.totalorder %s7266_s15, 4 }
 0x43e   : > { %v4231_v2 = vld [vmem:[#allocation3 + $0x138] sm:$0xff] (!%p6088_p0)  ;;  %v4232_v58 = vld [vmem:[#allocation3 + $0x140] sm:$0xff] (!%p6088_p0)  ;;  %v4135_v57 = vld [vmem:[#allocation3 + $0x129] sm:$0xff] (!%p6088_p0)  ;;  %s7287_s29 = smov (!%p6088_p0), 64   ;;  %vm4688_vm4 = vcmask (!%p6088_p0), 523264   ;;  %vm5835_vm5 = vcmask (!%p6088_p0), 31744  }
 0x43f   : > { %4061 = sbr.rel (%p6088_p0) target bundleno = 1585 (0x631), region = 52  ;;  %v4207_v17 = vld [vmem:[#allocation3 + $0x18] sm:$0xff] (!%p6088_p0)  ;;  %v8546_v39 = vpack.c.bf16 (!%p6088_p0), %v4232_v58, %v4231_v2  ;;  %v4208_v21 = vld [vmem:[#allocation3 + $0x20] sm:$0xff] (!%p6088_p0)  ;;  %v4111_v43 = vld [vmem:[#allocation3 + $0x9] sm:$0xff] (!%p6088_p0) }
 0x440   : > { %v4134_v62 = vld [vmem:[#allocation3 + $0x121] sm:$0xff] (!%p6088_p0)  ;;  %v8548_v23 = vpack.c.bf16 (!%p6088_p0), %v4208_v21, %v4207_v17  ;;  %v4233_v0 = vld [vmem:[#allocation3 + $0x150] sm:$0xff] (!%p6088_p0)  ;;  %v4234_v52 = vld [vmem:[#allocation3 + $0x158] sm:$0xff] (!%p6088_p0) }
 0x441   : > { %v4110_v14 = vld [vmem:[#allocation3 + $0x1] sm:$0xff] (!%p6088_p0)  ;;  %4584 = vrot.lane.b32.xlu0 (!%p6088_p0), %v8546_v39, %s7287_s29  ;;  %v8552_v15 = vpack.c.bf16 (!%p6088_p0), %v4135_v57, %v4134_v62  ;;  %v4136_v37 = vld [vmem:[#allocation3 + $0x139] sm:$0xff] (!%p6088_p0)  ;;  %v8558_v10 = vpack.c.bf16 (!%p6088_p0), %v4234_v52, %v4233_v0  ;;  %v4209_v53 = vld [vmem:[#allocation3 + $0x30] sm:$0xff] (!%p6088_p0) }
 0x442   : > { %4560 = vrot.lane.b32.xlu1 (!%p6088_p0), %v8548_v23, %s7287_s29  ;;  %v4142_v44 = vpack.c.bf16 (!%p6088_p0), %v4111_v43, %v4110_v14  ;;  %v4137_v50 = vld [vmem:[#allocation3 + $0x141] sm:$0xff] (!%p6088_p0)  ;;  %v4210_v47 = vld [vmem:[#allocation3 + $0x38] sm:$0xff] (!%p6088_p0)  ;;  %v4236_v4 = vld [vmem:[#allocation3 + $0x170] sm:$0xff] (!%p6088_p0) }
 0x443   : > { %v8561_v60 = vpack.c.bf16 (!%p6088_p0), %v4137_v50, %v4136_v37  ;;  %v4112_v22 = vld [vmem:[#allocation3 + $0x19] sm:$0xff] (!%p6088_p0)  ;;  %v4113_v6 = vld [vmem:[#allocation3 + $0x21] sm:$0xff] (!%p6088_p0)  ;;  %v8565_v36 = vpack.c.bf16 (!%p6088_p0), %v4210_v47, %v4209_v53  ;;  %v4138_v3 = vld [vmem:[#allocation3 + $0x151] sm:$0xff] (!%p6088_p0) }
 0x444   : > { %v8569_v35 = vpack.c.bf16 (!%p6088_p0), %v4113_v6, %v4112_v22  ;;  %v4235_v51 = vld [vmem:[#allocation3 + $0x168] sm:$0xff] (!%p6088_p0)  ;;  %v4139_v28 = vld [vmem:[#allocation3 + $0x159] sm:$0xff] (!%p6088_p0)  ;;  %v4212_v55 = vld [vmem:[#allocation3 + $0x50] sm:$0xff] (!%p6088_p0) }
 0x445   : > { %4536 = vrot.lane.b32.xlu0 (!%p6088_p0), %v8552_v15, %s7287_s29  ;;  %v8573_v27 = vpack.c.bf16 (!%p6088_p0), %v4236_v4, %v4235_v51  ;;  %v8577_v7 = vpack.c.bf16 (!%p6088_p0), %v4139_v28, %v4138_v3  ;;  %v4211_v48 = vld [vmem:[#allocation3 + $0x48] sm:$0xff] (!%p6088_p0)  ;;  %v4114_v45 = vld [vmem:[#allocation3 + $0x31] sm:$0xff] (!%p6088_p0)  ;;  %v4115_v49 = vld [vmem:[#allocation3 + $0x39] sm:$0xff] (!%p6088_p0) }
 0x446   : > { %4512 = vrot.lane.b32.xlu1 %v4142_v44, %s7287_s29  ;;  %v8581_v12 = vpack.c.bf16 %v4212_v55, %v4211_v48  ;;  %v8585_v32 = vpack.c.bf16 %v4115_v49, %v4114_v45  ;;  %v4237_v54 = vld [vmem:[#allocation3 + $0x180] sm:$0xff]  ;;  %v4238_v63 = vld [vmem:[#allocation3 + $0x188] sm:$0xff]  ;;  %v4141_v61 = vld [vmem:[#allocation3 + $0x171] sm:$0xff] }
 0x447   : > { %v4140_v30 = vld [vmem:[#allocation3 + $0x169] sm:$0xff]  ;;  %v4254_v19 = vpack.c.bf16 %v4238_v63, %v4237_v54  ;;  %v4213_v18 = vld [vmem:[#allocation3 + $0x60] sm:$0xff]  ;;  %v4117_v11 = vld [vmem:[#allocation3 + $0x51] sm:$0xff] }
 0x448   : > { %v4214_v16 = vld [vmem:[#allocation3 + $0x68] sm:$0xff]  ;;  %v8591_v20 = vpack.c.bf16 %v4141_v61, %v4140_v30  ;;  %v7208_v29 = vld [vmem:[%s7367_s11 + $0x40] sm:$0xff]   ;;  %v7210_v59 = vld [vmem:[%s7367_s11 + $0x48] sm:$0xff]  }
 0x449   : > { %4586 = vrot.lane.b32.xlu0 %v8558_v10, %s7287_s29  ;;  %v4116_v33 = vld [vmem:[#allocation3 + $0x49] sm:$0xff]  ;;  %v8596_v26 = vpack.c.bf16 %v4214_v16, %v4213_v18  ;;  %7074 = vmatprep.subr.bf16.mxu1 %v7208_v29  ;;  %v4303_v46 = vld [vmem:[#allocation3 + $0x1a] sm:$0xff]  ;;  %v4305_v24 = vld [vmem:[#allocation3 + $0x32] sm:$0xff] }
 0x44a   : > { %4538 = vrot.lane.b32.xlu1 %v8561_v60, %s7287_s29  ;;  %v7209_v5 = vld [vmem:[%s7367_s11] sm:$0xff]   ;;  %v8600_v13 = vpack.c.bf16 %v4117_v11, %v4116_v33  ;;  %v4304_v40 = vld [vmem:[#allocation3 + $0x22] sm:$0xff]  ;;  %6678 = vmatprep.subr.bf16.mxu0 %v7208_v29  ;;  %v7211_v42 = vld [vmem:[%s7367_s11 + $0x8] sm:$0xff]  }
 0x44b   : > { %7082 = vmatpush3.bf16.msra.mxu1 %v7209_v5  ;;  %v4215_v25 = vld [vmem:[#allocation3 + $0x78] sm:$0xff]  ;;  %v4216_v41 = vld [vmem:[#allocation3 + $0x80] sm:$0xff]  ;;  %6679 = vmatpush3.bf16.msra.mxu0 %v7209_v5  ;;  %v4119_v56 = vld [vmem:[#allocation3 + $0x69] sm:$0xff]  ;;  %v8609_v8 = vpack.c.bf16 %v4304_v40, %v4303_v46 }
 0x44c   : > { %7075 = vmatprep.subr.bf16.mxu1 %v7210_v59  ;;  %v4118_v31 = vld [vmem:[#allocation3 + $0x61] sm:$0xff]  ;;  %6680 = vmatprep.subr.bf16.mxu0 %v7210_v59  ;;  %v8615_v38 = vpack.c.bf16 %v4216_v41, %v4215_v25  ;;  %v7216_v21 = vld [vmem:[%s7367_s11 + $0x60] sm:$0xff]   ;;  %v4218_v57 = vld [vmem:[#allocation3 + $0x98] sm:$0xff] }
 0x44d   : > { %4562 = vrot.lane.b32.xlu0 %v8565_v36, %s7287_s29  ;;  %v7212_v9 = vld [vmem:[%s7367_s11 + $0x50] sm:$0xff]   ;;  %v7214_v1 = vld [vmem:[%s7367_s11 + $0x58] sm:$0xff]   ;;  %v4146_v58 = vpack.c.bf16 %v4119_v56, %v4118_v31  ;;  %v4217_v62 = vld [vmem:[#allocation3 + $0x90] sm:$0xff] }
 0x44e   : > { %4514 = vrot.lane.b32.xlu1 %v8569_v35, %s7287_s29  ;;  %v7213_v34 = vld [vmem:[%s7367_s11 + $0x10] sm:$0xff]   ;;  %v7215_v17 = vld [vmem:[%s7367_s11 + $0x18] sm:$0xff]   ;;  %v7217_v0 = vld [vmem:[%s7367_s11 + $0x20] sm:$0xff]   ;;  %v8630_v37 = vpack.c.bf16 %v4218_v57, %v4217_v62 }
 0x44f   : > { %7083 = vmatpush3.bf16.msra.mxu1 %v7211_v42  ;;  %6681 = vmatpush3.bf16.msra.mxu0 %v7211_v42  ;;  %v4306_v2 = vld [vmem:[#allocation3 + $0x3a] sm:$0xff]  ;;  %v4307_v53 = vld [vmem:[#allocation3 + $0x4a] sm:$0xff]  ;;  %v4308_v47 = vld [vmem:[#allocation3 + $0x52] sm:$0xff] }
 0x450   : > { %7076 = vmatprep.subr.bf16.mxu1 %v7212_v9  ;;  %6682 = vmatprep.subr.bf16.mxu0 %v7212_v9  ;;  %v4120_v14 = vld [vmem:[#allocation3 + $0x79] sm:$0xff]  ;;  %v4121_v43 = vld [vmem:[#allocation3 + $0x81] sm:$0xff]  ;;  %v8624_v44 = vpack.c.bf16 %v4306_v2, %v4305_v24  ;;  %v4220_v4 = vld [vmem:[#allocation3 + $0xb0] sm:$0xff]  ;;  %v8639_v28 = vpack.c.bf16 %v4308_v47, %v4307_v53 }
 0x451   : > { %4588 = vrot.lane.b32.xlu0 %v8573_v27, %s7287_s29  ;;  %v7218_v52 = vld [vmem:[%s7367_s11 + $0x68] sm:$0xff]   ;;  %v4147_v50 = vpack.c.bf16 %v4121_v43, %v4120_v14  ;;  %v7220_v6 = vld [vmem:[%s7367_s11 + $0x70] sm:$0xff]   ;;  %v4219_v51 = vld [vmem:[#allocation3 + $0xa8] sm:$0xff] }
 0x452   : > { %4540 = vrot.lane.b32.xlu1 %v8577_v7, %s7287_s29  ;;  %v7219_v22 = vld [vmem:[%s7367_s11 + $0x28] sm:$0xff]   ;;  %v7221_v55 = vld [vmem:[%s7367_s11 + $0x30] sm:$0xff]   ;;  %v7222_v45 = vld [vmem:[%s7367_s11 + $0x78] sm:$0xff]   ;;  %v8644_v49 = vpack.c.bf16 %v4220_v4, %v4219_v51 }
 0x453   : > { %7084 = vmatpush3.bf16.msra.mxu1 %v7213_v34  ;;  %6683 = vmatpush3.bf16.msra.mxu0 %v7213_v34  ;;  %v4122_v3 = vld [vmem:[#allocation3 + $0x91] sm:$0xff]  ;;  %v4123_v48 = vld [vmem:[#allocation3 + $0x99] sm:$0xff]  ;;  %v4309_v54 = vld [vmem:[#allocation3 + $0x62] sm:$0xff] }
 0x454   : > { %7077 = vmatprep.subr.bf16.mxu1 %v7214_v1  ;;  %6684 = vmatprep.subr.bf16.mxu0 %v7214_v1  ;;  %v4310_v63 = vld [vmem:[#allocation3 + $0x6a] sm:$0xff]  ;;  %v4148_v30 = vpack.c.bf16 %v4123_v48, %v4122_v3  ;;  %v4221_v33 = vld [vmem:[#allocation3 + $0xc0] sm:$0xff]  ;;  %v4223_v25 = vld [vmem:[#allocation3 + $0xd8] sm:$0xff] }
 0x455   : > { %4564 = vrot.lane.b32.xlu0 %v8581_v12, %s7287_s29  ;;  %v7223_v61 = vld [vmem:[%s7367_s11 + $0x38] sm:$0xff]   ;;  %v8653_v18 = vld [vmem:[%s7367_s11 + $0x100] sm:$0xff]   ;;  %v8656_v16 = vpack.c.bf16 %v4310_v63, %v4309_v54  ;;  %v4311_v40 = vld [vmem:[#allocation3 + $0x7a] sm:$0xff] }
 0x456   : > { %4516 = vrot.lane.b32.xlu1 %v8585_v32, %s7287_s29  ;;  %v4222_v11 = vld [vmem:[#allocation3 + $0xc8] sm:$0xff]  ;;  %v4125_v5 = vld [vmem:[#allocation3 + $0xb1] sm:$0xff]  ;;  %v4224_v41 = vld [vmem:[#allocation3 + $0xe0] sm:$0xff] }
 0x457   : > { %7085 = vmatpush3.bf16.msra.mxu1 %v7215_v17  ;;  %6685 = vmatpush3.bf16.msra.mxu0 %v7215_v17  ;;  %v4124_v29 = vld [vmem:[#allocation3 + $0xa9] sm:$0xff]  ;;  %v8659_v59 = vpack.c.bf16 %v4222_v11, %v4221_v33  ;;  %v4126_v56 = vld [vmem:[#allocation3 + $0xc1] sm:$0xff]  ;;  %v4247_v34 = vpack.c.bf16 %v4224_v41, %v4223_v25  ;;  %v4313_v24 = vld [vmem:[#allocation3 + $0x92] sm:$0xff] }
 0x458   : > { %7078 = vmatprep.subr.bf16.mxu1 %v7216_v21  ;;  %6686 = vmatprep.subr.bf16.mxu0 %v7216_v21  ;;  %v4149_v46 = vpack.c.bf16 %v4125_v5, %v4124_v29  ;;  %v4312_v42 = vld [vmem:[#allocation3 + $0x82] sm:$0xff]  ;;  %v4314_v2 = vld [vmem:[#allocation3 + $0x9a] sm:$0xff]  ;;  %v4225_v17 = vld [vmem:[#allocation3 + $0xf0] sm:$0xff] }
 0x459   : > { %4590 = vrot.lane.b32.xlu0 %v4254_v19, %s7287_s29  ;;  %v7224_v19 = vld [vmem:[%s7367_s11 + $0xc0] sm:$0xff]   ;;  %v8667_v31 = vpack.c.bf16 %v4312_v42, %v4311_v40  ;;  %v4226_v21 = vld [vmem:[#allocation3 + $0xf8] sm:$0xff]  ;;  %v4129_v57 = vld [vmem:[#allocation3 + $0xe1] sm:$0xff] }
 0x45a   : > { %4542 = vrot.lane.b32.xlu1 %v8591_v20, %s7287_s29  ;;  %v4127_v9 = vld [vmem:[#allocation3 + $0xc9] sm:$0xff]  ;;  %v4128_v62 = vld [vmem:[#allocation3 + $0xd9] sm:$0xff]  ;;  %v4248_v14 = vpack.c.bf16 %v4226_v21, %v4225_v17 }
 0x45b   : > { %7086 = vmatpush3.bf16.msra.mxu1 %v7217_v0  ;;  %6687 = vmatpush3.bf16.msra.mxu0 %v7217_v0  ;;  %v4150_v1 = vpack.c.bf16 %v4127_v9, %v4126_v56  ;;  %v4151_v43 = vpack.c.bf16 %v4129_v57, %v4128_v62  ;;  %v4315_v0 = vld [vmem:[#allocation3 + $0xaa] sm:$0xff]  ;;  %v4317_v3 = vld [vmem:[#allocation3 + $0xc2] sm:$0xff]  ;;  %v4319_v33 = vld [vmem:[#allocation3 + $0xda] sm:$0xff] }
 0x45c   : > { %7079 = vmatprep.subr.bf16.mxu1 %v7218_v52  ;;  %6688 = vmatprep.subr.bf16.mxu0 %v7218_v52  ;;  %v4316_v52 = vld [vmem:[#allocation3 + $0xb2] sm:$0xff]  ;;  %v4227_v53 = vld [vmem:[#allocation3 + $0x108] sm:$0xff] }
 0x45d   : > { %4566 = vrot.lane.b32.xlu0 %v8596_v26, %s7287_s29  ;;  %v4228_v47 = vld [vmem:[#allocation3 + $0x110] sm:$0xff]  ;;  %v4230_v54 = vld [vmem:[#allocation3 + $0x128] sm:$0xff] }
 0x45e   : > { %4518 = vrot.lane.b32.xlu1 %v8600_v13, %s7287_s29  ;;  %v4249_v51 = vpack.c.bf16 %v4228_v47, %v4227_v53  ;;  %v4318_v48 = vld [vmem:[#allocation3 + $0xca] sm:$0xff]  ;;  %v4320_v11 = vld [vmem:[#allocation3 + $0xe2] sm:$0xff]  ;;  %v4321_v5 = vld [vmem:[#allocation3 + $0xf2] sm:$0xff] }
 0x45f   : > { %7087 = vmatpush3.bf16.msra.mxu1 %v7219_v22  ;;  %6689 = vmatpush3.bf16.msra.mxu0 %v7219_v22  ;;  %v4130_v22 = vld [vmem:[#allocation3 + $0xf1] sm:$0xff]  ;;  %v4132_v63 = vld [vmem:[#allocation3 + $0x109] sm:$0xff]  ;;  %v8695_v29 = vpack.c.bf16 %v4320_v11, %v4319_v33 }
 0x460   : > { %7080 = vmatprep.subr.bf16.mxu1 %v7220_v6  ;;  %6690 = vmatprep.subr.bf16.mxu0 %v7220_v6  ;;  %v4131_v6 = vld [vmem:[#allocation3 + $0xf9] sm:$0xff]  ;;  %v4323_v42 = vld [vmem:[#allocation3 + $0x10a] sm:$0xff]  ;;  %v4182_v56 = vld [vmem:[#allocation3 + $0x122] sm:$0xff] }
 0x461   : > { %4656 = vrot.lane.b32.xlu0 %v8585_v32, %s7287_s29  ;;  %v4152_v4 = vpack.c.bf16 %v4131_v6, %v4130_v22  ;;  %v4324_v25 = vld [vmem:[#allocation3 + $0x112] sm:$0xff]  ;;  %v4183_v9 = vld [vmem:[#allocation3 + $0x12a] sm:$0xff] }
 0x462   : > { %4608 = vrot.lane.b32.xlu1 %v8609_v8, %s7287_s29  ;;  %v8705_v41 = vpack.c.bf16 %v4324_v25, %v4323_v42  ;;  %v4159_v17 = vld [vmem:[#allocation3 + $0xa] sm:$0xff]  ;;  %v4186_v57 = vld [vmem:[#allocation3 + $0x152] sm:$0xff] }
 0x463   : > { %7088 = vmatpush3.bf16.msra.mxu1 %v7221_v55  ;;  %6691 = vmatpush3.bf16.msra.mxu0 %v7221_v55  ;;  %v8688_v55 = vpack.c.bf16 %v4318_v48, %v4317_v3  ;;  %v4430_v3 = vld [vmem:[#allocation3 + $0x199] sm:$0xff]  ;;  %v4431_v48 = vld [vmem:[#allocation3 + $0x1a1] sm:$0xff]  ;;  %v4334_v42 = vld [vmem:[#allocation3 + $0x18a] sm:$0xff] }
 0x464   : > { %7081 = vmatprep.subr.bf16.mxu1 %v7222_v45  ;;  %6692 = vmatprep.subr.bf16.mxu0 %v7222_v45  ;;  %v4229_v45 = vld [vmem:[#allocation3 + $0x120] sm:$0xff]  ;;  %v7240_v11 = vld [vmem:[%s7367_s11 + $0x108] sm:$0xff]  }
 0x465   : > { %4568 = vrot.lane.b32.xlu0 %v8615_v38, %s7287_s29  ;;  %v7228_v25 = vld [vmem:[%s7367_s11 + $0x88] sm:$0xff]  }
 0x466   : > { %4520 = vrot.lane.b32.xlu1 %v4146_v58, %s7287_s29 }
 0x467   : > { %7089 = vmatpush3.bf16.msra.mxu1 %v7223_v61  ;;  %6693 = vmatpush3.bf16.msra.mxu0 %v7223_v61  ;;  %v4250_v61 = vpack.c.bf16 %v4230_v54, %v4229_v45  ;;  %v7227_v54 = vld [vmem:[%s7367_s11 + $0xc8] sm:$0xff]  }
 0x468   : > { %6790 = vmatprep.subr.bf16.mxu1 %v7224_v19  ;;  %7002 = vmatprep.subr.bf16.mxu0 %v8653_v18 }
 0x469   : > { %4658 = vrot.lane.b32.xlu0 %v8600_v13, %s7287_s29 }
 0x46a   : > { %4610 = vrot.lane.b32.xlu1 %v8624_v44, %s7287_s29 }
 0x46d   : > { %4570 = vrot.lane.b32.xlu0 %v8630_v37, %s7287_s29 }
 0x46e   : > { %4522 = vrot.lane.b32.xlu1 %v4147_v50, %s7287_s29 }
 0x471   : > { %4660 = vrot.lane.b32.xlu0 %v4146_v58, %s7287_s29  ;;  %v8674_v58 = vpack.c.bf16 %v4314_v2, %v4313_v24  ;;  %v4185_v24 = vld [vmem:[#allocation3 + $0x142] sm:$0xff] }
 0x472   : > { %4612 = vrot.lane.b32.xlu1 %v8639_v28, %s7287_s29  ;;  %v4158_v2 = vld [vmem:[#allocation3 + $0x2] sm:$0xff] }
 0x473   : > { %v4190_v62 = vpack.c.bf16 %v4159_v17, %v4158_v2  ;;  %v7242_v2 = vld [vmem:[%s7367_s11 + $0x110] sm:$0xff]  }
 0x474   : > { %v7230_v17 = vld [vmem:[%s7367_s11 + $0x90] sm:$0xff]  }
 0x475   : > { %4572 = vrot.lane.b32.xlu0 %v8644_v49, %s7287_s29 }
 0x476   : > { %4524 = vrot.lane.b32.xlu1 %v4148_v30, %s7287_s29 }
 0x479   : > { %4662 = vrot.lane.b32.xlu0 %v4147_v50, %s7287_s29  ;;  %v8681_v50 = vpack.c.bf16 %v4316_v52, %v4315_v0  ;;  %v4429_v0 = vld [vmem:[#allocation3 + $0x189] sm:$0xff] }
 0x47a   : > { %4614 = vrot.lane.b32.xlu1 %v8656_v16, %s7287_s29 }
 0x47d   : > { %4574 = vrot.lane.b32.xlu0 %v8659_v59, %s7287_s29 }
 0x47e   : > { %4526 = vrot.lane.b32.xlu1 %v4149_v46, %s7287_s29 }
 0x481   : > { %4664 = vrot.lane.b32.xlu0 %v4148_v30, %s7287_s29  ;;  %v4133_v30 = vld [vmem:[#allocation3 + $0x111] sm:$0xff] }
 0x482   : > { %4616 = vrot.lane.b32.xlu1 %v8667_v31, %s7287_s29  ;;  %v4153_v19 = vpack.c.bf16 %v4133_v30, %v4132_v63  ;;  %v4188_v63 = vld [vmem:[#allocation3 + $0x16a] sm:$0xff]  ;;  %v4189_v30 = vld [vmem:[#allocation3 + $0x172] sm:$0xff] }
 0x485   : > { %4576 = vrot.lane.b32.xlu0 %v4247_v34, %s7287_s29  ;;  %v4202_v34 = vpack.c.bf16 %v4183_v9, %v4182_v56  ;;  %v8738_v56 = vpack.c.bf16 %v4189_v30, %v4188_v63 }
 0x486   : > { %4528 = vrot.lane.b32.xlu1 %v4150_v1, %s7287_s29 }
 0x489   : > { %4666 = vrot.lane.b32.xlu0 %v4149_v46, %s7287_s29  ;;  %v4322_v46 = vld [vmem:[#allocation3 + $0xfa] sm:$0xff] }
 0x48a   : > { %4618 = vrot.lane.b32.xlu1 %v8674_v58, %s7287_s29  ;;  %v8700_v40 = vpack.c.bf16 %v4322_v46, %v4321_v5  ;;  %v4447_v5 = vpack.c.bf16 %v4431_v48, %v4430_v3  ;;  %v4333_v46 = vld [vmem:[#allocation3 + $0x182] sm:$0xff] }
 0x48d   : > { %4578 = vrot.lane.b32.xlu0 %v4248_v14, %s7287_s29  ;;  %v4187_v14 = vld [vmem:[#allocation3 + $0x15a] sm:$0xff] }
 0x48e   : > { %4530 = vrot.lane.b32.xlu1 %v4151_v43, %s7287_s29  ;;  %v8721_v22 = vpack.c.bf16 %v4187_v14, %v4186_v57 }
 0x491   : > { %4668 = vrot.lane.b32.xlu0 %v4150_v1, %s7287_s29  ;;  %v4184_v1 = vld [vmem:[#allocation3 + $0x13a] sm:$0xff] }
 0x492   : > { %4620 = vrot.lane.b32.xlu1 %v8681_v50, %s7287_s29  ;;  %v8714_v21 = vpack.c.bf16 %v4185_v24, %v4184_v1  ;;  %v8746_v24 = vpack.c.bf16 %v4334_v42, %v4333_v46  ;;  %v7241_v42 = vld [vmem:[%s7367_s11 + $0xb8] sm:$0xff]  }
 0x495   : > { %4580 = vrot.lane.b32.xlu0 %v4249_v51, %s7287_s29 }
 0x496   : > { %4532 = vrot.lane.b32.xlu1 %v4152_v4, %s7287_s29 }
 0x499   : > { %4670 = vrot.lane.b32.xlu0 %v4151_v43, %s7287_s29  ;;  %v4063_v43 = vld [vmem:[#allocation3 + $0x8] sm:$0xff] }
 0x49a   : > { %4622 = vrot.lane.b32.xlu1 %v8688_v55, %s7287_s29 }
 0x49d   : > { %4582 = vrot.lane.b32.xlu0 %v4250_v61, %s7287_s29 }
 0x49e   : > { %4534 = vrot.lane.b32.xlu1 %v4153_v19, %s7287_s29 }
 0x4a1   : > { %4672 = vrot.lane.b32.xlu0 %v4152_v4, %s7287_s29  ;;  %v7225_v4 = vld [vmem:[%s7367_s11 + $0x80] sm:$0xff]  }
 0x4a2   : > { %4624 = vrot.lane.b32.xlu1 %v8695_v29, %s7287_s29 }
 0x4a5   : > { %4674 = vrot.lane.b32.xlu0 %v4153_v19, %s7287_s29 }
 0x4a6   : > { %4626 = vrot.lane.b32.xlu1 %v8700_v40, %s7287_s29 }
 0x4a9   : > { %4676 = vrot.lane.b32.xlu0 %v8552_v15, %s7287_s29  ;;  %v4062_v15 = vld [vmem:[#allocation3] sm:$0xff] }
 0x4aa   : > { %4628 = vrot.lane.b32.xlu1 %v8705_v41, %s7287_s29  ;;  %v4094_v6 = vpack.c.bf16 %v4063_v43, %v4062_v15  ;;  %v7231_v15 = vld [vmem:[%s7367_s11 + $0xd8] sm:$0xff]  }
 0x4ab   : > { %v7243_v43 = vld [vmem:[%s7367_s11 + $0x118] sm:$0xff]  }
 0x4ad   : > { %4678 = vrot.lane.b32.xlu0 %v8561_v60, %s7287_s29  ;;  %v4428_v60 = vld [vmem:[#allocation3 + $0x181] sm:$0xff] }
 0x4ae   : > { %4630 = vrot.lane.b32.xlu1 %v4202_v34, %s7287_s29  ;;  %v8726_v51 = vpack.c.bf16 %v4429_v0, %v4428_v60  ;;  %v7232_v60 = vld [vmem:[%s7367_s11 + $0x98] sm:$0xff]  }
 0x4b1   : > { %4680 = vrot.lane.b32.xlu0 %v8577_v7, %s7287_s29 }
 0x4b2   : > { %4632 = vrot.lane.b32.xlu1 %v8714_v21, %s7287_s29 }
 0x4b3   : > { %v4585_v52 = vpop.permute.xlu0 %4584 }
 0x4b4   : > { %v4561_v53 = vpop.permute.xlu1 %4560  ;;  %v4803_v47 = vsel %vm4688_vm4, %v4202_v34, %v4585_v52  ;;  %v7233_v52 = vld [vmem:[%s7367_s11 + $0xe0] sm:$0xff]  }
 0x4b5   : > { %5416 = vmatprep.mubr.bf16.mxu1 %v4803_v47  ;;  %v4755_v7 = vsel %vm4688_vm4, %v4190_v62, %v4561_v53  ;;  %4682 = vrot.lane.b32.xlu0 %v8591_v20, %s7287_s29 }
 0x4b6   : > { %5320 = vmatprep.mubr.bf16.mxu0 %v4755_v7  ;;  %4634 = vrot.lane.b32.xlu1 %v8721_v22, %s7287_s29 }
 0x4b7   : > { %v4537_v45 = vpop.permute.xlu0 %4536 }
 0x4b8   : > { %v4513_v19 = vpop.permute.xlu1 %4512  ;;  %v4739_v33 = vsel %vm4688_vm4, %v4250_v61, %v4537_v45  ;;  %v7229_v61 = vld [vmem:[%s7367_s11 + $0xd0] sm:$0xff]  }
 0x4b9   : > { %5417 = vmatmul.mubr.bf16.vlgmr.msra.gmra.mrb[0].mxu1 %v4739_v33  ;;  %v4691_v20 = vsel %vm4688_vm4, %v4094_v6, %v4513_v19  ;;  %4684 = vrot.lane.b32.xlu0 %v8726_v51, %s7287_s29  ;;  %v7235_v6 = vld [vmem:[%s7367_s11 + $0xe8] sm:$0xff]   ;;  %v7238_v19 = vld [vmem:[%s7367_s11 + $0xb0] sm:$0xff]  }
 0x4ba   : > { %6791 = vmatpush3.bf16.msra.mxu1 %v7225_v4  ;;  %5321 = vmatmul.mubr.bf16.vlgmr.msra.gmra.mrb[0].mxu0 %v4691_v20 }
 0x4bb   : > { %v4587_v9 = vpop.permute.xlu0 %4586  ;;  %6792 = vmatprep.subr.bf16.mxu1 %v7227_v54  ;;  %7003 = vmatpush3.bf16.msra.mxu0 %v8653_v18  ;;  %v7237_v54 = vld [vmem:[%s7367_s11 + $0xf0] sm:$0xff]  }
 0x4bc   : > { %v4539_v34 = vpop.permute.xlu1 %4538  ;;  %v4807_v1 = vsel %vm4688_vm4, %v8714_v21, %v4587_v9  ;;  %7004 = vmatprep.subr.bf16.mxu0 %v7240_v11  ;;  %4636 = vrot.lane.b32.xlu1 %v8738_v56, %s7287_s29 }
 0x4bd   : > { %5424 = vmatprep.mubr.bf16.mxu1 %v4807_v1  ;;  %4686 = vrot.lane.b32.xlu0 %v4447_v5, %s7287_s29  ;;  %v4743_v18 = vsel %vm4688_vm4, %v8546_v39, %v4539_v34 }
 0x4be   : > { %6793 = vmatpush3.bf16.msra.mxu1 %v7228_v25 }
 0x4bf   : > { %v4563_v62 = vpop.permute.xlu0 %4562  ;;  %6794 = vmatprep.subr.bf16.mxu1 %v7229_v61  ;;  %7005 = vmatpush3.bf16.msra.mxu0 %v7240_v11  ;;  %v7239_v11 = vld [vmem:[%s7367_s11 + $0xf8] sm:$0xff]  }
 0x4c0   : > { %v4515_v57 = vpop.permute.xlu1 %4514  ;;  %v4759_v14 = vsel %vm4688_vm4, %v8609_v8, %v4563_v62  ;;  %4638 = vrot.lane.b32.xlu1 %v8746_v24, %s7287_s29  ;;  %7006 = vmatprep.subr.bf16.mxu0 %v7242_v2 }
 0x4c1   : > { %5328 = vmatprep.mubr.bf16.mxu0 %v4759_v14  ;;  %5425 = vmatmul.mubr.bf16.gmra.mrb[4].mxu1 %v4743_v18  ;;  %v4695_v39 = vsel %vm4688_vm4, %v8548_v23, %v4515_v57  ;;  %v7234_v23 = vld [vmem:[%s7367_s11 + $0xa0] sm:$0xff]  }
 0x4c2   : > { %6795 = vmatpush3.bf16.msra.mxu1 %v7230_v17  ;;  %5329 = vmatmul.mubr.bf16.gmra.mrb[4].mxu0 %v4695_v39  ;;  %v4358_v39 = vld [vmem:[#allocation3 + $0x78] sm:$0xff] }
 0x4c3   : > { %v4589_v0 = vpop.permute.xlu0 %4588  ;;  %6796 = vmatprep.subr.bf16.mxu1 %v7231_v15  ;;  %7007 = vmatpush3.bf16.msra.mxu0 %v7242_v2 }
 0x4c4   : > { %v4541_v8 = vpop.permute.xlu1 %4540  ;;  %v4811_v53 = vsel %vm4688_vm4, %v8721_v22, %v4589_v0  ;;  %7008 = vmatprep.subr.bf16.mxu0 %v7243_v43 }
 0x4c5   : > { %5432 = vmatprep.mubr.bf16.mxu1 %v4811_v53  ;;  %v4747_v47 = vsel %vm4688_vm4, %v8558_v10, %v4541_v8  ;;  %v7236_v10 = vld [vmem:[%s7367_s11 + $0xa8] sm:$0xff]  }
 0x4c6   : > { %6797 = vmatpush3.bf16.msra.mxu1 %v7232_v60  ;;  %v4359_v60 = vld [vmem:[#allocation3 + $0x80] sm:$0xff] }
 0x4c7   : > { %v4565_v7 = vpop.permute.xlu0 %4564  ;;  %6798 = vmatprep.subr.bf16.mxu1 %v7233_v52  ;;  %7009 = vmatpush3.bf16.msra.mxu0 %v7243_v43  ;;  %v4261_v52 = vld [vmem:[#allocation3 + $0x61] sm:$0xff] }
 0x4c8   : > { %v4517_v4 = vpop.permute.xlu1 %4516  ;;  %v4763_v3 = vsel %vm4688_vm4, %v8624_v44, %v4565_v7 }
 0x4c9   : > { %5336 = vmatprep.mubr.bf16.mxu0 %v4763_v3  ;;  %5433 = vmatmul.mubr.bf16.gmra.mrb[8].mxu1 %v4747_v47  ;;  %v4699_v48 = vsel %vm4688_vm4, %v8565_v36, %v4517_v4  ;;  %v4361_v4 = vld [vmem:[#allocation3 + $0x98] sm:$0xff] }
 0x4ca   : > { %6799 = vmatpush3.bf16.msra.mxu1 %v7234_v23  ;;  %5337 = vmatmul.mubr.bf16.gmra.mrb[8].mxu0 %v4699_v48 }
 0x4cb   : > { %v4591_v45 = vpop.permute.xlu0 %4590  ;;  %6800 = vmatprep.subr.bf16.mxu1 %v7235_v6 }
 0x4cc   : > { %v4543_v63 = vpop.permute.xlu1 %4542  ;;  %v4815_v30 = vsel %vm4688_vm4, %v8738_v56, %v4591_v45 }
 0x4cd   : > { %5440 = vmatprep.mubr.bf16.mxu1 %v4815_v30  ;;  %v4751_v44 = vsel %vm4688_vm4, %v8573_v27, %v4543_v63 }
 0x4ce   : > { %6801 = vmatpush3.bf16.msra.mxu1 %v7236_v10  ;;  %v4263_v10 = vld [vmem:[#allocation3 + $0x79] sm:$0xff] }
 0x4cf   : > { %v4567_v33 = vpop.permute.xlu0 %4566  ;;  %6802 = vmatprep.subr.bf16.mxu1 %v7237_v54 }
 0x4d0   : > { %v4519_v20 = vpop.permute.xlu1 %4518  ;;  %v4767_v5 = vsel %vm4688_vm4, %v8639_v28, %v4567_v33 }
 0x4d1   : > { %5344 = vmatprep.mubr.bf16.mxu0 %v4767_v5  ;;  %5441 = vmatmul.mubr.bf16.gmra.mrb[12].mxu1 %v4751_v44  ;;  %v4703_v46 = vsel %vm4688_vm4, %v8581_v12, %v4519_v20  ;;  %v4363_v20 = vld [vmem:[#allocation3 + $0xb0] sm:$0xff] }
 0x4d2   : > { %6803 = vmatpush3.bf16.msra.mxu1 %v7238_v19  ;;  %5345 = vmatmul.mubr.bf16.gmra.mrb[12].mxu0 %v4703_v46 }
 0x4d3   : > { %v4657_v25 = vpop.permute.xlu0 %4656  ;;  %6804 = vmatprep.subr.bf16.mxu1 %v7239_v11  ;;  %v4362_v11 = vld [vmem:[#allocation3 + $0xa8] sm:$0xff] }
 0x4d4   : > { %v4609_v9 = vpop.permute.xlu1 %4608  ;;  %v4883_v27 = vsel %vm4688_vm4, %v8565_v36, %v4657_v25 }
 0x4d5   : > { %5481 = vmatprep.mubr.bf16.mxu1 %v4883_v27  ;;  %v4819_v61 = vsel %vm4688_vm4, %v8569_v35, %v4609_v9  ;;  %v4389_v27 = vpack.c.bf16 %v4363_v20, %v4362_v11 }
 0x4d6   : > { %6805 = vmatpush3.bf16.msra.mxu1 %v7241_v42  ;;  %v4265_v42 = vld [vmem:[#allocation3 + $0x91] sm:$0xff] }
 0x4d7   : > { %v4569_v28 = vpop.permute.xlu0 %4568 }
 0x4d8   : > { %v4521_v34 = vpop.permute.xlu1 %4520  ;;  %v4771_v1 = vsel %vm4688_vm4, %v8656_v16, %v4569_v28  ;;  %v4080_v28 = vld [vmem:[#allocation3 + $0xd8] sm:$0xff] }
 0x4d9   : > { %5352 = vmatprep.mubr.bf16.mxu0 %v4771_v1  ;;  %5482 = vmatmul.mubr.bf16.vlgmr.msra.gmra.mrb[16].mxu1 %v4819_v61  ;;  %v4707_v2 = vsel %vm4688_vm4, %v8596_v26, %v4521_v34  ;;  %v4081_v34 = vld [vmem:[#allocation3 + $0xe0] sm:$0xff] }
 0x4da   : > { %5353 = vmatmul.mubr.bf16.gmra.mrb[16].mxu0 %v4707_v2 }
 0x4db   : > { %v4659_v18 = vpop.permute.xlu0 %4658 }
 0x4dc   : > { %v4611_v17 = vpop.permute.xlu1 %4610  ;;  %v4887_v36 = vsel %vm4688_vm4, %v8581_v12, %v4659_v18 }
 0x4dd   : > { %5489 = vmatprep.mubr.bf16.mxu1 %v4887_v36  ;;  %v4823_v35 = vsel %vm4688_vm4, %v8585_v32, %v4611_v17  ;;  %v4103_v17 = vpack.c.bf16 %v4081_v34, %v4080_v28  ;;  %v4364_v36 = vld [vmem:[#allocation3 + $0xc0] sm:$0xff]  ;;  %v4273_v28 = vld [vmem:[#allocation3 + $0xf1] sm:$0xff] }
 0x4de   : > { %v4274_v34 = vld [vmem:[#allocation3 + $0xf9] sm:$0xff] }
 0x4df   : > { %v4571_v62 = vpop.permute.xlu0 %4570 }
 0x4e0   : > { %v4523_v15 = vpop.permute.xlu1 %4522  ;;  %v4775_v16 = vsel %vm4688_vm4, %v8667_v31, %v4571_v62  ;;  %v4262_v31 = vld [vmem:[#allocation3 + $0x69] sm:$0xff] }
 0x4e1   : > { %5360 = vmatprep.mubr.bf16.mxu0 %v4775_v16  ;;  %5490 = vmatmul.mubr.bf16.gmra.mrb[20].mxu1 %v4823_v35  ;;  %v4711_v57 = vsel %vm4688_vm4, %v8615_v38, %v4523_v15  ;;  %v4387_v38 = vpack.c.bf16 %v4359_v60, %v4358_v39  ;;  %v4365_v35 = vld [vmem:[#allocation3 + $0xc8] sm:$0xff]  ;;  %v4268_v16 = vld [vmem:[#allocation3 + $0xb1] sm:$0xff] }
 0x4e2   : > { %5361 = vmatmul.mubr.bf16.gmra.mrb[20].mxu0 %v4711_v57  ;;  %v4267_v15 = vld [vmem:[#allocation3 + $0xa9] sm:$0xff]  ;;  %v4083_v60 = vld [vmem:[#allocation3 + $0xf8] sm:$0xff] }
 0x4e3   : > { %v4661_v14 = vpop.permute.xlu0 %4660  ;;  %v4082_v39 = vld [vmem:[#allocation3 + $0xf0] sm:$0xff] }
 0x4e4   : > { %v4613_v43 = vpop.permute.xlu1 %4612  ;;  %v4891_v12 = vsel %vm4688_vm4, %v8596_v26, %v4661_v14  ;;  %v4290_v26 = vpack.c.bf16 %v4262_v31, %v4261_v52  ;;  %v4390_v14 = vpack.c.bf16 %v4365_v35, %v4364_v36  ;;  %v4104_v31 = vpack.c.bf16 %v4083_v60, %v4082_v39  ;;  %v4275_v39 = vld [vmem:[#allocation3 + $0x109] sm:$0xff]  ;;  %v4276_v60 = vld [vmem:[#allocation3 + $0x111] sm:$0xff] }
 0x4e5   : > { %5497 = vmatprep.mubr.bf16.mxu1 %v4891_v12  ;;  %v4827_v32 = vsel %vm4688_vm4, %v8600_v13, %v4613_v43  ;;  %v4360_v13 = vld [vmem:[#allocation3 + $0x90] sm:$0xff]  ;;  %v4293_v12 = vpack.c.bf16 %v4268_v16, %v4267_v15  ;;  %v4296_v36 = vpack.c.bf16 %v4274_v34, %v4273_v28  ;;  %v4468_v28 = vld [vmem:[#allocation3 + $0x122] sm:$0xff] }
 0x4e6   : > { %v4388_v63 = vpack.c.bf16 %v4361_v4, %v4360_v13  ;;  %v4085_v13 = vld [vmem:[#allocation3 + $0x110] sm:$0xff] }
 0x4e7   : > { %v4573_v0 = vpop.permute.xlu0 %4572  ;;  %v4469_v34 = vld [vmem:[#allocation3 + $0x12a] sm:$0xff] }
 0x4e8   : > { %v4525_v8 = vpop.permute.xlu1 %4524  ;;  %v4779_v53 = vsel %vm4688_vm4, %v8674_v58, %v4573_v0  ;;  %v4264_v58 = vld [vmem:[#allocation3 + $0x81] sm:$0xff] }
 0x4e9   : > { %5368 = vmatprep.mubr.bf16.mxu0 %v4779_v53  ;;  %5498 = vmatmul.mubr.bf16.gmra.mrb[24].mxu1 %v4827_v32  ;;  %v4715_v47 = vsel %vm4688_vm4, %v8630_v37, %v4525_v8  ;;  %v4291_v30 = vpack.c.bf16 %v4264_v58, %v4263_v10  ;;  %v4448_v10 = vld [vmem:[#allocation3 + $0x32] sm:$0xff]  ;;  %v4449_v58 = vld [vmem:[#allocation3 + $0x3a] sm:$0xff] }
 0x4ea   : > { %5369 = vmatmul.mubr.bf16.gmra.mrb[24].mxu0 %v4715_v47 }
 0x4eb   : > { %v4663_v23 = vpop.permute.xlu0 %4662 }
 0x4ec   : > { %v4615_v7 = vpop.permute.xlu1 %4614  ;;  %v4895_v6 = vsel %vm4688_vm4, %v4387_v38, %v4663_v23  ;;  %v4269_v38 = vld [vmem:[#allocation3 + $0xc1] sm:$0xff] }
 0x4ed   : > { %5505 = vmatprep.mubr.bf16.mxu1 %v4895_v6  ;;  %v4831_v3 = vsel %vm4688_vm4, %v4290_v26, %v4615_v7  ;;  %v4084_v6 = vld [vmem:[#allocation3 + $0x108] sm:$0xff] }
 0x4ef   : > { %v4575_v48 = vpop.permute.xlu0 %4574 }
 0x4f0   : > { %v4527_v45 = vpop.permute.xlu1 %4526  ;;  %v4783_v54 = vsel %vm4688_vm4, %v8681_v50, %v4575_v48  ;;  %v4266_v50 = vld [vmem:[#allocation3 + $0x99] sm:$0xff] }
 0x4f1   : > { %5376 = vmatprep.mubr.bf16.mxu0 %v4783_v54  ;;  %5506 = vmatmul.mubr.bf16.gmra.mrb[28].mxu1 %v4831_v3  ;;  %v4719_v37 = vsel %vm4688_vm4, %v8644_v49, %v4527_v45  ;;  %v4292_v61 = vpack.c.bf16 %v4266_v50, %v4265_v42  ;;  %v4105_v45 = vpack.c.bf16 %v4085_v13, %v4084_v6 }
 0x4f2   : > { %5377 = vmatmul.mubr.bf16.gmra.mrb[28].mxu0 %v4719_v37  ;;  %v4272_v37 = vld [vmem:[#allocation3 + $0xe1] sm:$0xff] }
 0x4f3   : > { %v4665_v44 = vpop.permute.xlu0 %4664 }
 0x4f4   : > { %v4617_v19 = vpop.permute.xlu1 %4616  ;;  %v4899_v33 = vsel %vm4688_vm4, %v4388_v63, %v4665_v44 }
 0x4f5   : > { %5513 = vmatprep.mubr.bf16.mxu1 %v4899_v33  ;;  %v4835_v5 = vsel %vm4688_vm4, %v4291_v30, %v4617_v19  ;;  %v4480_v30 = vpack.c.bf16 %v4449_v58, %v4448_v10  ;;  %v4376_v10 = vld [vmem:[#allocation3 + $0x150] sm:$0xff]  ;;  %v4377_v58 = vld [vmem:[#allocation3 + $0x158] sm:$0xff] }
 0x4f7   : > { %v4577_v46 = vpop.permute.xlu0 %4576 }
 0x4f8   : > { %v4529_v25 = vpop.permute.xlu1 %4528  ;;  %v4787_v9 = vsel %vm4688_vm4, %v8688_v55, %v4577_v46  ;;  %v4451_v46 = vld [vmem:[#allocation3 + $0x52] sm:$0xff] }
 0x4f9   : > { %5384 = vmatprep.mubr.bf16.mxu0 %v4787_v9  ;;  %5514 = vmatmul.mubr.bf16.gmra.mrb[32].mxu1 %v4835_v5  ;;  %v4723_v49 = vsel %vm4688_vm4, %v8659_v59, %v4529_v25  ;;  %v4450_v5 = vld [vmem:[#allocation3 + $0x4a] sm:$0xff]  ;;  %v4452_v25 = vld [vmem:[#allocation3 + $0x62] sm:$0xff] }
 0x4fa   : > { %5385 = vmatmul.mubr.bf16.gmra.mrb[32].mxu0 %v4723_v49  ;;  %v4453_v9 = vld [vmem:[#allocation3 + $0x6a] sm:$0xff]  ;;  %v4481_v49 = vpack.c.bf16 %v4451_v46, %v4450_v5  ;;  %v4279_v5 = vld [vmem:[#allocation3 + $0x139] sm:$0xff]  ;;  %v4280_v46 = vld [vmem:[#allocation3 + $0x141] sm:$0xff] }
 0x4fb   : > { %v4667_v1 = vpop.permute.xlu0 %4666 }
 0x4fc   : > { %v4619_v2 = vpop.permute.xlu1 %4618  ;;  %v4903_v18 = vsel %vm4688_vm4, %v4389_v27, %v4667_v1  ;;  %v4482_v1 = vpack.c.bf16 %v4453_v9, %v4452_v25  ;;  %v4379_v25 = vld [vmem:[#allocation3 + $0x170] sm:$0xff]  ;;  %v4299_v9 = vpack.c.bf16 %v4280_v46, %v4279_v5 }
 0x4fd   : > { %5521 = vmatprep.mubr.bf16.mxu1 %v4903_v18  ;;  %v4839_v55 = vsel %vm4688_vm4, %v4292_v61, %v4619_v2  ;;  %v4372_v18 = vld [vmem:[#allocation3 + $0x120] sm:$0xff] }
 0x4ff   : > { %v4579_v62 = vpop.permute.xlu0 %4578 }
 0x500   : > { %v4531_v57 = vpop.permute.xlu1 %4530  ;;  %v4791_v59 = vsel %vm4688_vm4, %v8695_v29, %v4579_v62  ;;  %v4270_v29 = vld [vmem:[#allocation3 + $0xc9] sm:$0xff] }
 0x501   : > { %5392 = vmatprep.mubr.bf16.mxu0 %v4791_v59  ;;  %5522 = vmatmul.mubr.bf16.gmra.mrb[36].mxu1 %v4839_v55  ;;  %v4727_v43 = vsel %vm4688_vm4, %v4103_v17, %v4531_v57  ;;  %v4294_v7 = vpack.c.bf16 %v4270_v29, %v4269_v38  ;;  %v4454_v55 = vld [vmem:[#allocation3 + $0x7a] sm:$0xff]  ;;  %v4455_v62 = vld [vmem:[#allocation3 + $0x82] sm:$0xff]  ;;  %v4456_v57 = vld [vmem:[#allocation3 + $0x92] sm:$0xff] }
 0x502   : > { %5393 = vmatmul.mubr.bf16.gmra.mrb[36].mxu0 %v4727_v43  ;;  %v4457_v59 = vld [vmem:[#allocation3 + $0x9a] sm:$0xff]  ;;  %v4483_v43 = vpack.c.bf16 %v4455_v62, %v4454_v55  ;;  %v4459_v38 = vld [vmem:[#allocation3 + $0xb2] sm:$0xff]  ;;  %v4381_v55 = vld [vmem:[#allocation3 + $0x188] sm:$0xff] }
 0x503   : > { %v4669_v32 = vpop.permute.xlu0 %4668 }
 0x504   : > { %v4621_v0 = vpop.permute.xlu1 %4620  ;;  %v4907_v52 = vsel %vm4688_vm4, %v4390_v14, %v4669_v32  ;;  %v4484_v32 = vpack.c.bf16 %v4457_v59, %v4456_v57 }
 0x505   : > { %5529 = vmatprep.mubr.bf16.mxu1 %v4907_v52  ;;  %v4843_v8 = vsel %vm4688_vm4, %v4293_v12, %v4621_v0  ;;  %v4374_v0 = vld [vmem:[#allocation3 + $0x138] sm:$0xff]  ;;  %v4375_v52 = vld [vmem:[#allocation3 + $0x140] sm:$0xff] }
 0x506   : > { %v4395_v29 = vpack.c.bf16 %v4375_v52, %v4374_v0 }
 0x507   : > { %v4581_v53 = vpop.permute.xlu0 %4580 }
 0x508   : > { %v4533_v47 = vpop.permute.xlu1 %4532  ;;  %v4795_v26 = vsel %vm4688_vm4, %v8700_v40, %v4581_v53  ;;  %v4271_v40 = vld [vmem:[#allocation3 + $0xd9] sm:$0xff]  ;;  %v4458_v53 = vld [vmem:[#allocation3 + $0xaa] sm:$0xff] }
 0x509   : > { %5400 = vmatprep.mubr.bf16.mxu0 %v4795_v26  ;;  %5530 = vmatmul.mubr.bf16.gmra.mrb[40].mxu1 %v4843_v8  ;;  %v4731_v23 = vsel %vm4688_vm4, %v4104_v31, %v4533_v47  ;;  %v4295_v11 = vpack.c.bf16 %v4272_v37, %v4271_v40  ;;  %v4460_v26 = vld [vmem:[#allocation3 + $0xc2] sm:$0xff]  ;;  %v4485_v6 = vpack.c.bf16 %v4459_v38, %v4458_v53 }
 0x50a   : > { %5401 = vmatmul.mubr.bf16.gmra.mrb[40].mxu0 %v4731_v23  ;;  %v4461_v23 = vld [vmem:[#allocation3 + $0xca] sm:$0xff]  ;;  %v4463_v40 = vld [vmem:[#allocation3 + $0xe2] sm:$0xff]  ;;  %v4396_v37 = vpack.c.bf16 %v4377_v58, %v4376_v10 }
 0x50b   : > { %v4671_v4 = vpop.permute.xlu0 %4670  ;;  %v4479_v38 = vld [vmem:[#allocation3 + $0x1a2] sm:$0xff] }
 0x50c   : > { %v4623_v3 = vpop.permute.xlu1 %4622  ;;  %v4911_v48 = vsel %vm4688_vm4, %v4103_v17, %v4671_v4  ;;  %v4373_v17 = vld [vmem:[#allocation3 + $0x128] sm:$0xff] }
 0x50d   : > { %5537 = vmatprep.mubr.bf16.mxu1 %v4911_v48  ;;  %v4847_v54 = vsel %vm4688_vm4, %v4294_v7, %v4623_v3  ;;  %v4394_v15 = vpack.c.bf16 %v4373_v17, %v4372_v18  ;;  %v4277_v4 = vld [vmem:[#allocation3 + $0x121] sm:$0xff]  ;;  %v4278_v3 = vld [vmem:[#allocation3 + $0x129] sm:$0xff]  ;;  %v4486_v48 = vpack.c.bf16 %v4461_v23, %v4460_v26  ;;  %v4281_v18 = vld [vmem:[#allocation3 + $0x151] sm:$0xff] }
 0x50e   : > { %v4282_v17 = vld [vmem:[#allocation3 + $0x159] sm:$0xff] }
 0x50f   : > { %v4583_v63 = vpop.permute.xlu0 %4582  ;;  %v4300_v62 = vpack.c.bf16 %v4282_v17, %v4281_v18 }
 0x510   : > { %v4535_v44 = vpop.permute.xlu1 %4534  ;;  %v4799_v19 = vsel %vm4688_vm4, %v8705_v41, %v4583_v63  ;;  %v4462_v63 = vld [vmem:[#allocation3 + $0xda] sm:$0xff] }
 0x511   : > { %5408 = vmatprep.mubr.bf16.mxu0 %v4799_v19  ;;  %5538 = vmatmul.mubr.bf16.gmra.mrb[44].mxu1 %v4847_v54  ;;  %v4735_v33 = vsel %vm4688_vm4, %v4105_v45, %v4535_v44  ;;  %v4464_v44 = vld [vmem:[#allocation3 + $0xf2] sm:$0xff]  ;;  %v4465_v19 = vld [vmem:[#allocation3 + $0xfa] sm:$0xff] }
 0x512   : > { %5409 = vmatmul.mubr.bf16.gmra.mrb[44].mxu0 %v4735_v33 }
 0x513   : > { %v4673_v20 = vpop.permute.xlu0 %4672  ;;  %7010 = vmatprep.mubr.msk.bf16.mxu0 %vm4688_vm4, %v4480_v30 }
 0x514   : > { %v4625_v42 = vpop.permute.xlu1 %4624  ;;  %v4915_v50 = vsel %vm4688_vm4, %v4104_v31, %v4673_v20  ;;  %v4297_v31 = vpack.c.bf16 %v4276_v60, %v4275_v39  ;;  %v4382_v39 = vld [vmem:[#allocation3 + $0x198] sm:$0xff]  ;;  %v4383_v60 = vld [vmem:[#allocation3 + $0x1a0] sm:$0xff] }
 0x515   : > { %5545 = vmatprep.mubr.bf16.mxu1 %v4915_v50  ;;  %v4851_v27 = vsel %vm4688_vm4, %v4295_v11, %v4625_v42  ;;  %v4487_v11 = vpack.c.bf16 %v4463_v40, %v4462_v63  ;;  %v4488_v42 = vpack.c.bf16 %v4465_v19, %v4464_v44  ;;  %v4378_v50 = vld [vmem:[#allocation3 + $0x168] sm:$0xff]  ;;  %v4399_v0 = vpack.c.bf16 %v4383_v60, %v4382_v39 }
 0x517   : > { %v4675_v61 = vpop.permute.xlu0 %4674 }
 0x518   : > { %v4919_v2 = vsel %vm4688_vm4, %v4105_v45, %v4675_v61  ;;  %v4627_v35 = vpop.permute.xlu1 %4626  ;;  %v4298_v45 = vpack.c.bf16 %v4278_v3, %v4277_v4 }
 0x519   : > { %5546 = vmatmul.mubr.bf16.gmra.mrb[48].mxu1 %v4851_v27  ;;  %v4855_v14 = vsel %vm4688_vm4, %v4296_v36, %v4627_v35  ;;  %v4490_v36 = vpack.c.bf16 %v4469_v34, %v4468_v28  ;;  %v4380_v35 = vld [vmem:[#allocation3 + $0x180] sm:$0xff] }
 0x51a   : > { %7011 = vmatmul.mubr.msk.bf16.vlgmr.msra.gmra.mrb[48].mxu0 %vm4688_vm4, %v4481_v49  ;;  %5553 = vmatprep.mubr.bf16.mxu1 %v4919_v2  ;;  %v4397_v49 = vpack.c.bf16 %v4379_v25, %v4378_v50 }
 0x51b   : > { %7014 = vmatprep.mubr.msk.bf16.mxu0 %vm4688_vm4, %v4482_v1  ;;  %v4677_v16 = vpop.permute.xlu0 %4676 }
 0x51c   : > { %v4923_v12 = vsel %vm4688_vm4, %v4394_v15, %v4677_v16  ;;  %v4629_v8 = vpop.permute.xlu1 %4628  ;;  %v4398_v16 = vpack.c.bf16 %v4381_v55, %v4380_v35 }
 0x51d   : > { %v4859_v7 = vsel %vm4688_vm4, %v4297_v31, %v4629_v8 }
 0x51f   : > { %v4679_v47 = vpop.permute.xlu0 %4678 }
 0x520   : > { %v4927_v13 = vsel %vm4688_vm4, %v4395_v29, %v4679_v47  ;;  %v4631_v54 = vpop.permute.xlu1 %4630 }
 0x521   : > { %5554 = vmatmul.mubr.bf16.gmra.mrb[52].mxu1 %v4855_v14  ;;  %v4863_v33 = vsel %vm4688_vm4, %v4298_v45, %v4631_v54 }
 0x522   : > { %7015 = vmatmul.mubr.msk.bf16.gmra.mrb[52].mxu0 %vm4688_vm4, %v4483_v43  ;;  %5561 = vmatprep.mubr.bf16.mxu1 %v4923_v12  ;;  %v4283_v43 = vld [vmem:[#allocation3 + $0x169] sm:$0xff]  ;;  %v4284_v12 = vld [vmem:[#allocation3 + $0x171] sm:$0xff] }
 0x523   : > { %7018 = vmatprep.mubr.msk.bf16.mxu0 %vm4688_vm4, %v4484_v32  ;;  %v4681_v30 = vpop.permute.xlu0 %4680 }
 0x524   : > { %v4931_v20 = vsel %vm4688_vm4, %v4396_v37, %v4681_v30  ;;  %v4633_v27 = vpop.permute.xlu1 %4632 }
 0x525   : > { %v4867_v1 = vsel %vm4688_vm4, %v4299_v9, %v4633_v27 }
 0x527   : > { %v4683_v61 = vpop.permute.xlu0 %4682 }
 0x528   : > { %v4935_v2 = vsel %vm4688_vm4, %v4397_v49, %v4683_v61  ;;  %v4635_v15 = vpop.permute.xlu1 %4634 }
 0x529   : > { %5562 = vmatmul.mubr.bf16.gmra.mrb[56].mxu1 %v4859_v7  ;;  %v4871_v59 = vsel %vm4688_vm4, %v4300_v62, %v4635_v15 }
 0x52a   : > { %7019 = vmatmul.mubr.msk.bf16.gmra.mrb[56].mxu0 %vm4688_vm4, %v4485_v6  ;;  %5569 = vmatprep.mubr.bf16.mxu1 %v4927_v13 }
 0x52b   : > { %7022 = vmatprep.mubr.msk.bf16.mxu0 %vm4688_vm4, %v4486_v48  ;;  %v4685_v57 = vpop.permute.xlu0 %4684 }
 0x52c   : > { %v4939_v14 = vsel %vm4688_vm4, %v4398_v16, %v4685_v57 }
 0x52e   : > { %v4637_v32 = vpop.permute.xlu1 %4636 }
 0x52f   : > { %v4687_v52 = vpop.permute.xlu0 %4686 }
 0x530   : > { %v4943_v8 = vsel %vm4688_vm4, %v4399_v0, %v4687_v52 }
 0x531   : > { %5570 = vmatmul.mubr.bf16.gmra.mrb[60].mxu1 %v4863_v33 }
 0x532   : > { %7023 = vmatmul.mubr.msk.bf16.gmra.mrb[60].mxu0 %vm4688_vm4, %v4487_v11  ;;  %5577 = vmatprep.mubr.bf16.mxu1 %v4931_v20  ;;  %v4639_v53 = vpop.permute.xlu1 %4638 }
 0x533   : > { %7026 = vmatprep.mubr.msk.bf16.mxu0 %vm4688_vm4, %v4488_v42 }
 0x539   : > { %5578 = vmatmul.mubr.bf16.gmra.mrb[64].mxu1 %v4867_v1 }
 0x53a   : > { %7027 = vmatmul.mubr.msk.bf16.gmra.mrb[64].mxu0 %vm4688_vm4, %v8705_v41  ;;  %5585 = vmatprep.mubr.bf16.mxu1 %v4935_v2  ;;  %v4301_v41 = vpack.c.bf16 %v4284_v12, %v4283_v43  ;;  %v8892_v43 = vld [vmem:[%s7362_s8] ss:$0 sm:$0xff] }
 0x53b   : > { %7030 = vmatprep.mubr.msk.bf16.mxu0 %vm4688_vm4, %v4490_v36 }
 0x53c   : > { %v4875_v31 = vsel %vm4688_vm4, %v4301_v41, %v4637_v32 }
 0x541   : > { %5586 = vmatmul.mubr.bf16.gmra.mrb[68].mxu1 %v4871_v59 }
 0x542   : > { %7031 = vmatmul.mubr.msk.bf16.gmra.mrb[68].mxu0 %vm4688_vm4, %v8714_v21  ;;  %5593 = vmatprep.mubr.bf16.mxu1 %v4939_v14  ;;  %v4478_v21 = vld [vmem:[#allocation3 + $0x19a] sm:$0xff] }
 0x543   : > { %7034 = vmatprep.mubr.msk.bf16.mxu0 %vm4688_vm4, %v8721_v22  ;;  %v4879_v22 = vsel %vm4688_vm4, %v8726_v51, %v4639_v53  ;;  %v4495_v29 = vpack.c.bf16 %v4479_v38, %v4478_v21 }
 0x549   : > { %5594 = vmatmul.mubr.bf16.gmra.mrb[72].mxu1 %v4875_v31 }
 0x54a   : > { %7035 = vmatmul.mubr.msk.bf16.gmra.mrb[72].mxu0 %vm4688_vm4, %v8738_v56  ;;  %5601 = vmatprep.mubr.bf16.mxu1 %v4943_v8 }
 0x54b   : > { %7038 = vmatprep.mubr.msk.bf16.mxu0 %vm4688_vm4, %v8746_v24 }
 0x551   : > { %5602 = vmatmul.mubr.bf16.gmra.mrb[76].mxu1 %v4879_v22 }
 0x552   : > { %7039 = vmatmul.mubr.msk.bf16.gmra.mrb[76].mxu0 %vm4688_vm4, %v4495_v29 }
 0x58c   : > { %v6766_v47 = vpop.f32.mrb[0].mxu1 }
 0x58d   : > { %v6694_v26 = vpop.f32.mrb[0].mxu0  ;;  %v6767_v23 = vpop.f32.mrb[1].mxu1 }
 0x58e   : > { %v8875_v7 = vadd.f32 %v6767_v23, %v6766_v47  ;;  %v6695_v56 = vpop.f32.mrb[1].mxu0  ;;  %v6769_v6 = vpop.f32.mrb[2].mxu1 }
 0x58f   : > { %v6696_v13 = vadd.f32 %v6695_v56, %v6694_v26  ;;  %v6697_v4 = vpop.f32.mrb[2].mxu0  ;;  %v6770_v3 = vpop.f32.mrb[3].mxu1 }
 0x590   : > { %v8877_v24 = vadd.f32 %v6770_v3, %v6769_v6  ;;  %v6698_v48 = vpop.f32.mrb[3].mxu0 }
 0x591   : > { %v6699_v10 = vadd.f32 %v6698_v48, %v6697_v4  ;;  %v5323_v60 = vadd.f32 %v6696_v13, %v8892_v43 }
 0x593   : > { %v5326_v53 = vadd.f32 %v6699_v10, %v8892_v43 }
 0x594   : > { %v6772_v58 = vpop.f32.mrb[4].mxu1 }
 0x595   : > { %v6700_v51 = vpop.f32.mrb[4].mxu0  ;;  %v6773_v45 = vpop.f32.mrb[5].mxu1 }
 0x596   : > { %v8879_v54 = vadd.f32 %v6773_v45, %v6772_v58  ;;  %v6701_v63 = vpop.f32.mrb[5].mxu0  ;;  %v6775_v40 = vpop.f32.mrb[6].mxu1 }
 0x597   : > { %v6702_v37 = vadd.f32 %v6701_v63, %v6700_v51  ;;  %v6703_v30 = vpop.f32.mrb[6].mxu0  ;;  %v6776_v44 = vpop.f32.mrb[7].mxu1 }
 0x598   : > { %v8881_v19 = vadd.f32 %v6776_v44, %v6775_v40  ;;  %v6704_v33 = vpop.f32.mrb[7].mxu0 }
 0x599   : > { %v6705_v11 = vadd.f32 %v6704_v33, %v6703_v30  ;;  %v5331_v6 = vadd.f32 %v6702_v37, %v8892_v43 }
 0x59b   : > { %v5334_v10 = vadd.f32 %v6705_v11, %v8892_v43 }
 0x59c   : > { %v6778_v20 = vpop.f32.mrb[8].mxu1 }
 0x59d   : > { %v6706_v5 = vpop.f32.mrb[8].mxu0  ;;  %v6779_v46 = vpop.f32.mrb[9].mxu1 }
 0x59e   : > { %v8883_v42 = vadd.f32 %v6779_v46, %v6778_v20  ;;  %v6707_v50 = vpop.f32.mrb[9].mxu0  ;;  %v6781_v25 = vpop.f32.mrb[10].mxu1 }
 0x59f   : > { %v6708_v9 = vadd.f32 %v6707_v50, %v6706_v5  ;;  %v6709_v27 = vpop.f32.mrb[10].mxu0  ;;  %v6782_v49 = vpop.f32.mrb[11].mxu1 }
 0x5a0   : > { %v8885_v61 = vadd.f32 %v6782_v49, %v6781_v25  ;;  %v6710_v28 = vpop.f32.mrb[11].mxu0 }
 0x5a1   : > { %v6711_v34 = vadd.f32 %v6710_v28, %v6709_v27  ;;  %v5339_v37 = vadd.f32 %v6708_v9, %v8892_v43 }
 0x5a3   : > { %v5342_v11 = vadd.f32 %v6711_v34, %v8892_v43 }
 0x5a4   : > { %v6784_v1 = vpop.f32.mrb[12].mxu1 }
 0x5a5   : > { %v6712_v2 = vpop.f32.mrb[12].mxu0  ;;  %v6785_v18 = vpop.f32.mrb[13].mxu1 }
 0x5a6   : > { %v8887_v17 = vadd.f32 %v6785_v18, %v6784_v1  ;;  %v6713_v36 = vpop.f32.mrb[13].mxu0  ;;  %v6787_v35 = vpop.f32.mrb[14].mxu1 }
 0x5a7   : > { %v6714_v55 = vadd.f32 %v6713_v36, %v6712_v2  ;;  %v6715_v62 = vpop.f32.mrb[14].mxu0  ;;  %v6788_v15 = vpop.f32.mrb[15].mxu1 }
 0x5a8   : > { %v8889_v16 = vadd.f32 %v6788_v15, %v6787_v35  ;;  %v6716_v57 = vpop.f32.mrb[15].mxu0 }
 0x5a9   : > { %v6717_v59 = vadd.f32 %v6716_v57, %v6715_v62  ;;  %v5347_v9 = vadd.f32 %v6714_v55, %v8892_v43 }
 0x5ab   : > { %v5350_v34 = vadd.f32 %v6717_v59, %v8892_v43 }
 0x5ac   : > { %v6806_v14 = vpop.f32.mrb[16].mxu1 }
 0x5ad   : > { %v6718_v12 = vpop.f32.mrb[16].mxu0  ;;  %v6807_v39 = vpop.f32.mrb[17].mxu1 }
 0x5ae   : > { %v6808_v41 = vadd.f32 %v6807_v39, %v6806_v14  ;;  %v6719_v32 = vpop.f32.mrb[17].mxu0  ;;  %v6809_v0 = vpop.f32.mrb[18].mxu1 }
 0x5af   : > { %v6720_v52 = vadd.f32 %v6719_v32, %v6718_v12  ;;  %v6721_v31 = vpop.f32.mrb[18].mxu0  ;;  %v6810_v8 = vpop.f32.mrb[19].mxu1 }
 0x5b0   : > { %v6811_v21 = vadd.f32 %v6810_v8, %v6809_v0  ;;  %v6722_v38 = vpop.f32.mrb[19].mxu0  ;;  %v8896_v22 = vadd.f32 %v6808_v41, %v5323_v60 }
 0x5b1   : > { %v6723_v29 = vadd.f32 %v6722_v38, %v6721_v31  ;;  %v5355_v55 = vadd.f32 %v6720_v52, %v8892_v43 }
 0x5b2   : > { %v8898_v47 = vadd.f32 %v6811_v21, %v5326_v53 }
 0x5b3   : > { %v5358_v59 = vadd.f32 %v6723_v29, %v8892_v43 }
 0x5b4   : > { %v6812_v26 = vpop.f32.mrb[20].mxu1 }
 0x5b5   : > { %v6724_v23 = vpop.f32.mrb[20].mxu0  ;;  %v6813_v56 = vpop.f32.mrb[21].mxu1 }
 0x5b6   : > { %v6814_v13 = vadd.f32 %v6813_v56, %v6812_v26  ;;  %v6725_v4 = vpop.f32.mrb[21].mxu0  ;;  %v6815_v3 = vpop.f32.mrb[22].mxu1 }
 0x5b7   : > { %v6726_v48 = vadd.f32 %v6725_v4, %v6724_v23  ;;  %v6727_v58 = vpop.f32.mrb[22].mxu0  ;;  %v6816_v51 = vpop.f32.mrb[23].mxu1 }
 0x5b8   : > { %v6817_v45 = vadd.f32 %v6816_v51, %v6815_v3  ;;  %v6728_v63 = vpop.f32.mrb[23].mxu0  ;;  %v8902_v40 = vadd.f32 %v6814_v13, %v5331_v6 }
 0x5b9   : > { %v6729_v30 = vadd.f32 %v6728_v63, %v6727_v58  ;;  %v5363_v52 = vadd.f32 %v6726_v48, %v8892_v43 }
 0x5ba   : > { %v8904_v44 = vadd.f32 %v6817_v45, %v5334_v10 }
 0x5bb   : > { %v5366_v29 = vadd.f32 %v6729_v30, %v8892_v43 }
 0x5bc   : > { %v6818_v33 = vpop.f32.mrb[24].mxu1 }
 0x5bd   : > { %v6730_v20 = vpop.f32.mrb[24].mxu0  ;;  %v6819_v5 = vpop.f32.mrb[25].mxu1 }
 0x5be   : > { %v6820_v46 = vadd.f32 %v6819_v5, %v6818_v33  ;;  %v6731_v50 = vpop.f32.mrb[25].mxu0  ;;  %v6821_v25 = vpop.f32.mrb[26].mxu1 }
 0x5bf   : > { %v6732_v27 = vadd.f32 %v6731_v50, %v6730_v20  ;;  %v6733_v49 = vpop.f32.mrb[26].mxu0  ;;  %v6822_v28 = vpop.f32.mrb[27].mxu1 }
 0x5c0   : > { %v6823_v1 = vadd.f32 %v6822_v28, %v6821_v25  ;;  %v6734_v2 = vpop.f32.mrb[27].mxu0  ;;  %v8908_v18 = vadd.f32 %v6820_v46, %v5339_v37 }
 0x5c1   : > { %v6735_v36 = vadd.f32 %v6734_v2, %v6733_v49 }
 0x5c2   : > { %v8910_v35 = vadd.f32 %v6823_v1, %v5342_v11 }
 0x5c4   : > { %v6824_v62 = vpop.f32.mrb[28].mxu1 }
 0x5c5   : > { %v6736_v15 = vpop.f32.mrb[28].mxu0  ;;  %v6825_v57 = vpop.f32.mrb[29].mxu1 }
 0x5c6   : > { %v6826_v14 = vadd.f32 %v6825_v57, %v6824_v62  ;;  %v6737_v12 = vpop.f32.mrb[29].mxu0  ;;  %v6827_v39 = vpop.f32.mrb[30].mxu1 }
 0x5c7   : > { %v6738_v60 = vadd.f32 %v6737_v12, %v6736_v15  ;;  %v6739_v41 = vpop.f32.mrb[30].mxu0  ;;  %v6828_v32 = vpop.f32.mrb[31].mxu1  ;;  %v5371_v12 = vadd.f32 %v6732_v27, %v8892_v43 }
 0x5c8   : > { %v6829_v0 = vadd.f32 %v6828_v32, %v6827_v39  ;;  %v6740_v31 = vpop.f32.mrb[31].mxu0  ;;  %v8914_v8 = vadd.f32 %v6826_v14, %v5347_v9 }
 0x5c9   : > { %v6741_v53 = vadd.f32 %v6740_v31, %v6739_v41  ;;  %v5374_v31 = vadd.f32 %v6735_v36, %v8892_v43 }
 0x5ca   : > { %v8916_v21 = vadd.f32 %v6829_v0, %v5350_v34 }
 0x5cc   : > { %v6830_v38 = vpop.f32.mrb[32].mxu1 }
 0x5cd   : > { %v6742_v26 = vpop.f32.mrb[32].mxu0  ;;  %v6831_v23 = vpop.f32.mrb[33].mxu1 }
 0x5ce   : > { %v6832_v56 = vadd.f32 %v6831_v23, %v6830_v38  ;;  %v6743_v6 = vpop.f32.mrb[33].mxu0  ;;  %v6833_v13 = vpop.f32.mrb[34].mxu1 }
 0x5cf   : > { %v6744_v4 = vadd.f32 %v6743_v6, %v6742_v26  ;;  %v6745_v3 = vpop.f32.mrb[34].mxu0  ;;  %v6834_v58 = vpop.f32.mrb[35].mxu1 }
 0x5d0   : > { %v6835_v51 = vadd.f32 %v6834_v58, %v6833_v13  ;;  %v6746_v10 = vpop.f32.mrb[35].mxu0  ;;  %v8920_v45 = vadd.f32 %v6832_v56, %v5355_v55 }
 0x5d1   : > { %v6747_v63 = vadd.f32 %v6746_v10, %v6745_v3  ;;  %v5379_v3 = vadd.f32 %v6738_v60, %v8892_v43 }
 0x5d2   : > { %v8922_v33 = vadd.f32 %v6835_v51, %v5358_v59 }
 0x5d4   : > { %v6836_v20 = vpop.f32.mrb[36].mxu1 }
 0x5d5   : > { %v6748_v5 = vpop.f32.mrb[36].mxu0  ;;  %v6837_v37 = vpop.f32.mrb[37].mxu1 }
 0x5d6   : > { %v6838_v46 = vadd.f32 %v6837_v37, %v6836_v20  ;;  %v6749_v50 = vpop.f32.mrb[37].mxu0  ;;  %v6839_v25 = vpop.f32.mrb[38].mxu1 }
 0x5d7   : > { %v8925_v49 = vadd.f32 %v6749_v50, %v6748_v5  ;;  %v6751_v28 = vpop.f32.mrb[38].mxu0  ;;  %v6840_v11 = vpop.f32.mrb[39].mxu1  ;;  %v5382_v5 = vadd.f32 %v6741_v53, %v8892_v43 }
 0x5d8   : > { %v6841_v1 = vadd.f32 %v6840_v11, %v6839_v25  ;;  %v6752_v2 = vpop.f32.mrb[39].mxu0  ;;  %v8928_v62 = vadd.f32 %v6838_v46, %v5363_v52 }
 0x5d9   : > { %v8930_v15 = vadd.f32 %v6752_v2, %v6751_v28 }
 0x5da   : > { %v8932_v57 = vadd.f32 %v6841_v1, %v5366_v29  ;;  %v5773_v29 = vld [vmem:[%s7352_s27 + $0x10] sm:$0xff]  ;;  %v5387_v1 = vadd.f32 %v6744_v4, %v8892_v43 }
 0x5dc   : > { %v6842_v9 = vpop.f32.mrb[40].mxu1 }
 0x5dd   : > { %v6754_v14 = vpop.f32.mrb[40].mxu0  ;;  %v6843_v48 = vpop.f32.mrb[41].mxu1 }
 0x5de   : > { %v6844_v39 = vadd.f32 %v6843_v48, %v6842_v9  ;;  %v6755_v41 = vpop.f32.mrb[41].mxu0  ;;  %v6845_v32 = vpop.f32.mrb[42].mxu1  ;;  %v5771_v48 = vld [vmem:[%s7352_s27] sm:$0xff] }
 0x5df   : > { %v8935_v34 = vadd.f32 %v6755_v41, %v6754_v14  ;;  %v6757_v0 = vpop.f32.mrb[42].mxu0  ;;  %v6846_v30 = vpop.f32.mrb[43].mxu1 }
 0x5e0   : > { %v6847_v38 = vadd.f32 %v6846_v30, %v6845_v32  ;;  %v6758_v26 = vpop.f32.mrb[43].mxu0  ;;  %v8938_v23 = vadd.f32 %v6844_v39, %v5371_v12  ;;  %v5390_v12 = vadd.f32 %v6747_v63, %v8892_v43 }
 0x5e1   : > { %v8940_v55 = vadd.f32 %v6758_v26, %v6757_v0  ;;  %v5774_v0 = vld [vmem:[%s7352_s27 + $0x18] sm:$0xff] }
 0x5e2   : > { %v8942_v56 = vadd.f32 %v6847_v38, %v5374_v31  ;;  %v5772_v38 = vld [vmem:[%s7352_s27 + $0x8] sm:$0xff] }
 0x5e4   : > { %v6848_v6 = vpop.f32.mrb[44].mxu1 }
 0x5e5   : > { %v6760_v13 = vpop.f32.mrb[44].mxu0  ;;  %v6849_v27 = vpop.f32.mrb[45].mxu1 }
 0x5e6   : > { %v6850_v58 = vadd.f32 %v6849_v27, %v6848_v6  ;;  %v6761_v59 = vpop.f32.mrb[45].mxu0  ;;  %v6851_v51 = vpop.f32.mrb[46].mxu1 }
 0x5e7   : > { %v8945_v10 = vadd.f32 %v6761_v59, %v6760_v13  ;;  %v6763_v36 = vpop.f32.mrb[46].mxu0  ;;  %v6852_v20 = vpop.f32.mrb[47].mxu1  ;;  %v5777_v59 = vld [vmem:[%s7352_s27 + $0x30] sm:$0xff] }
 0x5e8   : > { %v6853_v37 = vadd.f32 %v6852_v20, %v6851_v51  ;;  %v6764_v52 = vpop.f32.mrb[47].mxu0  ;;  %v8948_v46 = vadd.f32 %v6850_v58, %v5379_v3 }
 0x5e9   : > { %v8950_v50 = vadd.f32 %v6764_v52, %v6763_v36  ;;  %v5398_v52 = vadd.f32 %v8930_v15, %v8892_v43 }
 0x5ea   : > { %v8952_v25 = vadd.f32 %v6853_v37, %v5382_v5  ;;  %v5775_v37 = vld [vmem:[%s7352_s27 + $0x20] sm:$0xff] }
 0x5ec   : > { %v6854_v60 = vpop.f32.mrb[48].mxu1 }
 0x5ed   : > { %v6855_v28 = vpop.f32.mrb[49].mxu1  ;;  %v7012_v11 = vpop.f32.mrb[48].mxu0 }
 0x5ee   : > { %v6856_v2 = vadd.f32 %v6855_v28, %v6854_v60  ;;  %v5653_v9 = vadd.f32 %v7012_v11, %v8902_v40  ;;  %v6857_v53 = vpop.f32.mrb[50].mxu1  ;;  %v5644_v14 = vpop.f32.mrb[49].mxu0 }
 0x5ef   : > { %v5645_v39 = vadd.f32 %v5644_v14, %v8896_v22  ;;  %v6858_v41 = vpop.f32.mrb[51].mxu1  ;;  %v7013_v32 = vpop.f32.mrb[50].mxu0 }
 0x5f0   : > { %v5805_v4 = vadd.f32 %v5773_v29, %v5653_v9  ;;  %v6859_v30 = vadd.f32 %v6858_v41, %v6857_v53  ;;  %v5656_v31 = vadd.f32 %v7013_v32, %v8904_v44  ;;  %v5647_v40 = vpop.f32.mrb[51].mxu0  ;;  %v8963_v26 = vadd.f32 %v6856_v2, %v5387_v1  ;;  %v5778_v29 = vld [vmem:[%s7352_s27 + $0x38] sm:$0xff]  ;;  %v5776_v9 = vld [vmem:[%s7352_s27 + $0x28] sm:$0xff]  ;;  %v5781_v32 = vld [vmem:[%s7352_s27 + $0x50] sm:$0xff] }
 0x5f1   : > { %v5803_v6 = vadd.f32 %v5771_v48, %v5645_v39  ;;  %v5648_v63 = vadd.f32 %v5647_v40, %v8898_v47  ;;  %v5395_v47 = vadd.f32 %v8925_v49, %v8892_v43  ;;  %v5779_v40 = vld [vmem:[%s7352_s27 + $0x40] sm:$0xff] }
 0x5f2   : > { %5838 = vst.msk [vmem:[%s7372_s14 + $0x10] sm:$0xff] %vm5835_vm5, %v5805_v4  ;;  %v5806_v22 = vadd.f32 %v5774_v0, %v5656_v31  ;;  %v8968_v13 = vadd.f32 %v6859_v30, %v5390_v12 }
 0x5f3   : > { %5836 = vst.msk [vmem:[%s7372_s14] sm:$0xff] %vm5835_vm5, %v5803_v6  ;;  %v5804_v27 = vadd.f32 %v5772_v38, %v5648_v63  ;;  %v5406_v38 = vadd.f32 %v8940_v55, %v8892_v43 }
 0x5f4   : > { %5839 = vst.msk [vmem:[%s7372_s14 + $0x18] sm:$0xff] %vm5835_vm5, %v5806_v22  ;;  %v6860_v44 = vpop.f32.mrb[52].mxu1 }
 0x5f5   : > { %5837 = vst.msk [vmem:[%s7372_s14 + $0x8] sm:$0xff] %vm5835_vm5, %v5804_v27  ;;  %v6861_v3 = vpop.f32.mrb[53].mxu1  ;;  %v7016_v58 = vpop.f32.mrb[52].mxu0  ;;  %v5782_v27 = vld [vmem:[%s7352_s27 + $0x58] sm:$0xff] }
 0x5f6   : > { %v6862_v51 = vadd.f32 %v6861_v3, %v6860_v44  ;;  %v5669_v36 = vadd.f32 %v7016_v58, %v8914_v8  ;;  %v6863_v20 = vpop.f32.mrb[54].mxu1  ;;  %v5660_v5 = vpop.f32.mrb[53].mxu0  ;;  %v5780_v58 = vld [vmem:[%s7352_s27 + $0x48] sm:$0xff] }
 0x5f7   : > { %v5661_v60 = vadd.f32 %v5660_v5, %v8908_v18  ;;  %v6864_v28 = vpop.f32.mrb[55].mxu1  ;;  %v7017_v11 = vpop.f32.mrb[54].mxu0 }
 0x5f8   : > { %v5809_v1 = vadd.f32 %v5777_v59, %v5669_v36  ;;  %v6865_v49 = vadd.f32 %v6864_v28, %v6863_v20  ;;  %v5672_v2 = vadd.f32 %v7017_v11, %v8916_v21  ;;  %v5663_v8 = vpop.f32.mrb[55].mxu0  ;;  %v8987_v53 = vadd.f32 %v6862_v51, %v5395_v47 }
 0x5f9   : > { %v5807_v14 = vadd.f32 %v5775_v37, %v5661_v60  ;;  %v5664_v15 = vadd.f32 %v5663_v8, %v8910_v35  ;;  %v5403_v35 = vadd.f32 %v8935_v34, %v8892_v43  ;;  %v5785_v37 = vld [vmem:[%s7352_s27 + $0x70] sm:$0xff] }
 0x5fa   : > { %5842 = vst.msk [vmem:[%s7372_s14 + $0x30] sm:$0xff] %vm5835_vm5, %v5809_v1  ;;  %v5810_v18 = vadd.f32 %v5778_v29, %v5672_v2  ;;  %v8992_v48 = vadd.f32 %v6865_v49, %v5398_v52  ;;  %v5783_v29 = vld [vmem:[%s7352_s27 + $0x60] sm:$0xff]  ;;  %v5414_v1 = vadd.f32 %v8950_v50, %v8892_v43 }
 0x5fb   : > { %5840 = vst.msk [vmem:[%s7372_s14 + $0x20] sm:$0xff] %vm5835_vm5, %v5807_v14  ;;  %v5808_v12 = vadd.f32 %v5776_v9, %v5664_v15  ;;  %v5786_v9 = vld [vmem:[%s7352_s27 + $0x78] sm:$0xff] }
 0x5fc   : > { %5843 = vst.msk [vmem:[%s7372_s14 + $0x38] sm:$0xff] %vm5835_vm5, %v5810_v18  ;;  %v6866_v21 = vpop.f32.mrb[56].mxu1  ;;  %v5784_v18 = vld [vmem:[%s7352_s27 + $0x68] sm:$0xff] }
 0x5fd   : > { %5841 = vst.msk [vmem:[%s7372_s14 + $0x28] sm:$0xff] %vm5835_vm5, %v5808_v12  ;;  %v6867_v39 = vpop.f32.mrb[57].mxu1  ;;  %v7020_v41 = vpop.f32.mrb[56].mxu0 }
 0x5fe   : > { %v6868_v0 = vadd.f32 %v6867_v39, %v6866_v21  ;;  %v5685_v4 = vadd.f32 %v7020_v41, %v8928_v62  ;;  %v6869_v30 = vpop.f32.mrb[58].mxu1  ;;  %v5676_v31 = vpop.f32.mrb[57].mxu0 }
 0x5ff   : > { %v5677_v6 = vadd.f32 %v5676_v31, %v8920_v45  ;;  %v6870_v63 = vpop.f32.mrb[59].mxu1  ;;  %v7021_v22 = vpop.f32.mrb[58].mxu0 }
 0x600   : > { %v5813_v44 = vadd.f32 %v5781_v32, %v5685_v4  ;;  %v6871_v34 = vadd.f32 %v6870_v63, %v6869_v30  ;;  %v5688_v3 = vadd.f32 %v7021_v22, %v8932_v57  ;;  %v5679_v62 = vpop.f32.mrb[59].mxu0  ;;  %v9011_v59 = vadd.f32 %v6868_v0, %v5403_v35  ;;  %v5789_v0 = vld [vmem:[%s7352_s27 + $0x90] sm:$0xff] }
 0x601   : > { %v5811_v47 = vadd.f32 %v5779_v40, %v5677_v6  ;;  %v5680_v55 = vadd.f32 %v5679_v62, %v8922_v33  ;;  %v5411_v33 = vadd.f32 %v8945_v10, %v8892_v43  ;;  %v5422_v6 = vadd.f32 %v8877_v24, %v8892_v43  ;;  %v5788_v62 = vld [vmem:[%s7352_s27 + $0x88] sm:$0xff] }
 0x602   : > { %5846 = vst.msk [vmem:[%s7372_s14 + $0x50] sm:$0xff] %vm5835_vm5, %v5813_v44  ;;  %v5814_v45 = vadd.f32 %v5782_v27, %v5688_v3  ;;  %v9016_v51 = vadd.f32 %v6871_v34, %v5406_v38  ;;  %v5787_v38 = vld [vmem:[%s7352_s27 + $0x80] sm:$0xff]  ;;  %v5790_v44 = vld [vmem:[%s7352_s27 + $0x98] sm:$0xff] }
 0x603   : > { %5844 = vst.msk [vmem:[%s7372_s14 + $0x40] sm:$0xff] %vm5835_vm5, %v5811_v47  ;;  %v5812_v36 = vadd.f32 %v5780_v58, %v5680_v55 }
 0x604   : > { %5847 = vst.msk [vmem:[%s7372_s14 + $0x58] sm:$0xff] %vm5835_vm5, %v5814_v45  ;;  %v6872_v57 = vpop.f32.mrb[60].mxu1 }
 0x605   : > { %5845 = vst.msk [vmem:[%s7372_s14 + $0x48] sm:$0xff] %vm5835_vm5, %v5812_v36  ;;  %v6873_v20 = vpop.f32.mrb[61].mxu1  ;;  %v7024_v5 = vpop.f32.mrb[60].mxu0 }
 0x606   : > { %v6874_v52 = vadd.f32 %v6873_v20, %v6872_v57  ;;  %v5701_v60 = vadd.f32 %v7024_v5, %v8948_v46  ;;  %v6875_v28 = vpop.f32.mrb[62].mxu1  ;;  %v5692_v11 = vpop.f32.mrb[61].mxu0  ;;  %v5793_v20 = vld [vmem:[%s7352_s27 + $0xb0] sm:$0xff] }
 0x607   : > { %v5693_v49 = vadd.f32 %v5692_v11, %v8938_v23  ;;  %v6876_v2 = vpop.f32.mrb[63].mxu1  ;;  %v7025_v8 = vpop.f32.mrb[62].mxu0 }
 0x608   : > { %v5817_v14 = vadd.f32 %v5785_v37, %v5701_v60  ;;  %v6877_v10 = vadd.f32 %v6876_v2, %v6875_v28  ;;  %v5704_v15 = vadd.f32 %v7025_v8, %v8952_v25  ;;  %v5695_v46 = vpop.f32.mrb[63].mxu0  ;;  %v5572_v12 = vadd.f32 %v6874_v52, %v5411_v33  ;;  %v5791_v60 = vld [vmem:[%s7352_s27 + $0xa0] sm:$0xff] }
 0x609   : > { %v5815_v21 = vadd.f32 %v5783_v29, %v5693_v49  ;;  %v5696_v39 = vadd.f32 %v5695_v46, %v8942_v56  ;;  %v5419_v56 = vadd.f32 %v8875_v7, %v8892_v43  ;;  %v5430_v28 = vadd.f32 %v8881_v19, %v8892_v43  ;;  %v5794_v49 = vld [vmem:[%s7352_s27 + $0xb8] sm:$0xff] }
 0x60a   : > { %5850 = vst.msk [vmem:[%s7372_s14 + $0x70] sm:$0xff] %vm5835_vm5, %v5817_v14  ;;  %v5818_v23 = vadd.f32 %v5786_v9, %v5704_v15  ;;  %v5575_v50 = vadd.f32 %v6877_v10, %v5414_v1  ;;  %v5792_v14 = vld [vmem:[%s7352_s27 + $0xa8] sm:$0xff] }
 0x60b   : > { %5848 = vst.msk [vmem:[%s7372_s14 + $0x60] sm:$0xff] %vm5835_vm5, %v5815_v21  ;;  %v5816_v41 = vadd.f32 %v5784_v18, %v5696_v39 }
 0x60c   : > { %5851 = vst.msk [vmem:[%s7372_s14 + $0x78] sm:$0xff] %vm5835_vm5, %v5818_v23  ;;  %v6878_v32 = vpop.f32.mrb[64].mxu1  ;;  %v5797_v23 = vld [vmem:[%s7352_s27 + $0xd0] sm:$0xff] }
 0x60d   : > { %5849 = vst.msk [vmem:[%s7372_s14 + $0x68] sm:$0xff] %vm5835_vm5, %v5816_v41  ;;  %v6879_v25 = vpop.f32.mrb[65].mxu1  ;;  %v7028_v35 = vpop.f32.mrb[64].mxu0 }
 0x60e   : > { %v6880_v4 = vadd.f32 %v6879_v25, %v6878_v32  ;;  %v5717_v30 = vadd.f32 %v7028_v35, %v8987_v53  ;;  %v6881_v31 = vpop.f32.mrb[66].mxu1  ;;  %v5708_v40 = vpop.f32.mrb[65].mxu0  ;;  %v5795_v35 = vld [vmem:[%s7352_s27 + $0xc0] sm:$0xff] }
 0x60f   : > { %v5709_v63 = vadd.f32 %v5708_v40, %v8963_v26  ;;  %v6882_v22 = vpop.f32.mrb[67].mxu1  ;;  %v7029_v27 = vpop.f32.mrb[66].mxu0 }
 0x610   : > { %v5821_v34 = vadd.f32 %v5789_v0, %v5717_v30  ;;  %v6883_v7 = vadd.f32 %v6882_v22, %v6881_v31  ;;  %v5720_v3 = vadd.f32 %v7029_v27, %v8992_v48  ;;  %v5711_v53 = vpop.f32.mrb[67].mxu0  ;;  %v5580_v58 = vadd.f32 %v6880_v4, %v5419_v56  ;;  %v5798_v31 = vld [vmem:[%s7352_s27 + $0xd8] sm:$0xff] }
 0x611   : > { %v5819_v47 = vadd.f32 %v5787_v38, %v5709_v63  ;;  %v5712_v55 = vadd.f32 %v5711_v53, %v8968_v13  ;;  %v5427_v13 = vadd.f32 %v8879_v54, %v8892_v43  ;;  %v5438_v0 = vadd.f32 %v8885_v61, %v8892_v43  ;;  %v5796_v63 = vld [vmem:[%s7352_s27 + $0xc8] sm:$0xff] }
 0x612   : > { %5854 = vst.msk [vmem:[%s7372_s14 + $0x90] sm:$0xff] %vm5835_vm5, %v5821_v34  ;;  %v5822_v24 = vadd.f32 %v5790_v44, %v5720_v3  ;;  %v5583_v26 = vadd.f32 %v6883_v7, %v5422_v6 }
 0x613   : > { %5852 = vst.msk [vmem:[%s7372_s14 + $0x80] sm:$0xff] %vm5835_vm5, %v5819_v47  ;;  %v5820_v45 = vadd.f32 %v5788_v62, %v5712_v55 }
 0x614   : > { %5855 = vst.msk [vmem:[%s7372_s14 + $0x98] sm:$0xff] %vm5835_vm5, %v5822_v24  ;;  %v6884_v36 = vpop.f32.mrb[68].mxu1 }
 0x615   : > { %5853 = vst.msk [vmem:[%s7372_s14 + $0x88] sm:$0xff] %vm5835_vm5, %v5820_v45  ;;  %v6885_v48 = vpop.f32.mrb[69].mxu1  ;;  %v7032_v57 = vpop.f32.mrb[68].mxu0 }
 0x616   : > { %v6886_v5 = vadd.f32 %v6885_v48, %v6884_v36  ;;  %v5733_v37 = vadd.f32 %v7032_v57, %v5572_v12  ;;  %v6887_v33 = vpop.f32.mrb[70].mxu1  ;;  %v5724_v52 = vpop.f32.mrb[69].mxu0  ;;  %v5446_v57 = vadd.f32 %v8889_v16, %v8892_v43 }
 0x617   : > { %v5725_v11 = vadd.f32 %v5724_v52, %v9011_v59  ;;  %v6888_v29 = vpop.f32.mrb[71].mxu1  ;;  %v7033_v1 = vpop.f32.mrb[70].mxu0 }
 0x618   : > { %v5825_v2 = vadd.f32 %v5793_v20, %v5733_v37  ;;  %v6889_v8 = vadd.f32 %v6888_v29, %v6887_v33  ;;  %v5736_v54 = vadd.f32 %v7033_v1, %v5575_v50  ;;  %v5727_v9 = vpop.f32.mrb[71].mxu0  ;;  %v5588_v10 = vadd.f32 %v6886_v5, %v5427_v13  ;;  %v5800_v37 = vld [vmem:[%s7352_s27 + $0xe8] sm:$0xff] }
 0x619   : > { %v5823_v15 = vadd.f32 %v5791_v60, %v5725_v11  ;;  %v5728_v46 = vadd.f32 %v5727_v9, %v9016_v51  ;;  %v5435_v51 = vadd.f32 %v8883_v42, %v8892_v43  ;;  %v5802_v11 = vld [vmem:[%s7352_s27 + $0xf8] sm:$0xff] }
 0x61a   : > { %5858 = vst.msk [vmem:[%s7372_s14 + $0xb0] sm:$0xff] %vm5835_vm5, %v5825_v2  ;;  %v5826_v19 = vadd.f32 %v5794_v49, %v5736_v54  ;;  %v5591_v59 = vadd.f32 %v6889_v8, %v5430_v28 }
 0x61b   : > { %5856 = vst.msk [vmem:[%s7372_s14 + $0xa0] sm:$0xff] %vm5835_vm5, %v5823_v15  ;;  %v5824_v18 = vadd.f32 %v5792_v14, %v5728_v46 }
 0x61c   : > { %5859 = vst.msk [vmem:[%s7372_s14 + $0xb8] sm:$0xff] %vm5835_vm5, %v5826_v19  ;;  %v6890_v12 = vpop.f32.mrb[72].mxu1 }
 0x61d   : > { %5857 = vst.msk [vmem:[%s7372_s14 + $0xa8] sm:$0xff] %vm5835_vm5, %v5824_v18  ;;  %v6891_v21 = vpop.f32.mrb[73].mxu1  ;;  %v7036_v39 = vpop.f32.mrb[72].mxu0 }
 0x61e   : > { %v6892_v50 = vadd.f32 %v6891_v21, %v6890_v12  ;;  %v5749_v41 = vadd.f32 %v7036_v39, %v5588_v10  ;;  %v6893_v32 = vpop.f32.mrb[74].mxu1  ;;  %v5740_v25 = vpop.f32.mrb[73].mxu0 }
 0x61f   : > { %v5741_v56 = vadd.f32 %v5740_v25, %v5580_v58  ;;  %v6894_v4 = vpop.f32.mrb[75].mxu1  ;;  %v7037_v30 = vpop.f32.mrb[74].mxu0  ;;  %v5443_v58 = vadd.f32 %v8887_v17, %v8892_v43  ;;  %v5801_v17 = vld [vmem:[%s7352_s27 + $0xf0] sm:$0xff] }
 0x620   : > { %v5829_v40 = vadd.f32 %v5797_v23, %v5749_v41  ;;  %v6895_v38 = vadd.f32 %v6894_v4, %v6893_v32  ;;  %v5752_v6 = vadd.f32 %v7037_v30, %v5591_v59  ;;  %v5743_v42 = vpop.f32.mrb[75].mxu0  ;;  %v5596_v22 = vadd.f32 %v6892_v50, %v5435_v51 }
 0x621   : > { %v5827_v27 = vadd.f32 %v5795_v35, %v5741_v56  ;;  %v5744_v44 = vadd.f32 %v5743_v42, %v5583_v26  ;;  %v5799_v26 = vld [vmem:[%s7352_s27 + $0xe0] sm:$0xff] }
 0x622   : > { %5862 = vst.msk [vmem:[%s7372_s14 + $0xd0] sm:$0xff] %vm5835_vm5, %v5829_v40  ;;  %v5830_v34 = vadd.f32 %v5798_v31, %v5752_v6  ;;  %v5599_v61 = vadd.f32 %v6895_v38, %v5438_v0 }
 0x623   : > { %5860 = vst.msk [vmem:[%s7372_s14 + $0xc0] sm:$0xff] %vm5835_vm5, %v5827_v27  ;;  %v5828_v7 = vadd.f32 %v5796_v63, %v5744_v44 }
 0x624   : > { %5863 = vst.msk [vmem:[%s7372_s14 + $0xd8] sm:$0xff] %vm5835_vm5, %v5830_v34  ;;  %v6896_v3 = vpop.f32.mrb[76].mxu1 }
 0x625   : > { %5861 = vst.msk [vmem:[%s7372_s14 + $0xc8] sm:$0xff] %vm5835_vm5, %v5828_v7  ;;  %v6897_v53 = vpop.f32.mrb[77].mxu1  ;;  %v7040_v62 = vpop.f32.mrb[76].mxu0 }
 0x626   : > { %v6898_v47 = vadd.f32 %v6897_v53, %v6896_v3  ;;  %v6899_v55 = vpop.f32.mrb[78].mxu1  ;;  %v5756_v24 = vpop.f32.mrb[77].mxu0 }
 0x627   : > { %v5757_v45 = vadd.f32 %v5756_v24, %v5596_v22  ;;  %v6900_v36 = vpop.f32.mrb[79].mxu1  ;;  %v7041_v48 = vpop.f32.mrb[78].mxu0 }
 0x628   : > { %v5604_v20 = vadd.f32 %v6898_v47, %v5443_v58  ;;  %v6901_v13 = vadd.f32 %v6900_v36, %v6899_v55  ;;  %v5759_v5 = vpop.f32.mrb[79].mxu0 }
 0x629   : > { %v5831_v33 = vadd.f32 %v5799_v26, %v5757_v45  ;;  %v5760_v52 = vadd.f32 %v5759_v5, %v5599_v61 }
 0x62a   : > { %v5765_v60 = vadd.f32 %v7040_v62, %v5604_v20  ;;  %v5607_v28 = vadd.f32 %v6901_v13, %v5446_v57 }
 0x62b   : > { %5864 = vst.msk [vmem:[%s7372_s14 + $0xe0] sm:$0xff] %vm5835_vm5, %v5831_v33  ;;  %v5832_v29 = vadd.f32 %v5800_v37, %v5760_v52 }
 0x62c   : > { %v5833_v1 = vadd.f32 %v5801_v17, %v5765_v60  ;;  %v5768_v49 = vadd.f32 %v7041_v48, %v5607_v28 }
 0x62d   : > { %5865 = vst.msk [vmem:[%s7372_s14 + $0xe8] sm:$0xff] %vm5835_vm5, %v5832_v29 }
 0x62e   : > { %5866 = vst.msk [vmem:[%s7372_s14 + $0xf0] sm:$0xff] %vm5835_vm5, %v5833_v1  ;;  %v5834_v16 = vadd.f32 %v5802_v11, %v5768_v49 }
 0x630   : > { %5867 = vst.msk [vmem:[%s7372_s14 + $0xf8] sm:$0xff] %vm5835_vm5, %v5834_v16 }
 0x631 PF: > { %s14_s19 = sadd.s32 1, %s7282_s19   ;;  %s9134_s15 = smov %s7274_s17 }
 0x632   : > { %p11_p1 = scmp.ge.s32.totalorder %s14_s19, 12   ;;  %s9135_s16 = smov %s7278_s18 }
 0x633   : > { %s9136_s17 = smov %s9139_s20  ;;  %s9137_s18 = smov %s9143_s21 }
 0x634   :  { %13 = sbr.rel (!%p11_p1) target bundleno = 3 (0x3), region = 99 }

</bundles_post_ra>
